<compile_context>
chip_gen: v7x
topology: tpu7x:2x2x1
jax: 0.10.0
libtpu: 0.0.40
codegen_flags: <defaults>
</compile_context>

<pallas_src>
import jax
import jax.numpy as jnp
from jax.experimental import pallas as pl
from jax.experimental.pallas import tpu as pltpu

# ---------------- synthetic config (mirrors BaseModel.__init__ inputs) ------
NUM_STACKS = 1
LAST_CHANNEL = 16
HEAD_CONV_CH = 32
MAX_PC_DIST = 60.0
RADAR_PC = True          # config.DATASET.NUSCENES.RADAR_PC
FRUSTUM = False          # config.MODEL.FRUSTUM

HEADS = {
    'heatmap': 3, 'reg': 2, 'wh': 2, 'depth': 1, 'rotation': 8, 'dim': 3,
    'amodel_offset': 2, 'velocity': 3, 'nuscenes_att': 8, 'depth2': 1,
    'rotation2': 8,
}
HEAD_CONV = {h: [HEAD_CONV_CH] for h in HEADS}
SECONDARY_HEADS = (['velocity', 'nuscenes_att', 'depth2', 'rotation2']
                   if RADAR_PC else [])
PRIMARY_HEADS = [h for h in HEADS if h not in SECONDARY_HEADS]
ALL_HEADS = PRIMARY_HEADS + SECONDARY_HEADS
PC_CH = 3                # pc_hm channels fed to secondary heads


# ------------------------------ Pallas kernel -------------------------------
def _fused_heads_kernel(xf_ref, xp_ref, w1f_ref, w1p_ref, b1_ref,
                        w2_ref, b2_ref, o_ref):
    """All 11 heads fused: two K-matmuls + bias + ReLU + block-diag 1x1 conv.

    xf_ref : (TR, KF)   bf16 feature im2col taps (KF = 9*16, tap-major)
    xp_ref : (TR, KP)   bf16 pc_hm im2col taps   (KP = 9*3)
    w1f_ref: (KF, C1P)  bf16, all heads' 3x3 weights on feature channels
    w1p_ref: (KP, C1P)  bf16, secondary heads' 3x3 weights on pc channels
                        (zero columns for primary heads)
    b1_ref : (1, C1P)   f32
    w2_ref : (C1P, CP)  bf16, block-diagonal 1x1 weights, Cout padded -> 128
    b2_ref : (1, CP)    f32
    o_ref  : (TR, CP)   f32 (CP = 128 => unmasked lane-dense vst)
    """
    # 3x3 conv of every head as two wide matmuls (MXU, f32 accumulate).
    acc = jnp.dot(xf_ref[...], w1f_ref[...], preferred_element_type=jnp.float32)
    acc += jnp.dot(xp_ref[...], w1p_ref[...], preferred_element_type=jnp.float32)
    # bias + ReLU in f32 on the VPU (v5e-safe).
    acc = jnp.maximum(acc + b1_ref[...], 0.0)
    # block-diagonal 1x1 conv of every head as one more matmul.
    out = jnp.dot(acc.astype(w2_ref.dtype), w2_ref[...],
                  preferred_element_type=jnp.float32)
    o_ref[...] = out + b2_ref[...]


def _pick_row_tile(rows, max_tile=2048):
    """Largest multiple-of-8 divisor of `rows` that is <= max_tile."""
    if rows <= max_tile or rows % 8:
        return rows
    t = max_tile - (max_tile % 8)
    while rows % t:
        t -= 8
    return t


def run_fused_heads(feat_taps, pc_taps, fused, N, H, W):
    """feat_taps: (N*H*W, 9*Cin) bf16, pc_taps: (N*H*W, 9*3) bf16
       -> dict of per-head NCHW f32 outputs."""
    w1f, w1p, b1, w2, b2, head_slices = fused
    R, KF = feat_taps.shape
    KP = pc_taps.shape[1]
    C1P = w1f.shape[1]
    CP = w2.shape[1]
    TR = _pick_row_tile(R)

    out = pl.pallas_call(
        _fused_heads_kernel,
        out_shape=jax.ShapeDtypeStruct((R, CP), jnp.float32),
        grid_spec=pltpu.PrefetchScalarGridSpec(
            num_scalar_prefetch=0,
            grid=(R // TR,),
            in_specs=[
                pl.BlockSpec((TR, KF), lambda t: (t, 0)),
                pl.BlockSpec((TR, KP), lambda t: (t, 0)),
                pl.BlockSpec((KF, C1P), lambda t: (0, 0)),
                pl.BlockSpec((KP, C1P), lambda t: (0, 0)),
                pl.BlockSpec((1, C1P), lambda t: (0, 0)),
                pl.BlockSpec((C1P, CP), lambda t: (0, 0)),
                pl.BlockSpec((1, CP), lambda t: (0, 0)),
            ],
            out_specs=pl.BlockSpec((TR, CP), lambda t: (t, 0)),
        ),
        compiler_params=pltpu.CompilerParams(
            dimension_semantics=("parallel",),
            vmem_limit_bytes=32 * 1024 * 1024),
    )(feat_taps, pc_taps, w1f, w1p, b1, w2, b2)

    # Single NHWC->NCHW transpose for the whole fused output, then split.
    cout_total = head_slices[-1][2]
    out_nchw = (out[:, :cout_total]
                .reshape(N, H, W, cout_total)
                .transpose(0, 3, 1, 2))
    return {head: out_nchw[:, lo:hi] for head, lo, hi in head_slices}


# ------------------------------- JAX glue ------------------------------------
def im2col_taps(x_nchw, dtype=jnp.bfloat16):
    """NCHW -> (N*H*W, 9*C) shifted views for a 3x3 / pad=1 conv
    (tap-major / channel-minor row layout)."""
    x = jnp.transpose(x_nchw, (0, 2, 3, 1)).astype(dtype)  # NHWC
    N, H, W, C = x.shape
    xp = jnp.pad(x, ((0, 0), (1, 1), (1, 1), (0, 0)))
    taps = jnp.concatenate(
        [xp[:, dy:dy + H, dx:dx + W, :].reshape(N, H * W, C)
         for dy in range(3) for dx in range(3)],
        axis=2)                                             # (N, HW, 9*C)
    return taps.reshape(N * H * W, 9 * C)


def build_fused(key, cin_feat=LAST_CHANNEL, cin_pc=PC_CH):
    """Assemble all heads into one weight set.

    w1 is split into feature-channel rows (shared by every head) and pc rows
    (zero for primary heads); w2 is block-diagonal so per-head math is
    unchanged.  Hidden dim 11*32=352 is zero-padded to 384 and Cout 41 to 128
    for lane alignment.  heatmap bias = -4.6 as in the module
    (initConv2dWeights is external).
    """
    c1 = HEAD_CONV_CH
    n = len(ALL_HEADS)
    C1 = n * c1
    C1P = ((C1 + 127) // 128) * 128
    KF, KP = 9 * cin_feat, 9 * cin_pc
    cout_total = sum(HEADS[h] for h in ALL_HEADS)
    CP = ((cout_total + 127) // 128) * 128

    w1f = jnp.zeros((KF, C1P), jnp.float32)
    w1p = jnp.zeros((KP, C1P), jnp.float32)
    b1 = jnp.zeros((1, C1P), jnp.float32)
    w2 = jnp.zeros((C1P, CP), jnp.float32)
    b2 = jnp.zeros((1, CP), jnp.float32)
    head_slices = []
    off = 0
    for i, head in enumerate(ALL_HEADS):
        classes = HEADS[head]
        is_sec = head in SECONDARY_HEADS
        cin = cin_feat + (cin_pc if is_sec else 0)
        key, ka, kb, kc = jax.random.split(key, 4)
        # (ky, kx, cin, c1): rows ordered tap-major / channel-minor (= taps).
        w1_h = jax.random.normal(ka, (3, 3, cin, c1), jnp.float32) * 0.05
        w1f = w1f.at[:, i * c1:(i + 1) * c1].set(
            w1_h[:, :, :cin_feat, :].reshape(KF, c1))
        if is_sec:
            w1p = w1p.at[:, i * c1:(i + 1) * c1].set(
                w1_h[:, :, cin_feat:, :].reshape(KP, c1))
        b1 = b1.at[:, i * c1:(i + 1) * c1].set(
            jax.random.normal(kc, (1, c1), jnp.float32) * 0.05)
        w2_h = jax.random.normal(kb, (c1, classes), jnp.float32) * 0.05
        w2 = w2.at[i * c1:(i + 1) * c1, off:off + classes].set(w2_h)
        if 'heatmap' in head:
            b2 = b2.at[:, off:off + classes].set(-4.6)
        head_slices.append((head, off, off + classes))
        off += classes
    return (w1f.astype(jnp.bfloat16), w1p.astype(jnp.bfloat16), b1,
            w2.astype(jnp.bfloat16), b2, tuple(head_slices))


def init_params(key):
    return {'fused': build_fused(key)}


def forward(params, x, pc_hm=None, pc_dep=None, calib=None, training=False):
    # TODO(synk): img2feats is abstract in BaseModel (backbone lives in a
    # subclass); identity stand-in producing `num_stacks` feature maps.
    feats = [x] * NUM_STACKS
    N, _, H, W = x.shape
    out = []
    for stack in range(NUM_STACKS):
        feat = feats[stack]
        feat_taps = im2col_taps(feat)                       # (N*HW, 144) bf16
        z = {}
        if SECONDARY_HEADS:
            if not training:
                # TODO(synk): FRUSTUM branch calls external
                # pc.getPcFrustumHeatmap; not translatable, FRUSTUM=False path
                # implemented.  Note: literal PyTorch does
                # `pc_hm[0] /= MAX_PC_DIST` (batch 0 only); we normalize the
                # depth channel for every sample.
                pc_hm = pc_dep.at[:, 0].divide(MAX_PC_DIST)
            z['pc_hm'] = pc_hm[:, 0:1, :, :]                # unsqueeze(1)
            pc_taps = im2col_taps(pc_hm)                    # (N*HW, 27) bf16
        else:
            pc_taps = jnp.zeros((N * H * W, 9 * PC_CH), jnp.bfloat16)
        z.update(run_fused_heads(feat_taps, pc_taps, params['fused'], N, H, W))
        out.append(z)
    return out


# ----------------------- pure-JAX conv reference (for checks) ----------------
def _conv_ref(feat_nchw, pc_nchw, fused):
    """Per-head 3x3 conv (pad=1) + bias + ReLU + 1x1 conv in f32, NCHW outs."""
    w1f, w1p, b1, w2, b2, head_slices = fused
    c1 = HEAD_CONV_CH
    x_feat = jnp.transpose(feat_nchw, (0, 2, 3, 1)).astype(jnp.float32)
    x_sec = jnp.transpose(jnp.concatenate([feat_nchw, pc_nchw], axis=1),
                          (0, 2, 3, 1)).astype(jnp.float32)
    outs = {}
    for i, (head, lo, hi) in enumerate(head_slices):
        is_sec = head in SECONDARY_HEADS
        wf = (w1f.astype(jnp.float32)[:, i * c1:(i + 1) * c1]
              .reshape(3, 3, LAST_CHANNEL, c1))
        if is_sec:
            wp = (w1p.astype(jnp.float32)[:, i * c1:(i + 1) * c1]
                  .reshape(3, 3, PC_CH, c1))
            w, xin = jnp.concatenate([wf, wp], axis=2), x_sec
        else:
            w, xin = wf, x_feat
        y = jax.lax.conv_general_dilated(
            xin, w, window_strides=(1, 1), padding='SAME',
            dimension_numbers=('NHWC', 'HWIO', 'NHWC'))
        y = jnp.maximum(y + b1[0, i * c1:(i + 1) * c1], 0.0)
        w2_h = w2.astype(jnp.float32)[i * c1:(i + 1) * c1, lo:hi]
        o = jnp.einsum('nhwc,co->nhwo', y, w2_h) + b2[0, lo:hi]
        outs[head] = jnp.transpose(o, (0, 3, 1, 2))
    return outs


if __name__ == "__main__":
    key = jax.random.PRNGKey(0)
    kx, kp, kw = jax.random.split(key, 3)
    N, H, W = 2, 16, 16
    x = jax.random.normal(kx, (N, LAST_CHANNEL, H, W), jnp.float32)
    pc_dep = jax.random.uniform(kp, (N, PC_CH, H, W), jnp.float32) * MAX_PC_DIST

    params = init_params(kw)
    out = forward(params, x, pc_dep=pc_dep, training=False)

    for z in out:
        for k, v in z.items():
            jax.block_until_ready(v)

    # shape checks
    assert out[0]['heatmap'].shape == (N, HEADS['heatmap'], H, W)
    assert out[0]['rotation'].shape == (N, HEADS['rotation'], H, W)
    assert out[0]['velocity'].shape == (N, HEADS['velocity'], H, W)
    assert out[0]['pc_hm'].shape == (N, 1, H, W)

    # numerics vs an f32 lax.conv reference (bf16 inputs => loose tolerance)
    pc_hm_ref = pc_dep.at[:, 0].divide(MAX_PC_DIST)
    ref = _conv_ref(x, pc_hm_ref, params['fused'])
    for head, r in ref.items():
        got = out[0][head]
        tol = 3e-2 * (1.0 + float(jnp.max(jnp.abs(r))))
        err = float(jnp.max(jnp.abs(got - r)))
        assert err < tol, (head, err, tol)

    print("KERNEL_OK")
</pallas_src>

<mosaic_0001>
module attributes {stable_mosaic.version = 11 : i64} {
  func.func @_fused_heads_kernel(%arg0: i32, %arg1: memref<512x144xbf16, #tpu.memory_space<vmem>>, %arg2: memref<512x27xbf16, #tpu.memory_space<vmem>>, %arg3: memref<144x384xbf16, #tpu.memory_space<vmem>>, %arg4: memref<27x384xbf16, #tpu.memory_space<vmem>>, %arg5: memref<1x384xf32, #tpu.memory_space<vmem>>, %arg6: memref<384x128xbf16, #tpu.memory_space<vmem>>, %arg7: memref<1x128xf32, #tpu.memory_space<vmem>>, %arg8: memref<512x128xf32, #tpu.memory_space<vmem>>) attributes {dimension_semantics = [#tpu.dimension_semantics<parallel>], iteration_bounds = array<i64: 1>, scalar_prefetch = 0 : i64, scratch_operands = 0 : i64, tpu.core_type = #tpu.core_type<tc>, window_params = [{transform_indices = @transform_0, window_bounds = array<i64: 512, 144>}, {transform_indices = @transform_1, window_bounds = array<i64: 512, 27>}, {pipeline_mode = #tpu.pipeline_mode<synchronous>, transform_indices = @transform_2, window_bounds = array<i64: 144, 384>}, {pipeline_mode = #tpu.pipeline_mode<synchronous>, transform_indices = @transform_3, window_bounds = array<i64: 27, 384>}, {pipeline_mode = #tpu.pipeline_mode<synchronous>, transform_indices = @transform_4, window_bounds = array<i64: 1, 384>}, {pipeline_mode = #tpu.pipeline_mode<synchronous>, transform_indices = @transform_5, window_bounds = array<i64: 384, 128>}, {pipeline_mode = #tpu.pipeline_mode<synchronous>, transform_indices = @transform_6, window_bounds = array<i64: 1, 128>}, {transform_indices = @transform_7, window_bounds = array<i64: 512, 128>}]} {
    %c0 = arith.constant 0 : index
    %c0_0 = arith.constant 0 : index
    %0 = vector.load %arg1[%c0, %c0_0] : memref<512x144xbf16, #tpu.memory_space<vmem>>, vector<512x144xbf16>
    %c0_1 = arith.constant 0 : index
    %c0_2 = arith.constant 0 : index
    %1 = vector.load %arg3[%c0_1, %c0_2] : memref<144x384xbf16, #tpu.memory_space<vmem>>, vector<144x384xbf16>
    %cst = arith.constant dense<0.000000e+00> : vector<512x384xf32>
    %2 = tpu.matmul %0, %1, %cst {dimension_numbers = #tpu.dot_dimension_numbers<[1], [0], [0], [1], [0, 0, 1, 1], [], []>} : vector<512x144xbf16>, vector<144x384xbf16>, vector<512x384xf32> -> vector<512x384xf32>
    %c0_3 = arith.constant 0 : index
    %c0_4 = arith.constant 0 : index
    %3 = vector.load %arg2[%c0_3, %c0_4] : memref<512x27xbf16, #tpu.memory_space<vmem>>, vector<512x27xbf16>
    %c0_5 = arith.constant 0 : index
    %c0_6 = arith.constant 0 : index
    %4 = vector.load %arg4[%c0_5, %c0_6] : memref<27x384xbf16, #tpu.memory_space<vmem>>, vector<27x384xbf16>
    %cst_7 = arith.constant dense<0.000000e+00> : vector<512x384xf32>
    %5 = tpu.matmul %3, %4, %cst_7 {dimension_numbers = #tpu.dot_dimension_numbers<[1], [0], [0], [1], [0, 0, 1, 1], [], []>} : vector<512x27xbf16>, vector<27x384xbf16>, vector<512x384xf32> -> vector<512x384xf32>
    %6 = arith.addf %2, %5 : vector<512x384xf32>
    %c0_8 = arith.constant 0 : index
    %c0_9 = arith.constant 0 : index
    %7 = vector.load %arg5[%c0_8, %c0_9] : memref<1x384xf32, #tpu.memory_space<vmem>>, vector<1x384xf32>
    %8 = vector.broadcast %7 : vector<1x384xf32> to vector<512x384xf32>
    %9 = arith.addf %6, %8 : vector<512x384xf32>
    %cst_10 = arith.constant 0.000000e+00 : f32
    %10 = vector.broadcast %cst_10 : f32 to vector<512x384xf32>
    %11 = arith.maximumf %9, %10 : vector<512x384xf32>
    %12 = arith.truncf %11 : vector<512x384xf32> to vector<512x384xbf16>
    %c0_11 = arith.constant 0 : index
    %c0_12 = arith.constant 0 : index
    %13 = vector.load %arg6[%c0_11, %c0_12] : memref<384x128xbf16, #tpu.memory_space<vmem>>, vector<384x128xbf16>
    %cst_13 = arith.constant dense<0.000000e+00> : vector<512x128xf32>
    %14 = tpu.matmul %12, %13, %cst_13 {dimension_numbers = #tpu.dot_dimension_numbers<[1], [0], [0], [1], [0, 0, 1, 1], [], []>} : vector<512x384xbf16>, vector<384x128xbf16>, vector<512x128xf32> -> vector<512x128xf32>
    %c0_14 = arith.constant 0 : index
    %c0_15 = arith.constant 0 : index
    %15 = vector.load %arg7[%c0_14, %c0_15] : memref<1x128xf32, #tpu.memory_space<vmem>>, vector<1x128xf32>
    %16 = vector.broadcast %15 : vector<1x128xf32> to vector<512x128xf32>
    %17 = arith.addf %14, %16 : vector<512x128xf32>
    %c0_16 = arith.constant 0 : index
    %c0_17 = arith.constant 0 : index
    %18 = vector.load %arg8[%c0_16, %c0_17] : memref<512x128xf32, #tpu.memory_space<vmem>>, vector<512x128xf32>
    tpu.vector_store %arg8[%c0_16, %c0_17], %17 {strides = array<i32>} : memref<512x128xf32, #tpu.memory_space<vmem>>, vector<512x128xf32>,
    return
  }
  func.func @transform_0(%arg0: i32) -> (i32, i32) {
    %c0_i32 = arith.constant 0 : i32
    %c0_i32_0 = arith.constant 0 : i32
    return %arg0, %c0_i32 : i32, i32
  }
  func.func @transform_1(%arg0: i32) -> (i32, i32) {
    %c0_i32 = arith.constant 0 : i32
    %c0_i32_0 = arith.constant 0 : i32
    return %arg0, %c0_i32 : i32, i32
  }
  func.func @transform_2(%arg0: i32) -> (i32, i32) {
    %c0_i32 = arith.constant 0 : i32
    %c0_i32_0 = arith.constant 0 : i32
    %c0_i32_1 = arith.constant 0 : i32
    return %c0_i32, %c0_i32_0 : i32, i32
  }
  func.func @transform_3(%arg0: i32) -> (i32, i32) {
    %c0_i32 = arith.constant 0 : i32
    %c0_i32_0 = arith.constant 0 : i32
    %c0_i32_1 = arith.constant 0 : i32
    return %c0_i32, %c0_i32_0 : i32, i32
  }
  func.func @transform_4(%arg0: i32) -> (i32, i32) {
    %c0_i32 = arith.constant 0 : i32
    %c0_i32_0 = arith.constant 0 : i32
    %c0_i32_1 = arith.constant 0 : i32
    return %c0_i32, %c0_i32_0 : i32, i32
  }
  func.func @transform_5(%arg0: i32) -> (i32, i32) {
    %c0_i32 = arith.constant 0 : i32
    %c0_i32_0 = arith.constant 0 : i32
    %c0_i32_1 = arith.constant 0 : i32
    return %c0_i32, %c0_i32_0 : i32, i32
  }
  func.func @transform_6(%arg0: i32) -> (i32, i32) {
    %c0_i32 = arith.constant 0 : i32
    %c0_i32_0 = arith.constant 0 : i32
    %c0_i32_1 = arith.constant 0 : i32
    return %c0_i32, %c0_i32_0 : i32, i32
  }
  func.func @transform_7(%arg0: i32) -> (i32, i32) {
    %c0_i32 = arith.constant 0 : i32
    %c0_i32_0 = arith.constant 0 : i32
    return %arg0, %c0_i32 : i32, i32
  }
}

</mosaic_0001>

<bundles_post_ra>
// kernel: tpu_custom_call.1
= control target key start
LH: loop header
LB: loop body
LE: loop exit
PB: predicated region body
PF: predicated region fallthrough
CT: control target
= control target key end

     0   :  { %vm486_vm0 = vcmask 1044480   ;;  %vm487_vm1 = vcmask 1045504   ;;  %v4523_v4 = vmov 65535   ;;  %v6261_v11 = vmov 0   ;;  %s6253_s0 = inlined_call_operand.vmem [shape: bf16[512,144], index: 0, kind: input, shape index: {}]   ;;  %s6254_s1 = inlined_call_operand.vmem [shape: bf16[512,27], index: 1, kind: input, shape index: {}]   ;;  %s6255_s2 = inlined_call_operand.vmem [shape: bf16[144,384], index: 2, kind: input, shape index: {}]   ;;  %s6256_s3 = inlined_call_operand.vmem [shape: bf16[27,384], index: 3, kind: input, shape index: {}]   ;;  %s6257_s4 = inlined_call_operand.vmem [shape: f32[1,384], index: 4, kind: input, shape index: {}]   ;;  %s6258_s5 = inlined_call_operand.vmem [shape: bf16[384,128], index: 5, kind: input, shape index: {}]   ;;  %s6259_s6 = inlined_call_operand.vmem [shape: f32[1,128], index: 6, kind: input, shape index: {}]   ;;  %s6260_s7 = inlined_call_operand.hbm [shape: f32[512,128], index: 7, kind: output, shape index: {}]  }
   0x1   :  { %v4303_v0 = vld [vmem:[%s6256_s3 + $0x4] ss:$12 sps:$4 sm:$0xff]   ;;  %v4305_v1 = vld [vmem:[%s6256_s3 + $0x8] ss:$12 sps:$4 sm:$0xff]   ;;  %v4306_v2 = vld [vmem:[%s6256_s3] ss:$12 sps:$4 sm:$0xff]   ;;  %531 = vmatprep.mubr.bf16.mxu0 %v6261_v11 }
   0x2   :  { %499 = vmatprep.subr.bf16.mxu0 %v4303_v0  ;;  %4022 = vmatprep.subr.bf16.mxu1 %v4305_v1  ;;  %v4307_v3 = vld [vmem:[%s6256_s3 + $0x1c] ss:$12 sps:$4 sm:$0x3f]   ;;  %v488_v5 = vsel %vm486_vm0, 4294967295, %v4523_v4  ;;  %v4311_v12 = vld [vmem:[%s6254_s1] sm:$0xff]   ;;  %vm389_vm2 = vcmask 220160  }
   0x3   :  { %500 = vmatpush1.bf16.msra.mxu0 %v4306_v2  ;;  %4023 = vmatpush3.bf16.msra.mxu1 %v4305_v1  ;;  %v489_v6 = vsel %vm487_vm1, %v488_v5, 0  ;;  %v4309_v7 = vld [vmem:[%s6256_s3 + $0x20] ss:$12 sps:$4 sm:$0x3f]   ;;  %v4315_v15 = vld [vmem:[%s6255_s2 + $0x4] ss:$12 sps:$4 sm:$0xff]  }
   0x4   :  { %v494_v8 = vand.u32 %v4307_v3, %v489_v6  ;;  %v4310_v9 = vld [vmem:[%s6256_s3 + $0x18] ss:$12 sps:$4 sm:$0x3f]   ;;  %v497_v10 = vand.u32 %v4309_v7, %v489_v6  ;;  %4026 = vmatprep.mubr.msk.bf16.mxu1 %vm389_vm2, %v4311_v12  ;;  %v4312_v14 = vld [vmem:[%s6254_s1 + $0x8] sm:$0xff]   ;;  %v4316_v17 = vld [vmem:[%s6254_s1 + $0x10] sm:$0xff]  }
   0x5   :  { %v491_v13 = vand.u32 %v4310_v9, %v489_v6  ;;  %v4313_v16 = vld [vmem:[%s6255_s2] ss:$12 sps:$4 sm:$0xff]   ;;  %v4317_v18 = vld [vmem:[%s6254_s1 + $0x18] sm:$0xff]   ;;  %v4320_v23 = vld [vmem:[%s6254_s1 + $0x30] sm:$0xff]  }
   0x6   :  { %501 = vmatprep.subr.bf16.mxu0 %v494_v8  ;;  %4024 = vmatprep.subr.bf16.mxu1 %v497_v10  ;;  %v4322_v19 = vld [vmem:[%s6255_s2 + $0x18] ss:$12 sps:$4 sm:$0xff]   ;;  %v4324_v20 = vld [vmem:[%s6255_s2 + $0x1c] ss:$12 sps:$4 sm:$0xff]   ;;  %v4335_v24 = vld [vmem:[%s6255_s2 + $0x34] ss:$12 sps:$4 sm:$0xff]  }
   0x7   :  { %502 = vmatpush1.bf16.msra.mxu0 %v491_v13  ;;  %4025 = vmatpush3.bf16.msra.mxu1 %v497_v10  ;;  %v4318_v21 = vld [vmem:[%s6254_s1 + $0x20] sm:$0xff]   ;;  %v4319_v22 = vld [vmem:[%s6254_s1 + $0x28] sm:$0xff]   ;;  %v4333_v25 = vld [vmem:[%s6255_s2 + $0x30] ss:$12 sps:$4 sm:$0xff]  }
   0x8   :  { %1670 = vmatprep.subr.bf16.mxu0 %v4315_v15  ;;  %2023 = vmatprep.subr.bf16.mxu1 %v6261_v11  ;;  %v4643_v26 = vld [vmem:[%s6254_s1 + $0x38] sm:$0xff]   ;;  %v4342_v27 = vld [vmem:[%s6255_s2 + $0x48] ss:$12 sps:$4 sm:$0xff]   ;;  %v4654_v29 = vld [vmem:[%s6254_s1 + $0x40] sm:$0xff]  }
   0x9   :  { %v4344_v28 = vld [vmem:[%s6255_s2 + $0x4c] ss:$12 sps:$4 sm:$0xff]   ;;  %v4347_v30 = vld [vmem:[%s6255_s2 + $0x8] ss:$12 sps:$4 sm:$0xff]   ;;  %v4354_v36 = vld [vmem:[%s6255_s2 + $0x50] ss:$12 sps:$4 sm:$0xff]  }
   0xa   :  { %3704 = vmatmul.mubr.msk.bf16.vlgmr.msra.gmra.mrb[0].mxu0 %vm389_vm2, %v4311_v12  ;;  %4027 = vmatmul.mubr.msk.bf16.vlgmr.msra.gmra.mrb[0].mxu1 %vm389_vm2, %v4312_v14  ;;  %v4350_v31 = vld [vmem:[%s6255_s2 + $0x20] ss:$12 sps:$4 sm:$0xff]   ;;  %v4677_v33 = vld [vmem:[%s6254_s1 + $0x50] sm:$0xff]   ;;  %v4351_v34 = vld [vmem:[%s6255_s2 + $0x38] ss:$12 sps:$4 sm:$0xff]  }
   0xb   :  { %1671 = vmatpush1.bf16.msra.mxu0 %v4313_v16  ;;  %541 = vmatprep.mubr.bf16.mxu0 %v6261_v11  ;;  %v4672_v32 = vld [vmem:[%s6254_s1 + $0x48] sm:$0xff]   ;;  %v4692_v35 = vld [vmem:[%s6254_s1 + $0x58] sm:$0xff]   ;;  %v4361_v38 = vld [vmem:[%s6255_s2 + $0x64] ss:$12 sps:$4 sm:$0xff]  }
   0xc   :  { %4030 = vmatprep.mubr.msk.bf16.mxu1 %vm389_vm2, %v4316_v17  ;;  %1672 = vmatprep.subr.bf16.mxu0 %v4324_v20  ;;  %v4359_v37 = vld [vmem:[%s6255_s2 + $0x60] ss:$12 sps:$4 sm:$0xff]   ;;  %v4355_v40 = vld [vmem:[%s6255_s2 + $0x68] ss:$12 sps:$4 sm:$0xff]   ;;  %v4362_v45 = vld [vmem:[%s6255_s2 + $0x98] ss:$12 sps:$4 sm:$0xff]  }
   0xd   :  { %2024 = vmatpush1.bf16.msra.mxu1 %v4347_v30  ;;  %v4707_v39 = vld [vmem:[%s6254_s1 + $0x60] sm:$0xff]   ;;  %v4725_v42 = vld [vmem:[%s6254_s1 + $0x68] sm:$0xff]   ;;  %v4731_v43 = vld [vmem:[%s6254_s1 + $0x70] sm:$0xff]  }
   0xe   :  { %2025 = vmatprep.subr.bf16.mxu1 %v6261_v11  ;;  %v4358_v41 = vld [vmem:[%s6255_s2 + $0x80] ss:$12 sps:$4 sm:$0xff]   ;;  %v4375_v44 = vld [vmem:[%s6255_s2 + $0x7c] ss:$12 sps:$4 sm:$0xff]   ;;  %v4373_v46 = vld [vmem:[%s6255_s2 + $0x78] ss:$12 sps:$4 sm:$0xff]  }
   0xf   :  { %1673 = vmatpush1.bf16.msra.mxu0 %v4322_v19  ;;  %v4365_v47 = vld [vmem:[%s6255_s2 + $0xb0] ss:$12 sps:$4 sm:$0xff]   ;;  %v4390_v49 = vld [vmem:[%s6255_s2 + $0x94] ss:$12 sps:$4 sm:$0xff]   ;;  %v4783_v53 = vld [vmem:[%s6254_s1 + $0x88] sm:$0xff]  }
  0x10   :  { %1674 = vmatprep.subr.bf16.mxu0 %v4335_v24  ;;  %v4388_v48 = vld [vmem:[%s6255_s2 + $0x90] ss:$12 sps:$4 sm:$0xff]   ;;  %v4767_v51 = vld [vmem:[%s6254_s1 + $0x80] sm:$0xff]   ;;  %v4366_v52 = vld [vmem:[%s6255_s2 + $0xc8] ss:$12 sps:$4 sm:$0xff]  }
  0x11   :  { %2026 = vmatpush1.bf16.msra.mxu1 %v4350_v31  ;;  %v4762_v50 = vld [vmem:[%s6254_s1 + $0x78] sm:$0xff]   ;;  %v4788_v54 = vld [vmem:[%s6254_s1 + $0x90] sm:$0xff]   ;;  %v4806_v56 = vld [vmem:[%s6254_s1 + $0xa0] sm:$0xff]  }
  0x12   :  { %3705 = vmatmul.mubr.msk.bf16.gmra.mrb[4].mxu0 %vm389_vm2, %v4312_v14  ;;  %4031 = vmatmul.mubr.msk.bf16.gmra.mrb[4].mxu1 %vm389_vm2, %v4317_v18  ;;  %v4801_v55 = vld [vmem:[%s6254_s1 + $0x98] sm:$0xff]   ;;  %v4402_v57 = vld [vmem:[%s6255_s2 + $0xa8] ss:$12 sps:$4 sm:$0xff]   ;;  %v4846_v62 = vld [vmem:[%s6254_s1 + $0xc0] sm:$0xff]  }
  0x13   :  { %551 = vmatprep.mubr.bf16.mxu0 %v6261_v11  ;;  %4034 = vmatprep.mubr.msk.bf16.mxu1 %vm389_vm2, %v4318_v21  ;;  %v4404_v58 = vld [vmem:[%s6255_s2 + $0xac] ss:$12 sps:$4 sm:$0xff]   ;;  %v4829_v60 = vld [vmem:[%s6254_s1 + $0xb0] sm:$0xff]  }
  0x14   :  { %1675 = vmatpush1.bf16.msra.mxu0 %v4333_v25  ;;  %2027 = vmatprep.subr.bf16.mxu1 %v6261_v11  ;;  %v4824_v59 = vld [vmem:[%s6254_s1 + $0xa8] sm:$0xff]   ;;  %v4841_v61 = vld [vmem:[%s6254_s1 + $0xb8] sm:$0xff]  }
  0x15   :  { %1676 = vmatprep.subr.bf16.mxu0 %v4344_v28  ;;  %2028 = vmatpush1.bf16.msra.mxu1 %v4351_v34  ;;  %v4858_v63 = vld [vmem:[%s6254_s1 + $0xc8] sm:$0xff]  }
  0x16   :  { %2029 = vmatprep.subr.bf16.mxu1 %v6261_v11 }
  0x18   :  { %1677 = vmatpush1.bf16.msra.mxu0 %v4342_v27 }
  0x19   :  { %2030 = vmatpush1.bf16.msra.mxu1 %v4354_v36  ;;  %1678 = vmatprep.subr.bf16.mxu0 %v4361_v38 }
  0x1a   :  { %3706 = vmatmul.mubr.msk.bf16.gmra.mrb[8].mxu0 %vm389_vm2, %v4316_v17  ;;  %4035 = vmatmul.mubr.msk.bf16.gmra.mrb[8].mxu1 %vm389_vm2, %v4319_v22 }
  0x1b   :  { %561 = vmatprep.mubr.bf16.mxu0 %v6261_v11  ;;  %4038 = vmatprep.mubr.msk.bf16.mxu1 %vm389_vm2, %v4320_v23 }
  0x1c   :  { %2031 = vmatprep.subr.bf16.mxu1 %v6261_v11  ;;  %1679 = vmatpush1.bf16.msra.mxu0 %v4359_v37 }
  0x1d   :  { %2032 = vmatpush1.bf16.msra.mxu1 %v4355_v40  ;;  %1680 = vmatprep.subr.bf16.mxu0 %v4375_v44 }
  0x1e   :  { %2033 = vmatprep.subr.bf16.mxu1 %v6261_v11 }
  0x20   :  { %1681 = vmatpush1.bf16.msra.mxu0 %v4373_v46 }
  0x21   :  { %2034 = vmatpush1.bf16.msra.mxu1 %v4358_v41  ;;  %1682 = vmatprep.subr.bf16.mxu0 %v4390_v49 }
  0x22   :  { %3707 = vmatmul.mubr.msk.bf16.gmra.mrb[12].mxu0 %vm389_vm2, %v4317_v18  ;;  %4039 = vmatmul.mubr.msk.bf16.gmra.mrb[12].mxu1 %vm389_vm2, %v4643_v26 }
  0x23   :  { %571 = vmatprep.mubr.bf16.mxu0 %v6261_v11  ;;  %4042 = vmatprep.mubr.msk.bf16.mxu1 %vm389_vm2, %v4654_v29 }
  0x24   :  { %2035 = vmatprep.subr.bf16.mxu1 %v6261_v11  ;;  %1683 = vmatpush1.bf16.msra.mxu0 %v4388_v48 }
  0x25   :  { %2036 = vmatpush1.bf16.msra.mxu1 %v4362_v45  ;;  %1684 = vmatprep.subr.bf16.mxu0 %v4404_v58 }
  0x26   :  { %2037 = vmatprep.subr.bf16.mxu1 %v6261_v11 }
  0x28   :  { %1685 = vmatpush1.bf16.msra.mxu0 %v4402_v57 }
  0x29   :  { %2038 = vmatpush1.bf16.msra.mxu1 %v4365_v47 }
  0x2a   :  { %3708 = vmatmul.mubr.msk.bf16.gmra.mrb[16].mxu0 %vm389_vm2, %v4318_v21  ;;  %4043 = vmatmul.mubr.msk.bf16.gmra.mrb[16].mxu1 %vm389_vm2, %v4672_v32 }
  0x2b   :  { %581 = vmatprep.mubr.bf16.mxu0 %v6261_v11  ;;  %4046 = vmatprep.mubr.msk.bf16.mxu1 %vm389_vm2, %v4677_v33 }
  0x2c   :  { %2039 = vmatprep.subr.bf16.mxu1 %v6261_v11 }
  0x2d   :  { %2040 = vmatpush1.bf16.msra.mxu1 %v4366_v52 }
  0x2e   :  { %3008 = vmatprep.subr.bf16.mxu1 %v6261_v11 }
  0x32   :  { %3709 = vmatmul.mubr.msk.bf16.gmra.mrb[20].mxu0 %vm389_vm2, %v4319_v22  ;;  %4047 = vmatmul.mubr.msk.bf16.gmra.mrb[20].mxu1 %vm389_vm2, %v4692_v35 }
  0x33   :  { %591 = vmatprep.mubr.bf16.mxu0 %v6261_v11  ;;  %4050 = vmatprep.mubr.msk.bf16.mxu1 %vm389_vm2, %v4707_v39 }
  0x3a   :  { %3710 = vmatmul.mubr.msk.bf16.gmra.mrb[24].mxu0 %vm389_vm2, %v4320_v23  ;;  %4051 = vmatmul.mubr.msk.bf16.gmra.mrb[24].mxu1 %vm389_vm2, %v4725_v42 }
  0x3b   :  { %601 = vmatprep.mubr.bf16.mxu0 %v6261_v11  ;;  %4054 = vmatprep.mubr.msk.bf16.mxu1 %vm389_vm2, %v4731_v43 }
  0x42   :  { %3711 = vmatmul.mubr.msk.bf16.gmra.mrb[28].mxu0 %vm389_vm2, %v4643_v26  ;;  %4055 = vmatmul.mubr.msk.bf16.gmra.mrb[28].mxu1 %vm389_vm2, %v4762_v50 }
  0x43   :  { %611 = vmatprep.mubr.bf16.mxu0 %v6261_v11  ;;  %4058 = vmatprep.mubr.msk.bf16.mxu1 %vm389_vm2, %v4767_v51 }
  0x4a   :  { %3712 = vmatmul.mubr.msk.bf16.gmra.mrb[32].mxu0 %vm389_vm2, %v4654_v29  ;;  %4059 = vmatmul.mubr.msk.bf16.gmra.mrb[32].mxu1 %vm389_vm2, %v4783_v53 }
  0x4b   :  { %621 = vmatprep.mubr.bf16.mxu0 %v6261_v11  ;;  %4062 = vmatprep.mubr.msk.bf16.mxu1 %vm389_vm2, %v4788_v54 }
  0x52   :  { %3713 = vmatmul.mubr.msk.bf16.gmra.mrb[36].mxu0 %vm389_vm2, %v4672_v32  ;;  %4063 = vmatmul.mubr.msk.bf16.gmra.mrb[36].mxu1 %vm389_vm2, %v4801_v55 }
  0x53   :  { %631 = vmatprep.mubr.bf16.mxu0 %v6261_v11  ;;  %4066 = vmatprep.mubr.msk.bf16.mxu1 %vm389_vm2, %v4806_v56 }
  0x5a   :  { %3714 = vmatmul.mubr.msk.bf16.gmra.mrb[40].mxu0 %vm389_vm2, %v4677_v33  ;;  %4067 = vmatmul.mubr.msk.bf16.gmra.mrb[40].mxu1 %vm389_vm2, %v4824_v59 }
  0x5b   :  { %641 = vmatprep.mubr.bf16.mxu0 %v6261_v11  ;;  %4070 = vmatprep.mubr.msk.bf16.mxu1 %vm389_vm2, %v4829_v60 }
  0x62   :  { %3715 = vmatmul.mubr.msk.bf16.gmra.mrb[44].mxu0 %vm389_vm2, %v4692_v35  ;;  %4071 = vmatmul.mubr.msk.bf16.gmra.mrb[44].mxu1 %vm389_vm2, %v4841_v61 }
  0x63   :  { %651 = vmatprep.mubr.bf16.mxu0 %v6261_v11  ;;  %4074 = vmatprep.mubr.msk.bf16.mxu1 %vm389_vm2, %v4846_v62 }
  0x64   :  { %12 = vsyncpa [#allocation3], 0  ;;  %v4863_v0 = vld [vmem:[%s6254_s1 + $0xd0] sm:$0xff]   ;;  %v4416_v1 = vld [vmem:[%s6255_s2 + $0xc0] ss:$12 sps:$4 sm:$0xff]   ;;  %vm1573_vm3 = vcmask 130048  }
  0x65   :  { %v4418_v2 = vld [vmem:[%s6255_s2 + $0xc4] ss:$12 sps:$4 sm:$0xff]   ;;  %v4881_v3 = vld [vmem:[%s6254_s1 + $0xd8] sm:$0xff]   ;;  %v4898_v5 = vld [vmem:[%s6254_s1 + $0xe8] sm:$0xff]  }
  0x66   :  { %1686 = vmatprep.subr.bf16.mxu0 %v4418_v2  ;;  %v4886_v4 = vld [vmem:[%s6254_s1 + $0xe0] sm:$0xff]   ;;  %v4903_v6 = vld [vmem:[%s6254_s1 + $0xf0] sm:$0xff]   ;;  %v4915_v7 = vld [vmem:[%s6254_s1 + $0xf8] sm:$0xff]  }
  0x67   :  { %1687 = vmatpush1.bf16.msra.mxu0 %v4416_v1  ;;  %v4920_v8 = vld [vmem:[%s6253_s0 + $0x4] ss:$8 sps:$4 sm:$0xff]   ;;  %v4932_v9 = vld [vmem:[%s6253_s0] ss:$8 sps:$4 sm:$0xff]   ;;  %v4937_v10 = vld [vmem:[%s6253_s0 + $0x14] ss:$8 sps:$4 sm:$0xff]  }
  0x68   :  { %v4414_v12 = vld [vmem:[%s6258_s5] sm:$0xff]   ;;  %v4424_v13 = vld [vmem:[%s6258_s5 + $0x8] sm:$0xff]   ;;  %v4955_v14 = vld [vmem:[%s6253_s0 + $0x10] ss:$8 sps:$4 sm:$0xff]  }
  0x69   :  { %v4960_v15 = vld [vmem:[%s6253_s0 + $0x24] ss:$8 sps:$4 sm:$0xff]   ;;  %v4431_v16 = vld [vmem:[%s6258_s5 + $0x10] sm:$0xff]   ;;  %v4438_v17 = vld [vmem:[%s6258_s5 + $0x18] sm:$0xff]  }
  0x6a   :  { %3716 = vmatmul.mubr.msk.bf16.gmra.mrb[48].mxu0 %vm389_vm2, %v4707_v39  ;;  %4075 = vmatmul.mubr.msk.bf16.gmra.mrb[48].mxu1 %vm389_vm2, %v4858_v63  ;;  %v4979_v18 = vld [vmem:[%s6253_s0 + $0x20] ss:$8 sps:$4 sm:$0xff]   ;;  %v4984_v19 = vld [vmem:[%s6253_s0 + $0x34] ss:$8 sps:$4 sm:$0xff]   ;;  %v4996_v20 = vld [vmem:[%s6253_s0 + $0x30] ss:$8 sps:$4 sm:$0xff]  }
  0x6b   :  { %661 = vmatprep.mubr.bf16.mxu0 %v6261_v11  ;;  %4078 = vmatprep.mubr.msk.bf16.mxu1 %vm389_vm2, %v4863_v0  ;;  %v5001_v21 = vld [vmem:[%s6253_s0 + $0x44] ss:$8 sps:$4 sm:$0xff]   ;;  %v5015_v23 = vld [vmem:[%s6253_s0 + $0x40] ss:$8 sps:$4 sm:$0xff]   ;;  %v5021_v24 = vld [vmem:[%s6253_s0 + $0x54] ss:$8 sps:$4 sm:$0xff]  }
  0x6c   :  { %v4445_v22 = vld [vmem:[%s6258_s5 + $0x20] sm:$0xff]   ;;  %v5032_v25 = vld [vmem:[%s6253_s0 + $0x50] ss:$8 sps:$4 sm:$0xff]   ;;  %v4452_v27 = vld [vmem:[%s6258_s5 + $0x28] sm:$0xff]  }
  0x6d   :  { %v5037_v26 = vld [vmem:[%s6253_s0 + $0x64] ss:$8 sps:$4 sm:$0xff]   ;;  %v5051_v28 = vld [vmem:[%s6253_s0 + $0x60] ss:$8 sps:$4 sm:$0xff]   ;;  %v5057_v29 = vld [vmem:[%s6253_s0 + $0x74] ss:$8 sps:$4 sm:$0xff]  }
  0x6e   :  { %v5068_v30 = vld [vmem:[%s6253_s0 + $0x70] ss:$8 sps:$4 sm:$0xff]   ;;  %v5073_v31 = vld [vmem:[%s6253_s0 + $0x84] ss:$8 sps:$4 sm:$0xff]   ;;  %v5087_v33 = vld [vmem:[%s6253_s0 + $0x80] ss:$8 sps:$4 sm:$0xff]  }
  0x6f   :  { %v4459_v32 = vld [vmem:[%s6258_s5 + $0x30] sm:$0xff]   ;;  %v5109_v36 = vld [vmem:[%s6253_s0 + $0xa4] ss:$8 sps:$4 sm:$0xff]   ;;  %v4466_v37 = vld [vmem:[%s6258_s5 + $0x38] sm:$0xff]  }
  0x70   :  { %v5093_v34 = vld [vmem:[%s6253_s0 + $0x94] ss:$8 sps:$4 sm:$0xff]   ;;  %v5104_v35 = vld [vmem:[%s6253_s0 + $0x90] ss:$8 sps:$4 sm:$0xff]   ;;  %v5123_v38 = vld [vmem:[%s6253_s0 + $0xa0] ss:$8 sps:$4 sm:$0xff]  }
  0x71   :  { %v5128_v39 = vld [vmem:[%s6253_s0 + $0xb4] ss:$8 sps:$4 sm:$0xff]   ;;  %v5142_v41 = vld [vmem:[%s6253_s0 + $0xb0] ss:$8 sps:$4 sm:$0xff]   ;;  %v5166_v47 = vld [vmem:[%s6253_s0 + $0xc0] ss:$8 sps:$4 sm:$0xff]  }
  0x72   :  { %3717 = vmatmul.mubr.msk.bf16.gmra.mrb[52].mxu0 %vm389_vm2, %v4725_v42  ;;  %4079 = vmatmul.mubr.msk.bf16.gmra.mrb[52].mxu1 %vm389_vm2, %v4881_v3  ;;  %v5173_v49 = vld [vmem:[%s6253_s0 + $0xd4] ss:$8 sps:$4 sm:$0xff]   ;;  %v5203_v57 = vld [vmem:[%s6253_s0 + $0xe4] ss:$8 sps:$4 sm:$0xff]  }
  0x73   :  { %671 = vmatprep.mubr.bf16.mxu0 %v6261_v11  ;;  %4082 = vmatprep.mubr.msk.bf16.mxu1 %vm389_vm2, %v4886_v4  ;;  %v4481_v2 = vld [vmem:[%s6258_s5 + $0x48] sm:$0xff]  }
  0x7a   :  { %3718 = vmatmul.mubr.msk.bf16.gmra.mrb[56].mxu0 %vm389_vm2, %v4731_v43  ;;  %4083 = vmatmul.mubr.msk.bf16.gmra.mrb[56].mxu1 %vm389_vm2, %v4898_v5  ;;  %v5149_v43 = vld [vmem:[%s6253_s0 + $0xc4] ss:$8 sps:$4 sm:$0xff]  }
  0x7b   :  { %681 = vmatprep.mubr.bf16.mxu0 %v6261_v11  ;;  %4086 = vmatprep.mubr.msk.bf16.mxu1 %vm389_vm2, %v4903_v6 }
  0x82   :  { %3719 = vmatmul.mubr.msk.bf16.gmra.mrb[60].mxu0 %vm389_vm2, %v4762_v50  ;;  %4087 = vmatmul.mubr.msk.bf16.gmra.mrb[60].mxu1 %vm389_vm2, %v4915_v7 }
  0x83   :  { %691 = vmatprep.mubr.bf16.mxu0 %v6261_v11  ;;  %3891 = vmatprep.mubr.msk.bf16.mxu1 %vm1573_vm3, %v4920_v8 }
  0x8a   :  { %3720 = vmatmul.mubr.msk.bf16.gmra.mrb[64].mxu0 %vm389_vm2, %v4767_v51  ;;  %2056 = vmatmul.mubr.bf16.vlgmr.msra.gmra.mrb[64].mxu1 %v4932_v9 }
  0x8b   :  { %701 = vmatprep.mubr.bf16.mxu0 %v6261_v11  ;;  %3892 = vmatprep.mubr.msk.bf16.mxu1 %vm1573_vm3, %v4937_v10 }
  0x8c   :  { %3009 = vmatpush1.bf16.msra.mxu1 %v4414_v12 }
  0x8d   :  { %3010 = vmatprep.subr.bf16.mxu1 %v6261_v11 }
  0x90   :  { %3011 = vmatpush1.bf16.msra.mxu1 %v4424_v13 }
  0x91   :  { %3012 = vmatprep.subr.bf16.mxu1 %v6261_v11 }
  0x92   :  { %3721 = vmatmul.mubr.msk.bf16.gmra.mrb[68].mxu0 %vm389_vm2, %v4783_v53  ;;  %2064 = vmatmul.mubr.bf16.gmra.mrb[68].mxu1 %v4955_v14  ;;  %v5190_v53 = vld [vmem:[%s6253_s0 + $0xd0] ss:$8 sps:$4 sm:$0xff]  }
  0x93   :  { %711 = vmatprep.mubr.bf16.mxu0 %v6261_v11  ;;  %3893 = vmatprep.mubr.msk.bf16.mxu1 %vm1573_vm3, %v4960_v15 }
  0x94   :  { %3013 = vmatpush1.bf16.msra.mxu1 %v4431_v16 }
  0x95   :  { %3014 = vmatprep.subr.bf16.mxu1 %v6261_v11 }
  0x98   :  { %3015 = vmatpush1.bf16.msra.mxu1 %v4438_v17  ;;  %v5274_v17 = vld [vmem:[%s6253_s0 + $0x100] ss:$8 sps:$4 sm:$0xff]  }
  0x99   :  { %3016 = vmatprep.subr.bf16.mxu1 %v6261_v11 }
  0x9a   :  { %3722 = vmatmul.mubr.msk.bf16.gmra.mrb[72].mxu0 %vm389_vm2, %v4788_v54  ;;  %2072 = vmatmul.mubr.bf16.gmra.mrb[72].mxu1 %v4979_v18 }
  0x9b   :  { %721 = vmatprep.mubr.bf16.mxu0 %v6261_v11  ;;  %3894 = vmatprep.mubr.msk.bf16.mxu1 %vm1573_vm3, %v4984_v19 }
  0x9c   :  { %3017 = vmatpush1.bf16.msra.mxu1 %v4445_v22 }
  0x9d   :  { %3018 = vmatprep.subr.bf16.mxu1 %v6261_v11 }
  0xa0   :  { %3019 = vmatpush1.bf16.msra.mxu1 %v4452_v27 }
  0xa1   :  { %3020 = vmatprep.subr.bf16.mxu1 %v6261_v11 }
  0xa2   :  { %3723 = vmatmul.mubr.msk.bf16.gmra.mrb[76].mxu0 %vm389_vm2, %v4801_v55  ;;  %2080 = vmatmul.mubr.bf16.gmra.mrb[76].mxu1 %v4996_v20  ;;  %v4473_v55 = vld [vmem:[%s6258_s5 + $0x40] sm:$0xff]  }
  0xa3   :  { %731 = vmatprep.mubr.bf16.mxu0 %v6261_v11  ;;  %3895 = vmatprep.mubr.msk.bf16.mxu1 %vm1573_vm3, %v5001_v21 }
  0xa4   :  { %3021 = vmatpush1.bf16.msra.mxu1 %v4459_v32  ;;  %v4486_v32 = vld [vmem:[%s6258_s5 + $0x50] sm:$0xff]  }
  0xa5   :  { %3022 = vmatprep.subr.bf16.mxu1 %v6261_v11 }
  0xa8   :  { %3023 = vmatpush1.bf16.msra.mxu1 %v4466_v37  ;;  %v4487_v37 = vld [vmem:[%s6258_s5 + $0x88] sm:$0xff]  }
  0xa9   :  { %3024 = vmatprep.subr.bf16.mxu1 %v6261_v11 }
  0xaa   :  { %3724 = vmatmul.mubr.msk.bf16.gmra.mrb[80].mxu0 %vm389_vm2, %v4806_v56  ;;  %2088 = vmatmul.mubr.bf16.gmra.mrb[80].mxu1 %v5015_v23  ;;  %v4474_v56 = vld [vmem:[%s6258_s5 + $0x80] sm:$0xff]  }
  0xab   :  { %741 = vmatprep.mubr.bf16.mxu0 %v6261_v11  ;;  %3896 = vmatprep.mubr.msk.bf16.mxu1 %vm1573_vm3, %v5021_v24 }
  0xac   :  { %3025 = vmatpush1.bf16.msra.mxu1 %v4473_v55  ;;  %4090 = vmatprep.subr.bf16.mxu0 %v4474_v56 }
  0xad   :  { %3026 = vmatprep.subr.bf16.mxu1 %v6261_v11 }
  0xb0   :  { %3027 = vmatpush1.bf16.msra.mxu1 %v4481_v2 }
  0xb1   :  { %3028 = vmatprep.subr.bf16.mxu1 %v6261_v11 }
  0xb2   :  { %3725 = vmatmul.mubr.msk.bf16.gmra.mrb[84].mxu0 %vm389_vm2, %v4824_v59  ;;  %2096 = vmatmul.mubr.bf16.gmra.mrb[84].mxu1 %v5032_v25 }
  0xb3   :  { %751 = vmatprep.mubr.bf16.mxu0 %v6261_v11  ;;  %3897 = vmatprep.mubr.msk.bf16.mxu1 %vm1573_vm3, %v5037_v26 }
  0xb4   :  { %3029 = vmatpush1.bf16.msra.mxu1 %v4486_v32 }
  0xb5   :  { %3030 = vmatprep.subr.bf16.mxu1 %v6261_v11 }
  0xba   :  { %3726 = vmatmul.mubr.msk.bf16.gmra.mrb[88].mxu0 %vm389_vm2, %v4829_v60  ;;  %2104 = vmatmul.mubr.bf16.gmra.mrb[88].mxu1 %v5051_v28 }
  0xbb   :  { %761 = vmatprep.mubr.bf16.mxu0 %v6261_v11  ;;  %3898 = vmatprep.mubr.msk.bf16.mxu1 %vm1573_vm3, %v5057_v29 }
  0xc2   :  { %3727 = vmatmul.mubr.msk.bf16.gmra.mrb[92].mxu0 %vm389_vm2, %v4841_v61  ;;  %2112 = vmatmul.mubr.bf16.gmra.mrb[92].mxu1 %v5068_v30  ;;  %v5221_v61 = vld [vmem:[%s6253_s0 + $0xe0] ss:$8 sps:$4 sm:$0xff]  }
  0xc3   :  { %771 = vmatprep.mubr.bf16.mxu0 %v6261_v11  ;;  %3899 = vmatprep.mubr.msk.bf16.mxu1 %vm1573_vm3, %v5073_v31 }
  0xca   :  { %3728 = vmatmul.mubr.msk.bf16.gmra.mrb[96].mxu0 %vm389_vm2, %v4846_v62  ;;  %2120 = vmatmul.mubr.bf16.gmra.mrb[96].mxu1 %v5087_v33 }
  0xcb   :  { %781 = vmatprep.mubr.bf16.mxu0 %v6261_v11  ;;  %3900 = vmatprep.mubr.msk.bf16.mxu1 %vm1573_vm3, %v5093_v34 }
  0xd2   :  { %3729 = vmatmul.mubr.msk.bf16.gmra.mrb[100].mxu0 %vm389_vm2, %v4858_v63  ;;  %2128 = vmatmul.mubr.bf16.gmra.mrb[100].mxu1 %v5104_v35  ;;  %v5228_v63 = vld [vmem:[%s6253_s0 + $0xf4] ss:$8 sps:$4 sm:$0xff]  }
  0xd3   :  { %791 = vmatprep.mubr.bf16.mxu0 %v6261_v11  ;;  %3901 = vmatprep.mubr.msk.bf16.mxu1 %vm1573_vm3, %v5109_v36 }
  0xda   :  { %3730 = vmatmul.mubr.msk.bf16.gmra.mrb[104].mxu0 %vm389_vm2, %v4863_v0  ;;  %2136 = vmatmul.mubr.bf16.gmra.mrb[104].mxu1 %v5123_v38 }
  0xdb   :  { %801 = vmatprep.mubr.bf16.mxu0 %v6261_v11  ;;  %3902 = vmatprep.mubr.msk.bf16.mxu1 %vm1573_vm3, %v5128_v39 }
  0xdd   :  { %v5137_v40 = vpop.f32.mrb[0].mxu1 }
  0xde   :  { %v5144_v42 = vpop.f32.mrb[1].mxu1 }
  0xdf   :  { %v5151_v44 = vpop.f32.mrb[2].mxu1 }
  0xe0   :  { %v5153_v45 = vpop.f32.mrb[3].mxu1 }
  0xe2   :  { %3731 = vmatmul.mubr.msk.bf16.gmra.mrb[108].mxu0 %vm389_vm2, %v4881_v3  ;;  %2144 = vmatmul.mubr.bf16.gmra.mrb[108].mxu1 %v5142_v41 }
  0xe3   :  { %811 = vmatprep.mubr.bf16.mxu0 %v6261_v11  ;;  %3903 = vmatprep.mubr.msk.bf16.mxu1 %vm1573_vm3, %v5149_v43 }
  0xe5   :  { %v5161_v46 = vpop.f32.mrb[4].mxu1 }
  0xe6   :  { %v5168_v48 = vpop.f32.mrb[5].mxu1 }
  0xe7   :  { %v5175_v50 = vpop.f32.mrb[6].mxu1 }
  0xe8   :  { %v5177_v51 = vpop.f32.mrb[7].mxu1 }
  0xea   :  { %3732 = vmatmul.mubr.msk.bf16.gmra.mrb[112].mxu0 %vm389_vm2, %v4886_v4  ;;  %2152 = vmatmul.mubr.bf16.gmra.mrb[112].mxu1 %v5166_v47  ;;  %v5248_v4 = vld [vmem:[%s6253_s0 + $0xf0] ss:$8 sps:$4 sm:$0xff]  }
  0xeb   :  { %821 = vmatprep.mubr.bf16.mxu0 %v6261_v11  ;;  %3904 = vmatprep.mubr.msk.bf16.mxu1 %vm1573_vm3, %v5173_v49 }
  0xed   :  { %v5185_v52 = vpop.f32.mrb[8].mxu1 }
  0xee   :  { %v5192_v54 = vpop.f32.mrb[9].mxu1 }
  0xef   :  { %v5205_v58 = vpop.f32.mrb[10].mxu1 }
  0xf0   :  { %v5207_v59 = vpop.f32.mrb[11].mxu1 }
  0xf2   :  { %3733 = vmatmul.mubr.msk.bf16.gmra.mrb[116].mxu0 %vm389_vm2, %v4898_v5  ;;  %2160 = vmatmul.mubr.bf16.gmra.mrb[116].mxu1 %v5190_v53 }
  0xf3   :  { %831 = vmatprep.mubr.bf16.mxu0 %v6261_v11  ;;  %3905 = vmatprep.mubr.msk.bf16.mxu1 %vm1573_vm3, %v5203_v57 }
  0xf5   :  { %v5216_v60 = vpop.f32.mrb[12].mxu1 }
  0xf6   :  { %v5223_v62 = vpop.f32.mrb[13].mxu1 }
  0xf7   :  { %v5230_v0 = vpop.f32.mrb[14].mxu1 }
  0xf8   :  { %v5232_v1 = vpop.f32.mrb[15].mxu1 }
  0xfa   :  { %3734 = vmatmul.mubr.msk.bf16.gmra.mrb[120].mxu0 %vm389_vm2, %v4903_v6  ;;  %2168 = vmatmul.mubr.bf16.gmra.mrb[120].mxu1 %v5221_v61  ;;  %v5255_v6 = vld [vmem:[%s6253_s0 + $0x104] ss:$8 sps:$4 sm:$0xff]  }
  0xfb   :  { %841 = vmatprep.mubr.bf16.mxu0 %v6261_v11  ;;  %3906 = vmatprep.mubr.msk.bf16.mxu1 %vm1573_vm3, %v5228_v63 }
  0xfd   :  { %v5243_v3 = vpop.f32.mrb[16].mxu1 }
  0xfe   :  { %v5250_v5 = vpop.f32.mrb[17].mxu1 }
  0xff   :  { %v5257_v12 = vpop.f32.mrb[18].mxu1 }
 0x100   :  { %v5260_v13 = vpop.f32.mrb[19].mxu1 }
 0x102   :  { %3735 = vmatmul.mubr.msk.bf16.gmra.mrb[124].mxu0 %vm389_vm2, %v4915_v7  ;;  %2176 = vmatmul.mubr.bf16.gmra.mrb[124].mxu1 %v5248_v4  ;;  %v5281_v7 = vld [vmem:[%s6253_s0 + $0x114] ss:$8 sps:$4 sm:$0xff]  }
 0x103   :  { %3859 = vmatprep.mubr.msk.bf16.mxu0 %vm1573_vm3, %v4920_v8  ;;  %3907 = vmatprep.mubr.msk.bf16.mxu1 %vm1573_vm3, %v5255_v6 }
 0x105   :  { %v5269_v16 = vpop.f32.mrb[20].mxu1 }
 0x106   :  { %v5276_v22 = vpop.f32.mrb[21].mxu1 }
 0x107   :  { %v5283_v27 = vpop.f32.mrb[22].mxu1 }
 0x108   :  { %6271 = vst [vmem:[#allocation5_spill] sm:$0xff] %v5283_v27  ;;  %v5285_v8 = vpop.f32.mrb[23].mxu1 }
 0x10a   :  { %1703 = vmatmul.mubr.bf16.vlgmr.msra.gmra.mrb[0].mxu0 %v4932_v9  ;;  %2184 = vmatmul.mubr.bf16.gmra.mrb[128].mxu1 %v5274_v17  ;;  %v5304_v9 = vld [vmem:[%s6253_s0 + $0x110] ss:$8 sps:$4 sm:$0xff]  }
 0x10b   :  { %3860 = vmatprep.mubr.msk.bf16.mxu0 %vm1573_vm3, %v4937_v10  ;;  %3908 = vmatprep.mubr.msk.bf16.mxu1 %vm1573_vm3, %v5281_v7 }
 0x10c   :  { %4091 = vmatpush3.bf16.msra.mxu0 %v4474_v56  ;;  %v5311_v56 = vld [vmem:[%s6253_s0 + $0x124] ss:$8 sps:$4 sm:$0xff]  }
 0x10d   :  { %v5299_v55 = vpop.f32.mrb[24].mxu1  ;;  %4092 = vmatprep.subr.bf16.mxu0 %v4487_v37 }
 0x10e   :  { %6272 = vst [vmem:[#allocation6_spill] sm:$0xff] %v5299_v55  ;;  %v5306_v10 = vpop.f32.mrb[25].mxu1  ;;  %v6282_v55 = vmov 0  }
 0x10f   :  { %v5313_v2 = vpop.f32.mrb[26].mxu1 }
 0x110   :  { %6273 = vst [vmem:[#allocation7_spill] sm:$0xff] %v5313_v2  ;;  %v5316_v27 = vpop.f32.mrb[27].mxu1  ;;  %4093 = vmatpush3.bf16.msra.mxu0 %v4487_v37  ;;  %v5329_v2 = vld [vmem:[%s6253_s0 + $0x120] ss:$8 sps:$4 sm:$0xff]  }
 0x111   :  { %6274 = vst [vmem:[#allocation8_spill] sm:$0xff] %v5316_v27 }
 0x112   :  { %1713 = vmatmul.mubr.bf16.gmra.mrb[4].mxu0 %v4955_v14  ;;  %2192 = vmatmul.mubr.bf16.gmra.mrb[132].mxu1 %v5304_v9  ;;  %v5336_v14 = vld [vmem:[%s6253_s0 + $0x134] ss:$8 sps:$4 sm:$0xff]  }
 0x113   :  { %3861 = vmatprep.mubr.msk.bf16.mxu0 %vm1573_vm3, %v4960_v15  ;;  %3909 = vmatprep.mubr.msk.bf16.mxu1 %vm1573_vm3, %v5311_v56 }
 0x115   :  { %v5324_v32 = vpop.f32.mrb[28].mxu1 }
 0x116   :  { %6275 = vst [vmem:[#allocation9_spill] sm:$0xff] %v5324_v32  ;;  %v5331_v11 = vpop.f32.mrb[29].mxu1  ;;  %v4488_v32 = vld [vmem:[%s6258_s5 + $0x58] sm:$0xff]  }
 0x117   :  { %6276 = vst [vmem:[#allocation10_spill] sm:$0xff] %v5331_v11  ;;  %v5338_v37 = vpop.f32.mrb[30].mxu1  ;;  %3031 = vmatpush1.bf16.msra.mxu1 %v4488_v32 }
 0x118   :  { %6277 = vst [vmem:[#allocation11_spill] sm:$0xff] %v5338_v37  ;;  %v5340_v15 = vpop.f32.mrb[31].mxu1  ;;  %v5356_v37 = vld [vmem:[%s6253_s0 + $0x130] ss:$8 sps:$4 sm:$0xff]   ;;  %3032 = vmatprep.subr.bf16.mxu1 %v6282_v55 }
 0x119   :  { %6278 = vst [vmem:[#allocation12_spill] sm:$0xff] %v5340_v15 }
 0x11a   :  { %1723 = vmatmul.mubr.bf16.gmra.mrb[8].mxu0 %v4979_v18  ;;  %2200 = vmatmul.mubr.bf16.gmra.mrb[136].mxu1 %v5329_v2 }
 0x11b   :  { %3862 = vmatprep.mubr.msk.bf16.mxu0 %vm1573_vm3, %v4984_v19  ;;  %3910 = vmatprep.mubr.msk.bf16.mxu1 %vm1573_vm3, %v5336_v14  ;;  %v5363_v19 = vld [vmem:[%s6253_s0 + $0x144] ss:$8 sps:$4 sm:$0xff]  }
 0x11d   :  { %v5351_v11 = vpop.f32.mrb[32].mxu1 }
 0x11e   :  { %6279 = vst [vmem:[#allocation13_spill] sm:$0xff] %v5351_v11  ;;  %v5358_v18 = vpop.f32.mrb[33].mxu1 }
 0x11f   :  { %6280 = vst [vmem:[#allocation14_spill] sm:$0xff] %v5358_v18  ;;  %v5365_v15 = vpop.f32.mrb[34].mxu1 }
 0x120   :  { %6281 = vst [vmem:[#allocation15_spill] sm:$0xff] %v5365_v15  ;;  %v5368_v27 = vpop.f32.mrb[35].mxu1  ;;  %v5381_v15 = vld [vmem:[%s6253_s0 + $0x140] ss:$8 sps:$4 sm:$0xff]  }
 0x121   :  { %6283 = vst [vmem:[#allocation16_spill] sm:$0xff] %v5368_v27 }
 0x122   :  { %1733 = vmatmul.mubr.bf16.gmra.mrb[12].mxu0 %v4996_v20  ;;  %2208 = vmatmul.mubr.bf16.gmra.mrb[140].mxu1 %v5356_v37  ;;  %v5388_v20 = vld [vmem:[%s6253_s0 + $0x154] ss:$8 sps:$4 sm:$0xff]  }
 0x123   :  { %3863 = vmatprep.mubr.msk.bf16.mxu0 %vm1573_vm3, %v5001_v21  ;;  %3911 = vmatprep.mubr.msk.bf16.mxu1 %vm1573_vm3, %v5363_v19 }
 0x125   :  { %v5376_v32 = vpop.f32.mrb[36].mxu1 }
 0x126   :  { %6284 = vst [vmem:[#allocation17_spill] sm:$0xff] %v5376_v32  ;;  %v5383_v11 = vpop.f32.mrb[37].mxu1  ;;  %v4489_v32 = vld [vmem:[%s6258_s5 + $0x60] sm:$0xff]  }
 0x127   :  { %6285 = vst [vmem:[#allocation18_spill] sm:$0xff] %v5383_v11  ;;  %v5390_v27 = vpop.f32.mrb[38].mxu1  ;;  %3033 = vmatpush1.bf16.msra.mxu1 %v4489_v32 }
 0x128   :  { %6286 = vst [vmem:[#allocation19_spill] sm:$0xff] %v5390_v27  ;;  %v5392_v21 = vpop.f32.mrb[39].mxu1  ;;  %v4490_v27 = vld [vmem:[%s6258_s5 + $0x90] sm:$0xff]   ;;  %3034 = vmatprep.subr.bf16.mxu1 %v6282_v55 }
 0x129   :  { %6287 = vst [vmem:[#allocation20_spill] sm:$0xff] %v5392_v21  ;;  %4094 = vmatprep.subr.bf16.mxu0 %v4490_v27 }
 0x12a   :  { %1743 = vmatmul.mubr.bf16.gmra.mrb[16].mxu0 %v5015_v23  ;;  %2216 = vmatmul.mubr.bf16.gmra.mrb[144].mxu1 %v5381_v15  ;;  %v5411_v23 = vld [vmem:[%s6253_s0 + $0x150] ss:$8 sps:$4 sm:$0xff]  }
 0x12b   :  { %3864 = vmatprep.mubr.msk.bf16.mxu0 %vm1573_vm3, %v5021_v24  ;;  %3912 = vmatprep.mubr.msk.bf16.mxu1 %vm1573_vm3, %v5388_v20  ;;  %v5418_v24 = vld [vmem:[%s6253_s0 + $0x164] ss:$8 sps:$4 sm:$0xff]  }
 0x12c   :  { %4095 = vmatpush3.bf16.msra.mxu0 %v4490_v27  ;;  %v5436_v27 = vld [vmem:[%s6253_s0 + $0x160] ss:$8 sps:$4 sm:$0xff]  }
 0x12d   :  { %v5406_v11 = vpop.f32.mrb[40].mxu1 }
 0x12e   :  { %6288 = vst [vmem:[#allocation21_spill] sm:$0xff] %v5406_v11  ;;  %v5413_v21 = vpop.f32.mrb[41].mxu1 }
 0x12f   :  { %6289 = vst [vmem:[#allocation22_spill] sm:$0xff] %v5413_v21  ;;  %v5420_v18 = vpop.f32.mrb[42].mxu1 }
 0x130   :  { %6290 = vst [vmem:[#allocation23_spill] sm:$0xff] %v5420_v18  ;;  %v5423_v11 = vpop.f32.mrb[43].mxu1 }
 0x131   :  { %6291 = vst [vmem:[#allocation24_spill] sm:$0xff] %v5423_v11 }
 0x132   :  { %1753 = vmatmul.mubr.bf16.gmra.mrb[20].mxu0 %v5032_v25  ;;  %2224 = vmatmul.mubr.bf16.gmra.mrb[148].mxu1 %v5411_v23  ;;  %v5443_v25 = vld [vmem:[%s6253_s0 + $0x174] ss:$8 sps:$4 sm:$0xff]  }
 0x133   :  { %3865 = vmatprep.mubr.msk.bf16.mxu0 %vm1573_vm3, %v5037_v26  ;;  %3913 = vmatprep.mubr.msk.bf16.mxu1 %vm1573_vm3, %v5418_v24 }
 0x135   :  { %v5431_v32 = vpop.f32.mrb[44].mxu1 }
 0x136   :  { %6292 = vst [vmem:[#allocation25_spill] sm:$0xff] %v5431_v32  ;;  %v5438_v18 = vpop.f32.mrb[45].mxu1  ;;  %v4491_v32 = vld [vmem:[%s6258_s5 + $0x68] sm:$0xff]  }
 0x137   :  { %6293 = vst [vmem:[#allocation26_spill] sm:$0xff] %v5438_v18  ;;  %v5445_v11 = vpop.f32.mrb[46].mxu1  ;;  %3035 = vmatpush1.bf16.msra.mxu1 %v4491_v32 }
 0x138   :  { %6294 = vst [vmem:[#allocation27_spill] sm:$0xff] %v5445_v11  ;;  %v5447_v26 = vpop.f32.mrb[47].mxu1  ;;  %v5463_v11 = vld [vmem:[%s6253_s0 + $0x170] ss:$8 sps:$4 sm:$0xff]   ;;  %3036 = vmatprep.subr.bf16.mxu1 %v6282_v55 }
 0x139   :  { %6295 = vst [vmem:[#allocation28_spill] sm:$0xff] %v5447_v26 }
 0x13a   :  { %1763 = vmatmul.mubr.bf16.gmra.mrb[24].mxu0 %v5051_v28  ;;  %2232 = vmatmul.mubr.bf16.gmra.mrb[152].mxu1 %v5436_v27 }
 0x13b   :  { %3866 = vmatprep.mubr.msk.bf16.mxu0 %vm1573_vm3, %v5057_v29  ;;  %3914 = vmatprep.mubr.msk.bf16.mxu1 %vm1573_vm3, %v5443_v25  ;;  %v5470_v29 = vld [vmem:[%s6253_s0 + $0x184] ss:$8 sps:$4 sm:$0xff]  }
 0x13d   :  { %v5458_v18 = vpop.f32.mrb[48].mxu1 }
 0x13e   :  { %6296 = vst [vmem:[#allocation29_spill] sm:$0xff] %v5458_v18  ;;  %v5465_v28 = vpop.f32.mrb[49].mxu1 }
 0x13f   :  { %6297 = vst [vmem:[#allocation30_spill] sm:$0xff] %v5465_v28  ;;  %v5472_v26 = vpop.f32.mrb[50].mxu1  ;;  %v5527_v28 = vld [vmem:[%s6253_s0 + $0x1a4] ss:$8 sps:$4 sm:$0xff]  }
 0x140   :  { %6298 = vst [vmem:[#allocation31_spill] sm:$0xff] %v5472_v26  ;;  %v5475_v21 = vpop.f32.mrb[51].mxu1  ;;  %v5488_v26 = vld [vmem:[%s6253_s0 + $0x180] ss:$8 sps:$4 sm:$0xff]   ;;  %6308 = vst [vmem:[#allocation41_spill] sm:$0xff] %v5527_v28 }
 0x141   :  { %6299 = vst [vmem:[#allocation32_spill] sm:$0xff] %v5475_v21 }
 0x142   :  { %1773 = vmatmul.mubr.bf16.gmra.mrb[28].mxu0 %v5068_v30  ;;  %2240 = vmatmul.mubr.bf16.gmra.mrb[156].mxu1 %v5463_v11  ;;  %v5495_v30 = vld [vmem:[%s6253_s0 + $0x194] ss:$8 sps:$4 sm:$0xff]  }
 0x143   :  { %3867 = vmatprep.mubr.msk.bf16.mxu0 %vm1573_vm3, %v5073_v31  ;;  %3915 = vmatprep.mubr.msk.bf16.mxu1 %vm1573_vm3, %v5470_v29  ;;  %6302 = vst [vmem:[#allocation35_spill] sm:$0xff] %v5495_v30 }
 0x145   :  { %v5483_v32 = vpop.f32.mrb[52].mxu1 }
 0x146   :  { %6300 = vst [vmem:[#allocation33_spill] sm:$0xff] %v5483_v32  ;;  %v5490_v18 = vpop.f32.mrb[53].mxu1  ;;  %v4492_v32 = vld [vmem:[%s6258_s5 + $0x70] sm:$0xff]  }
 0x147   :  { %6301 = vst [vmem:[#allocation34_spill] sm:$0xff] %v5490_v18  ;;  %v5497_v21 = vpop.f32.mrb[54].mxu1  ;;  %3037 = vmatpush1.bf16.msra.mxu1 %v4492_v32 }
 0x148   :  { %6303 = vst [vmem:[#allocation36_spill] sm:$0xff] %v5497_v21  ;;  %v5499_v31 = vpop.f32.mrb[55].mxu1  ;;  %v4493_v21 = vld [vmem:[%s6258_s5 + $0x98] sm:$0xff]   ;;  %3038 = vmatprep.subr.bf16.mxu1 %v6282_v55  ;;  %v5547_v55 = vld [vmem:[%s6253_s0 + $0x1a0] ss:$8 sps:$4 sm:$0xff]  }
 0x149   :  { %6304 = vst [vmem:[#allocation37_spill] sm:$0xff] %v5499_v31  ;;  %4096 = vmatprep.subr.bf16.mxu0 %v4493_v21  ;;  %6313 = vst [vmem:[#allocation46_spill] sm:$0xff] %v5547_v55 }
 0x14a   :  { %1783 = vmatmul.mubr.bf16.gmra.mrb[32].mxu0 %v5087_v33  ;;  %2248 = vmatmul.mubr.bf16.gmra.mrb[160].mxu1 %v5488_v26  ;;  %v5518_v33 = vld [vmem:[%s6253_s0 + $0x190] ss:$8 sps:$4 sm:$0xff]  }
 0x14b   :  { %3868 = vmatprep.mubr.msk.bf16.mxu0 %vm1573_vm3, %v5093_v34  ;;  %3916 = vmatprep.mubr.msk.bf16.mxu1 %vm1573_vm3, %v5495_v30  ;;  %v2314_v30 = vlaneseq }
 0x14c   :  { %4097 = vmatpush3.bf16.msra.mxu0 %v4493_v21 }
 0x14d   :  { %v5513_v18 = vpop.f32.mrb[56].mxu1  ;;  %v5538_v32 = vshrl.u32 %v2314_v30, 7 }
 0x14e   :  { %6305 = vst [vmem:[#allocation38_spill] sm:$0xff] %v5513_v18  ;;  %v5520_v31 = vpop.f32.mrb[57].mxu1 }
 0x14f   :  { %6306 = vst [vmem:[#allocation39_spill] sm:$0xff] %v5520_v31  ;;  %v5522_v34 = vpop.f32.mrb[58].mxu1  ;;  %6310 = vst [vmem:[#allocation43_spill] sm:$0xff] %v5538_v32  ;;  %v2324_v30 = vsub.s32 2, %v5538_v32 }
 0x150   :  { %6307 = vst [vmem:[#allocation40_spill] sm:$0xff] %v5522_v34  ;;  %v5530_v18 = vpop.f32.mrb[59].mxu1 }
 0x151   :  { %6309 = vst [vmem:[#allocation42_spill] sm:$0xff] %v5530_v18 }
 0x152   :  { %1793 = vmatmul.mubr.bf16.gmra.mrb[36].mxu0 %v5104_v35  ;;  %2256 = vmatmul.mubr.bf16.gmra.mrb[164].mxu1 %v5518_v33 }
 0x153   :  { %3869 = vmatprep.mubr.msk.bf16.mxu0 %vm1573_vm3, %v5109_v36  ;;  %3917 = vmatprep.mubr.msk.bf16.mxu1 %vm1573_vm3, %v5527_v28  ;;  %v5554_v36 = vld [vmem:[%s6253_s0 + $0x1b4] ss:$8 sps:$4 sm:$0xff]  }
 0x154   :  { %6315 = vst [vmem:[#allocation48_spill] sm:$0xff] %v5554_v36 }
 0x155   :  { %v5540_v34 = vpop.f32.mrb[60].mxu1 }
 0x156   :  { %6311 = vst [vmem:[#allocation44_spill] sm:$0xff] %v5540_v34  ;;  %v5542_v21 = vpop.f32.mrb[61].mxu1  ;;  %v5562_v34 = vld [vmem:[%s6257_s4] sm:$0x7] }
 0x157   :  { %6312 = vst [vmem:[#allocation45_spill] sm:$0xff] %v5542_v21  ;;  %v5549_v35 = vpop.f32.mrb[62].mxu1  ;;  %6317 = vst [vmem:[#allocation50_spill] sm:$0xff] %v5562_v34 }
 0x158   :  { %6314 = vst [vmem:[#allocation47_spill] sm:$0xff] %v5549_v35  ;;  %v5556_v18 = vpop.f32.mrb[63].mxu1  ;;  %v5571_v35 = vrot.slane %v5562_v34, %v2324_v30  ;;  %v5585_v30 = vld [vmem:[%s6253_s0 + $0x1c4] ss:$8 sps:$4 sm:$0xff]  }
 0x159   :  { %6316 = vst [vmem:[#allocation49_spill] sm:$0xff] %v5556_v18  ;;  %v4494_v18 = vld [vmem:[%s6258_s5 + $0x78] sm:$0xff]  }
 0x15a   :  { %1803 = vmatmul.mubr.bf16.gmra.mrb[40].mxu0 %v5123_v38  ;;  %2264 = vmatmul.mubr.bf16.gmra.mrb[168].mxu1 %v5547_v55  ;;  %v5580_v38 = vld [vmem:[%s6253_s0 + $0x1b0] ss:$8 sps:$4 sm:$0xff]  }
 0x15b   :  { %3870 = vmatprep.mubr.msk.bf16.mxu0 %vm1573_vm3, %v5128_v39  ;;  %3918 = vmatprep.mubr.msk.bf16.mxu1 %vm1573_vm3, %v5554_v36 }
 0x15c   :  { %3039 = vmatpush1.bf16.msra.mxu1 %v4494_v18 }
 0x15d   :  { %v2057_v21 = vpop.f32.mrb[64].mxu1 }
 0x15e   :  { %v2058_v31 = vadd.f32 %v2057_v21, %v5144_v42  ;;  %v2059_v32 = vpop.f32.mrb[65].mxu1 }
 0x15f   :  { %v2060_v39 = vpop.f32.mrb[66].mxu1 }
 0x160   :  { %v2331_v36 = vadd.f32 %v5571_v35, %v2058_v31  ;;  %v2061_v34 = vadd.f32 %v2060_v39, %v5153_v45  ;;  %v2062_v55 = vpop.f32.mrb[67].mxu1  ;;  %v5600_v45 = vld [vmem:[%s6253_s0 + $0x1c0] ss:$8 sps:$4 sm:$0xff]  }
 0x162   :  { %v2334_v42 = vadd.f32 %v5571_v35, %v2061_v34  ;;  %1813 = vmatmul.mubr.bf16.gmra.mrb[44].mxu0 %v5142_v41  ;;  %2272 = vmatmul.mubr.bf16.gmra.mrb[172].mxu1 %v5580_v38  ;;  %v2523_v18 = vmax.f32 %v2331_v36, 0.0 }
 0x163   :  { %3871 = vmatprep.mubr.msk.bf16.mxu0 %vm1573_vm3, %v5149_v43  ;;  %3919 = vmatprep.mubr.msk.bf16.mxu1 %vm1573_vm3, %v5585_v30  ;;  %v5607_v43 = vld [vmem:[%s6253_s0 + $0x1d4] ss:$8 sps:$4 sm:$0xff]  }
 0x164   :  { %v2526_v32 = vmax.f32 %v2334_v42, 0.0 }
 0x165   :  { %v2065_v21 = vpop.f32.mrb[68].mxu1 }
 0x166   :  { %v2066_v31 = vadd.f32 %v5137_v40, %v2065_v21  ;;  %v2067_v28 = vpop.f32.mrb[69].mxu1  ;;  %v5602_v41 = vpack.c.bf16 %v2526_v32, %v2523_v18 }
 0x167   :  { %v2068_v34 = vpop.f32.mrb[70].mxu1 }
 0x168   :  { %v2337_v55 = vadd.f32 %v5571_v35, %v2066_v31  ;;  %v2069_v36 = vadd.f32 %v5151_v44, %v2068_v34  ;;  %v2070_v39 = vpop.f32.mrb[71].mxu1  ;;  %v4495_v44 = vld [vmem:[%s6258_s5 + $0xa0] sm:$0xff]   ;;  %v5627_v31 = vld [vmem:[%s6253_s0 + $0x1d0] ss:$8 sps:$4 sm:$0xff]  }
 0x169   :  { %v5632_v34 = vld [vmem:[%s6253_s0 + $0x1e4] ss:$8 sps:$4 sm:$0xff]   ;;  %4098 = vmatprep.subr.bf16.mxu0 %v4495_v44 }
 0x16a   :  { %v2340_v40 = vadd.f32 %v5571_v35, %v2069_v36  ;;  %1823 = vmatmul.mubr.bf16.gmra.mrb[48].mxu0 %v5166_v47  ;;  %2280 = vmatmul.mubr.bf16.gmra.mrb[176].mxu1 %v5600_v45  ;;  %v2529_v28 = vmax.f32 %v2337_v55, 0.0 }
 0x16b   :  { %3872 = vmatprep.mubr.msk.bf16.mxu0 %vm1573_vm3, %v5173_v49  ;;  %3920 = vmatprep.mubr.msk.bf16.mxu1 %vm1573_vm3, %v5607_v43 }
 0x16c   :  { %v2532_v42 = vmax.f32 %v2340_v40, 0.0  ;;  %4099 = vmatpush3.bf16.msra.mxu0 %v4495_v44  ;;  %v5647_v44 = vld [vmem:[%s6253_s0 + $0x1e0] ss:$8 sps:$4 sm:$0xff]  }
 0x16d   :  { %v2073_v18 = vpop.f32.mrb[72].mxu1 }
 0x16e   :  { %v5621_v32 = vpack.c.bf16 %v2532_v42, %v2529_v28  ;;  %v2074_v21 = vadd.f32 %v2073_v18, %v5168_v48  ;;  %v2075_v47 = vpop.f32.mrb[73].mxu1 }
 0x16f   :  { %v2076_v49 = vpop.f32.mrb[74].mxu1 }
 0x170   :  { %v2343_v55 = vadd.f32 %v5571_v35, %v2074_v21  ;;  %v2077_v36 = vadd.f32 %v2076_v49, %v5177_v51  ;;  %v2078_v39 = vpop.f32.mrb[75].mxu1 }
 0x172   :  { %v2346_v48 = vadd.f32 %v5571_v35, %v2077_v36  ;;  %1833 = vmatmul.mubr.bf16.gmra.mrb[52].mxu0 %v5190_v53  ;;  %2288 = vmatmul.mubr.bf16.gmra.mrb[180].mxu1 %v5627_v31  ;;  %v2535_v40 = vmax.f32 %v2343_v55, 0.0 }
 0x173   :  { %3873 = vmatprep.mubr.msk.bf16.mxu0 %vm1573_vm3, %v5203_v57  ;;  %3921 = vmatprep.mubr.msk.bf16.mxu1 %vm1573_vm3, %v5632_v34  ;;  %v5654_v57 = vld [vmem:[%s6253_s0 + $0x1f4] ss:$8 sps:$4 sm:$0xff]  }
 0x174   :  { %v2538_v28 = vmax.f32 %v2346_v48, 0.0  ;;  %v4496_v48 = vld [vmem:[%s6258_s5 + $0xa8] sm:$0xff]  }
 0x175   :  { %v2081_v42 = vpop.f32.mrb[76].mxu1  ;;  %4100 = vmatprep.subr.bf16.mxu0 %v4496_v48 }
 0x176   :  { %v2082_v18 = vadd.f32 %v5161_v46, %v2081_v42  ;;  %v2083_v51 = vpop.f32.mrb[77].mxu1  ;;  %v5649_v53 = vpack.c.bf16 %v2538_v28, %v2535_v40  ;;  %4101 = vmatpush3.bf16.msra.mxu0 %v4496_v48 }
 0x177   :  { %v2084_v21 = vpop.f32.mrb[78].mxu1 }
 0x178   :  { %v2349_v47 = vadd.f32 %v5571_v35, %v2082_v18  ;;  %v2085_v49 = vadd.f32 %v5175_v50, %v2084_v21  ;;  %v2086_v55 = vpop.f32.mrb[79].mxu1 }
 0x17a   :  { %v2352_v46 = vadd.f32 %v5571_v35, %v2085_v49  ;;  %1843 = vmatmul.mubr.bf16.gmra.mrb[56].mxu0 %v5221_v61  ;;  %2296 = vmatmul.mubr.bf16.gmra.mrb[184].mxu1 %v5647_v44  ;;  %v2541_v36 = vmax.f32 %v2349_v47, 0.0  ;;  %v5672_v61 = vld [vmem:[%s6253_s0 + $0x1f0] ss:$8 sps:$4 sm:$0xff]  }
 0x17b   :  { %3874 = vmatprep.mubr.msk.bf16.mxu0 %vm1573_vm3, %v5228_v63  ;;  %3922 = vmatprep.mubr.msk.bf16.mxu1 %vm1573_vm3, %v5654_v57 }
 0x17c   :  { %v2544_v39 = vmax.f32 %v2352_v46, 0.0 }
 0x17d   :  { %v2089_v50 = vpop.f32.mrb[80].mxu1 }
 0x17e   :  { %v2090_v40 = vadd.f32 %v2089_v50, %v5192_v54  ;;  %v2091_v28 = vpop.f32.mrb[81].mxu1  ;;  %v5674_v63 = vpack.c.bf16 %v2544_v39, %v2541_v36  ;;  %v4497_v54 = vld [vmem:[%s6258_s5 + $0xb0] sm:$0xff]  }
 0x17f   :  { %v2092_v42 = vpop.f32.mrb[82].mxu1  ;;  %4102 = vmatprep.subr.bf16.mxu0 %v4497_v54 }
 0x180   :  { %v2355_v18 = vadd.f32 %v5571_v35, %v2090_v40  ;;  %v2093_v51 = vadd.f32 %v2092_v42, %v5207_v59  ;;  %v2094_v21 = vpop.f32.mrb[83].mxu1  ;;  %4103 = vmatpush3.bf16.msra.mxu0 %v4497_v54  ;;  %v4498_v59 = vld [vmem:[%s6258_s5 + $0xb8] sm:$0xff]  }
 0x181   :  { %4104 = vmatprep.subr.bf16.mxu0 %v4498_v59 }
 0x182   :  { %v2358_v47 = vadd.f32 %v5571_v35, %v2093_v51  ;;  %1853 = vmatmul.mubr.bf16.gmra.mrb[60].mxu0 %v5248_v4  ;;  %2304 = vmatmul.mubr.bf16.gmra.mrb[188].mxu1 %v5672_v61  ;;  %v2547_v49 = vmax.f32 %v2355_v18, 0.0 }
 0x183   :  { %3875 = vmatprep.mubr.msk.bf16.mxu0 %vm1573_vm3, %v5255_v6 }
 0x184   :  { %v2550_v55 = vmax.f32 %v2358_v47, 0.0  ;;  %4105 = vmatpush3.bf16.msra.mxu0 %v4498_v59 }
 0x185   :  { %v2097_v46 = vpop.f32.mrb[84].mxu1 }
 0x186   :  { %v2098_v36 = vadd.f32 %v5185_v52, %v2097_v46  ;;  %v2099_v39 = vpop.f32.mrb[85].mxu1  ;;  %v5690_v48 = vpack.c.bf16 %v2550_v55, %v2547_v49 }
 0x187   :  { %v2100_v4 = vpop.f32.mrb[86].mxu1 }
 0x188   :  { %v2361_v50 = vadd.f32 %v5571_v35, %v2098_v36  ;;  %v2101_v6 = vadd.f32 %v5205_v58, %v2100_v4  ;;  %v2102_v40 = vpop.f32.mrb[87].mxu1 }
 0x18a   :  { %v2364_v28 = vadd.f32 %v5571_v35, %v2101_v6  ;;  %1863 = vmatmul.mubr.bf16.gmra.mrb[64].mxu0 %v5274_v17  ;;  %v2553_v42 = vmax.f32 %v2361_v50, 0.0 }
 0x18b   :  { %3876 = vmatprep.mubr.msk.bf16.mxu0 %vm1573_vm3, %v5281_v7 }
 0x18c   :  { %v2556_v52 = vmax.f32 %v2364_v28, 0.0 }
 0x18d   :  { %v2105_v18 = vpop.f32.mrb[88].mxu1 }
 0x18e   :  { %v2106_v51 = vadd.f32 %v2105_v18, %v5223_v62  ;;  %v2107_v21 = vpop.f32.mrb[89].mxu1  ;;  %v5699_v54 = vpack.c.bf16 %v2556_v52, %v2553_v42 }
 0x18f   :  { %v2108_v47 = vpop.f32.mrb[90].mxu1 }
 0x190   :  { %v2367_v58 = vadd.f32 %v5571_v35, %v2106_v51  ;;  %v2109_v49 = vadd.f32 %v2108_v47, %v5232_v1  ;;  %v2110_v55 = vpop.f32.mrb[91].mxu1 }
 0x192   :  { %v2370_v59 = vadd.f32 %v5571_v35, %v2109_v49  ;;  %1873 = vmatmul.mubr.bf16.gmra.mrb[68].mxu0 %v5304_v9  ;;  %v2559_v17 = vmax.f32 %v2367_v58, 0.0 }
 0x193   :  { %3877 = vmatprep.mubr.msk.bf16.mxu0 %vm1573_vm3, %v5311_v56 }
 0x194   :  { %v2562_v7 = vmax.f32 %v2370_v59, 0.0 }
 0x195   :  { %v2113_v46 = vpop.f32.mrb[92].mxu1 }
 0x196   :  { %v2114_v62 = vadd.f32 %v5216_v60, %v2113_v46  ;;  %v2115_v36 = vpop.f32.mrb[93].mxu1  ;;  %v5708_v39 = vpack.c.bf16 %v2562_v7, %v2559_v17 }
 0x197   :  { %v2116_v4 = vpop.f32.mrb[94].mxu1 }
 0x198   :  { %v2373_v50 = vadd.f32 %v5571_v35, %v2114_v62  ;;  %v2117_v1 = vadd.f32 %v5230_v0, %v2116_v4  ;;  %v2118_v6 = vpop.f32.mrb[95].mxu1 }
 0x19a   :  { %v2376_v40 = vadd.f32 %v5571_v35, %v2117_v1  ;;  %1883 = vmatmul.mubr.bf16.gmra.mrb[72].mxu0 %v5329_v2  ;;  %v2565_v9 = vmax.f32 %v2373_v50, 0.0 }
 0x19b   :  { %3878 = vmatprep.mubr.msk.bf16.mxu0 %vm1573_vm3, %v5336_v14 }
 0x19c   :  { %v2568_v56 = vmax.f32 %v2376_v40, 0.0 }
 0x19d   :  { %v2121_v28 = vpop.f32.mrb[96].mxu1 }
 0x19e   :  { %v2122_v60 = vadd.f32 %v2121_v28, %v5250_v5  ;;  %v2123_v42 = vpop.f32.mrb[97].mxu1  ;;  %v5717_v52 = vpack.c.bf16 %v2568_v56, %v2565_v9 }
 0x19f   :  { %v2124_v18 = vpop.f32.mrb[98].mxu1 }
 0x1a0   :  { %v2379_v51 = vadd.f32 %v5571_v35, %v2122_v60  ;;  %v2125_v0 = vadd.f32 %v2124_v18, %v5260_v13  ;;  %v2126_v21 = vpop.f32.mrb[99].mxu1 }
 0x1a2   :  { %v2382_v47 = vadd.f32 %v5571_v35, %v2125_v0  ;;  %1893 = vmatmul.mubr.bf16.gmra.mrb[76].mxu0 %v5356_v37  ;;  %v2571_v2 = vmax.f32 %v2379_v51, 0.0 }
 0x1a3   :  { %3879 = vmatprep.mubr.msk.bf16.mxu0 %vm1573_vm3, %v5363_v19 }
 0x1a4   :  { %v2574_v14 = vmax.f32 %v2382_v47, 0.0 }
 0x1a5   :  { %v2129_v58 = vpop.f32.mrb[100].mxu1 }
 0x1a6   :  { %v2130_v5 = vadd.f32 %v5243_v3, %v2129_v58  ;;  %v2131_v49 = vpop.f32.mrb[101].mxu1  ;;  %v5726_v55 = vpack.c.bf16 %v2574_v14, %v2571_v2 }
 0x1a7   :  { %v2132_v59 = vpop.f32.mrb[102].mxu1 }
 0x1a8   :  { %v2385_v17 = vadd.f32 %v5571_v35, %v2130_v5  ;;  %v2133_v13 = vadd.f32 %v5257_v12, %v2132_v59  ;;  %v2134_v7 = vpop.f32.mrb[103].mxu1  ;;  %v6319_v5 = vld [vmem:[#allocation8_spill] sm:$0xff] }
 0x1aa   :  { %v2388_v46 = vadd.f32 %v5571_v35, %v2133_v13  ;;  %1903 = vmatmul.mubr.bf16.gmra.mrb[80].mxu0 %v5381_v15  ;;  %v2577_v37 = vmax.f32 %v2385_v17, 0.0 }
 0x1ab   :  { %3880 = vmatprep.mubr.msk.bf16.mxu0 %vm1573_vm3, %v5388_v20 }
 0x1ac   :  { %v2580_v19 = vmax.f32 %v2388_v46, 0.0 }
 0x1ad   :  { %v2137_v62 = vpop.f32.mrb[104].mxu1 }
 0x1ae   :  { %v2138_v3 = vadd.f32 %v2137_v62, %v5276_v22  ;;  %v2139_v36 = vpop.f32.mrb[105].mxu1  ;;  %v5735_v4 = vpack.c.bf16 %v2580_v19, %v2577_v37 }
 0x1af   :  { %v2140_v50 = vpop.f32.mrb[106].mxu1 }
 0x1b0   :  { %v2391_v1 = vadd.f32 %v5571_v35, %v2138_v3  ;;  %v2141_v12 = vadd.f32 %v2140_v50, %v5285_v8  ;;  %v2142_v6 = vpop.f32.mrb[107].mxu1  ;;  %v6318_v8 = vld [vmem:[#allocation5_spill] sm:$0xff]  ;;  %v6321_v3 = vld [vmem:[#allocation7_spill] sm:$0xff] }
 0x1b2   :  { %v2394_v40 = vadd.f32 %v5571_v35, %v2141_v12  ;;  %1913 = vmatmul.mubr.bf16.gmra.mrb[84].mxu0 %v5411_v23  ;;  %v2583_v15 = vmax.f32 %v2391_v1, 0.0 }
 0x1b3   :  { %3881 = vmatprep.mubr.msk.bf16.mxu0 %vm1573_vm3, %v5418_v24 }
 0x1b4   :  { %v2586_v20 = vmax.f32 %v2394_v40, 0.0  ;;  %v6323_v40 = vld [vmem:[#allocation10_spill] sm:$0xff] }
 0x1b5   :  { %v2145_v9 = vpop.f32.mrb[108].mxu1 }
 0x1b6   :  { %v2146_v22 = vadd.f32 %v5269_v16, %v2145_v9  ;;  %v2147_v56 = vpop.f32.mrb[109].mxu1  ;;  %v5744_v28 = vpack.c.bf16 %v2586_v20, %v2583_v15 }
 0x1b7   :  { %v2148_v60 = vpop.f32.mrb[110].mxu1 }
 0x1b8   :  { %v2397_v42 = vadd.f32 %v5571_v35, %v2146_v22  ;;  %v2149_v18 = vadd.f32 %v6318_v8, %v2148_v60  ;;  %v2150_v51 = vpop.f32.mrb[111].mxu1  ;;  %v6324_v60 = vld [vmem:[#allocation12_spill] sm:$0xff] }
 0x1ba   :  { %v2400_v0 = vadd.f32 %v5571_v35, %v2149_v18  ;;  %1923 = vmatmul.mubr.bf16.gmra.mrb[88].mxu0 %v5436_v27  ;;  %v2589_v23 = vmax.f32 %v2397_v42, 0.0 }
 0x1bb   :  { %3882 = vmatprep.mubr.msk.bf16.mxu0 %vm1573_vm3, %v5443_v25 }
 0x1bc   :  { %v2592_v24 = vmax.f32 %v2400_v0, 0.0 }
 0x1bd   :  { %v2153_v21 = vpop.f32.mrb[112].mxu1 }
 0x1be   :  { %v2154_v16 = vadd.f32 %v2153_v21, %v5306_v10  ;;  %v2155_v47 = vpop.f32.mrb[113].mxu1  ;;  %v5753_v2 = vpack.c.bf16 %v2592_v24, %v2589_v23  ;;  %v6320_v10 = vld [vmem:[#allocation6_spill] sm:$0xff]  ;;  %v6326_v24 = vld [vmem:[#allocation9_spill] sm:$0xff] }
 0x1bf   :  { %v2156_v14 = vpop.f32.mrb[114].mxu1  ;;  %v6327_v47 = vld [vmem:[#allocation43_spill] sm:$0xff] }
 0x1c0   :  { %v2403_v58 = vadd.f32 %v5571_v35, %v2154_v16  ;;  %v2157_v49 = vadd.f32 %v2156_v14, %v6319_v5  ;;  %v2158_v59 = vpop.f32.mrb[115].mxu1  ;;  %v2316_v14 = vsub.s32 0, %v6327_v47 }
 0x1c2   :  { %v2406_v17 = vadd.f32 %v5571_v35, %v2157_v49  ;;  %1933 = vmatmul.mubr.bf16.gmra.mrb[92].mxu0 %v5463_v11  ;;  %v2595_v27 = vmax.f32 %v2403_v58, 0.0  ;;  %v6322_v11 = vld [vmem:[#allocation35_spill] sm:$0xff]  ;;  %v2320_v49 = vsub.s32 1, %v6327_v47 }
 0x1c3   :  { %3883 = vmatprep.mubr.msk.bf16.mxu0 %vm1573_vm3, %v5470_v29 }
 0x1c4   :  { %v2598_v25 = vmax.f32 %v2406_v17, 0.0  ;;  %v6328_v17 = vld [vmem:[#allocation11_spill] sm:$0xff] }
 0x1c5   :  { %v2161_v13 = vpop.f32.mrb[116].mxu1 }
 0x1c6   :  { %v2162_v7 = vadd.f32 %v6320_v10, %v2161_v13  ;;  %v2163_v46 = vpop.f32.mrb[117].mxu1  ;;  %v5762_v37 = vpack.c.bf16 %v2598_v25, %v2595_v27  ;;  %v6329_v13 = vld [vmem:[#allocation46_spill] sm:$0xff] }
 0x1c7   :  { %v2164_v19 = vpop.f32.mrb[118].mxu1  ;;  %v6330_v10 = vld [vmem:[#allocation50_spill] sm:$0xff] }
 0x1c8   :  { %v2409_v62 = vadd.f32 %v5571_v35, %v2162_v7  ;;  %v2165_v36 = vadd.f32 %v6321_v3, %v2164_v19  ;;  %v2166_v50 = vpop.f32.mrb[119].mxu1  ;;  %v5789_v7 = vrot.slane %v6330_v10, %v2316_v14  ;;  %v5792_v46 = vrot.slane %v6330_v10, %v2320_v49  ;;  %v6331_v19 = vld [vmem:[#allocation48_spill] sm:$0xff] }
 0x1ca   :  { %v2412_v1 = vadd.f32 %v5571_v35, %v2165_v36  ;;  %1943 = vmatmul.mubr.bf16.gmra.mrb[96].mxu0 %v5488_v26  ;;  %v2601_v29 = vmax.f32 %v2409_v62, 0.0  ;;  %v6325_v26 = vld [vmem:[#allocation41_spill] sm:$0xff] }
 0x1cb   :  { %3884 = vmatprep.mubr.msk.bf16.mxu0 %vm1573_vm3, %v6322_v11  ;;  %v6332_v11 = vld [vmem:[#allocation14_spill] sm:$0xff] }
 0x1cc   :  { %v2604_v12 = vmax.f32 %v2412_v1, 0.0 }
 0x1cd   :  { %v2169_v6 = vpop.f32.mrb[120].mxu1 }
 0x1ce   :  { %v2170_v15 = vadd.f32 %v2169_v6, %v6323_v40  ;;  %v2171_v20 = vpop.f32.mrb[121].mxu1  ;;  %v5771_v9 = vpack.c.bf16 %v2604_v12, %v2601_v29 }
 0x1cf   :  { %v2172_v22 = vpop.f32.mrb[122].mxu1 }
 0x1d0   :  { %v2415_v56 = vadd.f32 %v5571_v35, %v2170_v15  ;;  %v2173_v42 = vadd.f32 %v2172_v22, %v6324_v60  ;;  %v2174_v8 = vpop.f32.mrb[123].mxu1 }
 0x1d2   :  { %v2418_v18 = vadd.f32 %v5571_v35, %v2173_v42  ;;  %1953 = vmatmul.mubr.bf16.gmra.mrb[100].mxu0 %v5518_v33  ;;  %v2607_v51 = vmax.f32 %v2415_v56, 0.0  ;;  %v6333_v42 = vld [vmem:[#allocation16_spill] sm:$0xff] }
 0x1d3   :  { %3885 = vmatprep.mubr.msk.bf16.mxu0 %vm1573_vm3, %v6325_v26 }
 0x1d4   :  { %v2610_v0 = vmax.f32 %v2418_v18, 0.0 }
 0x1d5   :  { %v2177_v23 = vpop.f32.mrb[124].mxu1 }
 0x1d6   :  { %v2178_v21 = vadd.f32 %v6326_v24, %v2177_v23  ;;  %v2179_v16 = vpop.f32.mrb[125].mxu1  ;;  %v5781_v58 = vpack.c.bf16 %v2610_v0, %v2607_v51 }
 0x1d7   :  { %v2180_v5 = vpop.f32.mrb[126].mxu1 }
 0x1d8   :  { %v2421_v59 = vadd.f32 %v5571_v35, %v2178_v21  ;;  %v2181_v33 = vadd.f32 %v6328_v17, %v2180_v5  ;;  %v2182_v27 = vpop.f32.mrb[127].mxu1 }
 0x1d9   :  { %v6334_v27 = vld [vmem:[#allocation13_spill] sm:$0xff] }
 0x1da   :  { %v2424_v25 = vadd.f32 %v5571_v35, %v2181_v33  ;;  %1963 = vmatmul.mubr.bf16.gmra.mrb[104].mxu0 %v6329_v13  ;;  %v2613_v62 = vmax.f32 %v2421_v59, 0.0 }
 0x1db   :  { %3886 = vmatprep.mubr.msk.bf16.mxu0 %vm1573_vm3, %v6331_v19 }
 0x1dc   :  { %v2616_v3 = vmax.f32 %v2424_v25, 0.0 }
 0x1dd   :  { %v1704_v36 = vpop.f32.mrb[0].mxu0  ;;  %v2185_v50 = vpop.f32.mrb[128].mxu1 }
 0x1de   :  { %v2329_v1 = vadd.f32 %v5789_v7, %v1704_v36  ;;  %v2186_v29 = vadd.f32 %v2185_v50, %v6332_v11  ;;  %v1706_v12 = vpop.f32.mrb[1].mxu0  ;;  %v2187_v6 = vpop.f32.mrb[129].mxu1  ;;  %v5798_v40 = vpack.c.bf16 %v2616_v3, %v2613_v62  ;;  %v6335_v50 = vld [vmem:[#allocation15_spill] sm:$0xff] }
 0x1df   :  { %v2330_v15 = vadd.f32 %v5792_v46, %v1706_v12  ;;  %v1708_v20 = vpop.f32.mrb[2].mxu0  ;;  %v2188_v22 = vpop.f32.mrb[130].mxu1 }
 0x1e0   :  { %v2427_v56 = vadd.f32 %v5571_v35, %v2186_v29  ;;  %v2332_v60 = vadd.f32 %v5789_v7, %v1708_v20  ;;  %v2189_v8 = vadd.f32 %v2188_v22, %v6333_v42  ;;  %v1710_v18 = vpop.f32.mrb[3].mxu0  ;;  %v2190_v26 = vpop.f32.mrb[131].mxu1  ;;  %v2521_v0 = vmax.f32 %v2329_v1, 0.0 }
 0x1e1   :  { %v2333_v51 = vadd.f32 %v5792_v46, %v1710_v18  ;;  %v2522_v21 = vmax.f32 %v2330_v15, 0.0 }
 0x1e2   :  { %v2524_v23 = vmax.f32 %v2332_v60, 0.0  ;;  %v2430_v24 = vadd.f32 %v5571_v35, %v2189_v8  ;;  %1973 = vmatmul.mubr.bf16.gmra.mrb[108].mxu0 %v5580_v38  ;;  %v2619_v47 = vmax.f32 %v2427_v56, 0.0 }
 0x1e3   :  { %v2525_v16 = vmax.f32 %v2333_v51, 0.0  ;;  %3887 = vmatprep.mubr.msk.bf16.mxu0 %vm1573_vm3, %v5585_v30 }
 0x1e4   :  { %v2713_v14 = vpack.c.bf16 %v2524_v23, %v2521_v0  ;;  %v2622_v5 = vmax.f32 %v2430_v24, 0.0  ;;  %v6336_v23 = vld [vmem:[#allocation18_spill] sm:$0xff] }
 0x1e5   :  { %v2714_v49 = vpack.c.bf16 %v2525_v16, %v2522_v21  ;;  %v1714_v59 = vpop.f32.mrb[4].mxu0  ;;  %v2193_v17 = vpop.f32.mrb[132].mxu1 }
 0x1e6   :  { %v2335_v33 = vadd.f32 %v5789_v7, %v1714_v59  ;;  %v2194_v25 = vadd.f32 %v6334_v27, %v2193_v17  ;;  %v1716_v13 = vpop.f32.mrb[5].mxu0  ;;  %v2195_v10 = vpop.f32.mrb[133].mxu1  ;;  %v5811_v19 = vpack.c.bf16 %v2622_v5, %v2619_v47  ;;  %v6337_v59 = vld [vmem:[#allocation20_spill] sm:$0xff] }
 0x1e7   :  { %v2336_v38 = vadd.f32 %v5792_v46, %v1716_v13  ;;  %v1718_v62 = vpop.f32.mrb[6].mxu0  ;;  %v2196_v3 = vpop.f32.mrb[134].mxu1  ;;  %3040 = vmatprep.mubr.bf16.mxu1 %v2714_v49 }
 0x1e8   :  { %v2433_v30 = vadd.f32 %v5571_v35, %v2194_v25  ;;  %v2338_v36 = vadd.f32 %v5789_v7, %v1718_v62  ;;  %v2197_v1 = vadd.f32 %v6335_v50, %v2196_v3  ;;  %v1720_v11 = vpop.f32.mrb[7].mxu0  ;;  %3041 = vmatmul.mubr.bf16.vlgmr.msra.gmra.mrb[192].mxu1 %v2713_v14  ;;  %v2198_v29 = vpop.f32.mrb[135].mxu1  ;;  %v2527_v6 = vmax.f32 %v2335_v33, 0.0 }
 0x1e9   :  { %v2339_v12 = vadd.f32 %v5792_v46, %v1720_v11  ;;  %v2528_v22 = vmax.f32 %v2336_v38, 0.0 }
 0x1ea   :  { %v2530_v15 = vmax.f32 %v2338_v36, 0.0  ;;  %v2436_v20 = vadd.f32 %v5571_v35, %v2197_v1  ;;  %1983 = vmatmul.mubr.bf16.gmra.mrb[112].mxu0 %v5600_v45  ;;  %v2625_v60 = vmax.f32 %v2433_v30, 0.0 }
 0x1eb   :  { %v2531_v56 = vmax.f32 %v2339_v12, 0.0  ;;  %3888 = vmatprep.mubr.msk.bf16.mxu0 %vm1573_vm3, %v5607_v43 }
 0x1ec   :  { %v2716_v42 = vpack.c.bf16 %v2530_v15, %v2527_v6  ;;  %v2628_v8 = vmax.f32 %v2436_v20, 0.0  ;;  %v6338_v6 = vld [vmem:[#allocation17_spill] sm:$0xff] }
 0x1ed   :  { %v2717_v18 = vpack.c.bf16 %v2531_v56, %v2528_v22  ;;  %v1724_v26 = vpop.f32.mrb[8].mxu0  ;;  %v2201_v51 = vpop.f32.mrb[136].mxu1 }
 0x1ee   :  { %v2341_v0 = vadd.f32 %v5789_v7, %v1724_v26  ;;  %v2202_v24 = vadd.f32 %v2201_v51, %v6336_v23  ;;  %v1726_v21 = vpop.f32.mrb[9].mxu0  ;;  %v2203_v16 = vpop.f32.mrb[137].mxu1  ;;  %v5824_v47 = vpack.c.bf16 %v2628_v8, %v2625_v60 }
 0x1ef   :  { %v2342_v45 = vadd.f32 %v5792_v46, %v1726_v21  ;;  %v1728_v14 = vpop.f32.mrb[10].mxu0  ;;  %v2204_v5 = vpop.f32.mrb[138].mxu1  ;;  %3048 = vmatprep.mubr.bf16.mxu1 %v2717_v18  ;;  %v6339_v18 = vld [vmem:[#allocation19_spill] sm:$0xff] }
 0x1f0   :  { %v2439_v43 = vadd.f32 %v5571_v35, %v2202_v24  ;;  %v2344_v49 = vadd.f32 %v5789_v7, %v1728_v14  ;;  %v2205_v17 = vadd.f32 %v2204_v5, %v6337_v59  ;;  %v1730_v33 = vpop.f32.mrb[11].mxu0  ;;  %3049 = vmatmul.mubr.bf16.gmra.mrb[196].mxu1 %v2716_v42  ;;  %v2206_v27 = vpop.f32.mrb[139].mxu1  ;;  %v2533_v13 = vmax.f32 %v2341_v0, 0.0 }
 0x1f1   :  { %v2345_v25 = vadd.f32 %v5792_v46, %v1730_v33  ;;  %v2534_v62 = vmax.f32 %v2342_v45, 0.0 }
 0x1f2   :  { %v2536_v10 = vmax.f32 %v2344_v49, 0.0  ;;  %v2442_v38 = vadd.f32 %v5571_v35, %v2205_v17  ;;  %1993 = vmatmul.mubr.bf16.gmra.mrb[116].mxu0 %v5627_v31  ;;  %v2631_v30 = vmax.f32 %v2439_v43, 0.0 }
 0x1f3   :  { %v2537_v3 = vmax.f32 %v2345_v25, 0.0  ;;  %3889 = vmatprep.mubr.msk.bf16.mxu0 %vm1573_vm3, %v5632_v34  ;;  %v6340_v25 = vld [vmem:[#allocation22_spill] sm:$0xff] }
 0x1f4   :  { %v2719_v36 = vpack.c.bf16 %v2536_v10, %v2533_v13  ;;  %v2634_v50 = vmax.f32 %v2442_v38, 0.0 }
 0x1f5   :  { %v2720_v1 = vpack.c.bf16 %v2537_v3, %v2534_v62  ;;  %v1734_v11 = vpop.f32.mrb[12].mxu0  ;;  %v2209_v29 = vpop.f32.mrb[140].mxu1 }
 0x1f6   :  { %v2347_v12 = vadd.f32 %v5789_v7, %v1734_v11  ;;  %v2210_v15 = vadd.f32 %v6338_v6, %v2209_v29  ;;  %v1736_v20 = vpop.f32.mrb[13].mxu0  ;;  %v2211_v22 = vpop.f32.mrb[141].mxu1  ;;  %v5837_v56 = vpack.c.bf16 %v2634_v50, %v2631_v30  ;;  %v6341_v50 = vld [vmem:[#allocation24_spill] sm:$0xff] }
 0x1f7   :  { %v2348_v31 = vadd.f32 %v5792_v46, %v1736_v20  ;;  %v1738_v60 = vpop.f32.mrb[14].mxu0  ;;  %v2212_v42 = vpop.f32.mrb[142].mxu1  ;;  %3056 = vmatprep.mubr.bf16.mxu1 %v2720_v1 }
 0x1f8   :  { %v2445_v34 = vadd.f32 %v5571_v35, %v2210_v15  ;;  %v2350_v8 = vadd.f32 %v5789_v7, %v1738_v60  ;;  %v2213_v26 = vadd.f32 %v6339_v18, %v2212_v42  ;;  %v1740_v51 = vpop.f32.mrb[15].mxu0  ;;  %3057 = vmatmul.mubr.bf16.gmra.mrb[200].mxu1 %v2719_v36  ;;  %v2214_v0 = vpop.f32.mrb[143].mxu1  ;;  %v2539_v24 = vmax.f32 %v2347_v12, 0.0 }
 0x1f9   :  { %v2351_v23 = vadd.f32 %v5792_v46, %v1740_v51  ;;  %v2540_v45 = vmax.f32 %v2348_v31, 0.0  ;;  %v6342_v0 = vld [vmem:[#allocation21_spill] sm:$0xff] }
 0x1fa   :  { %v2542_v21 = vmax.f32 %v2350_v8, 0.0  ;;  %v2448_v16 = vadd.f32 %v5571_v35, %v2213_v26  ;;  %2003 = vmatmul.mubr.bf16.gmra.mrb[120].mxu0 %v5647_v44  ;;  %v2637_v5 = vmax.f32 %v2445_v34, 0.0 }
 0x1fb   :  { %v2543_v14 = vmax.f32 %v2351_v23, 0.0  ;;  %3890 = vmatprep.mubr.msk.bf16.mxu0 %vm1573_vm3, %v5654_v57 }
 0x1fc   :  { %v2722_v43 = vpack.c.bf16 %v2542_v21, %v2539_v24  ;;  %v2640_v49 = vmax.f32 %v2448_v16, 0.0 }
 0x1fd   :  { %v2723_v59 = vpack.c.bf16 %v2543_v14, %v2540_v45  ;;  %v1744_v17 = vpop.f32.mrb[16].mxu0  ;;  %v2217_v33 = vpop.f32.mrb[144].mxu1 }
 0x1fe   :  { %v2353_v27 = vadd.f32 %v5789_v7, %v1744_v17  ;;  %v2218_v13 = vadd.f32 %v2217_v33, %v6340_v25  ;;  %v1746_v10 = vpop.f32.mrb[17].mxu0  ;;  %v2219_v38 = vpop.f32.mrb[145].mxu1  ;;  %v5850_v62 = vpack.c.bf16 %v2640_v49, %v2637_v5 }
 0x1ff   :  { %v2354_v44 = vadd.f32 %v5792_v46, %v1746_v10  ;;  %v1748_v3 = vpop.f32.mrb[18].mxu0  ;;  %v2220_v30 = vpop.f32.mrb[146].mxu1  ;;  %3064 = vmatprep.mubr.bf16.mxu1 %v2723_v59 }
 0x200   :  { %v2451_v57 = vadd.f32 %v5571_v35, %v2218_v13  ;;  %v2356_v36 = vadd.f32 %v5789_v7, %v1748_v3  ;;  %v2221_v1 = vadd.f32 %v2220_v30, %v6341_v50  ;;  %v1750_v11 = vpop.f32.mrb[19].mxu0  ;;  %3065 = vmatmul.mubr.bf16.gmra.mrb[204].mxu1 %v2722_v43  ;;  %v2222_v29 = vpop.f32.mrb[147].mxu1  ;;  %v2545_v6 = vmax.f32 %v2353_v27, 0.0  ;;  %v6343_v43 = vld [vmem:[#allocation23_spill] sm:$0xff] }
 0x201   :  { %v2357_v12 = vadd.f32 %v5792_v46, %v1750_v11  ;;  %v2546_v22 = vmax.f32 %v2354_v44, 0.0  ;;  %v6344_v11 = vld [vmem:[#allocation26_spill] sm:$0xff] }
 0x202   :  { %v2548_v15 = vmax.f32 %v2356_v36, 0.0  ;;  %v2454_v20 = vadd.f32 %v5571_v35, %v2221_v1  ;;  %2013 = vmatmul.mubr.bf16.gmra.mrb[124].mxu0 %v5672_v61  ;;  %v2643_v60 = vmax.f32 %v2451_v57, 0.0 }
 0x203   :  { %v2549_v31 = vmax.f32 %v2357_v12, 0.0  ;;  %4106 = vmatprep.mubr.bf16.mxu0 %v5602_v41 }
 0x204   :  { %v2725_v42 = vpack.c.bf16 %v2548_v15, %v2545_v6  ;;  %v2646_v34 = vmax.f32 %v2454_v20, 0.0 }
 0x205   :  { %v2726_v8 = vpack.c.bf16 %v2549_v31, %v2546_v22  ;;  %v1754_v18 = vpop.f32.mrb[20].mxu0  ;;  %v2225_v26 = vpop.f32.mrb[148].mxu1 }
 0x206   :  { %v2359_v51 = vadd.f32 %v5789_v7, %v1754_v18  ;;  %v2226_v23 = vadd.f32 %v6342_v0, %v2225_v26  ;;  %v1756_v24 = vpop.f32.mrb[21].mxu0  ;;  %v2227_v21 = vpop.f32.mrb[149].mxu1  ;;  %v5862_v16 = vpack.c.bf16 %v2646_v34, %v2643_v60  ;;  %v6345_v60 = vld [vmem:[#allocation28_spill] sm:$0xff] }
 0x207   :  { %v2360_v61 = vadd.f32 %v5792_v46, %v1756_v24  ;;  %v1758_v45 = vpop.f32.mrb[22].mxu0  ;;  %v2228_v14 = vpop.f32.mrb[150].mxu1  ;;  %3072 = vmatprep.mubr.bf16.mxu1 %v2726_v8 }
 0x208   :  { %v2457_v41 = vadd.f32 %v5571_v35, %v2226_v23  ;;  %v2362_v5 = vadd.f32 %v5789_v7, %v1758_v45  ;;  %v2229_v49 = vadd.f32 %v6343_v43, %v2228_v14  ;;  %v1760_v59 = vpop.f32.mrb[23].mxu0  ;;  %3073 = vmatmul.mubr.bf16.gmra.mrb[208].mxu1 %v2725_v42  ;;  %v2230_v17 = vpop.f32.mrb[151].mxu1  ;;  %v2551_v27 = vmax.f32 %v2359_v51, 0.0 }
 0x209   :  { %v2363_v33 = vadd.f32 %v5792_v46, %v1760_v59  ;;  %v2552_v10 = vmax.f32 %v2360_v61, 0.0 }
 0x20a   :  { %v2554_v25 = vmax.f32 %v2362_v5, 0.0  ;;  %v2460_v13 = vadd.f32 %v5571_v35, %v2229_v49  ;;  %4107 = vmatmul.mubr.bf16.vlgmr.msra.gmra.mrb[128].mxu0 %v5621_v32  ;;  %v2649_v44 = vmax.f32 %v2457_v41, 0.0  ;;  %v6346_v49 = vld [vmem:[#allocation25_spill] sm:$0xff] }
 0x20b   :  { %v2555_v38 = vmax.f32 %v2363_v33, 0.0  ;;  %4110 = vmatprep.mubr.bf16.mxu0 %v5649_v53 }
 0x20c   :  { %v2728_v3 = vpack.c.bf16 %v2554_v25, %v2551_v27  ;;  %v2652_v30 = vmax.f32 %v2460_v13, 0.0 }
 0x20d   :  { %v2729_v57 = vpack.c.bf16 %v2555_v38, %v2552_v10  ;;  %v1764_v36 = vpop.f32.mrb[24].mxu0  ;;  %v2233_v50 = vpop.f32.mrb[152].mxu1  ;;  %v6347_v38 = vld [vmem:[#allocation27_spill] sm:$0xff] }
 0x20e   :  { %v2365_v1 = vadd.f32 %v5789_v7, %v1764_v36  ;;  %v2234_v29 = vadd.f32 %v2233_v50, %v6344_v11  ;;  %v1766_v12 = vpop.f32.mrb[25].mxu0  ;;  %v2235_v6 = vpop.f32.mrb[153].mxu1  ;;  %v5874_v15 = vpack.c.bf16 %v2652_v30, %v2649_v44 }
 0x20f   :  { %v2366_v32 = vadd.f32 %v5792_v46, %v1766_v12  ;;  %v1768_v20 = vpop.f32.mrb[26].mxu0  ;;  %v2236_v22 = vpop.f32.mrb[154].mxu1  ;;  %3080 = vmatprep.mubr.bf16.mxu1 %v2729_v57 }
 0x210   :  { %v2463_v53 = vadd.f32 %v5571_v35, %v2234_v29  ;;  %v2368_v31 = vadd.f32 %v5789_v7, %v1768_v20  ;;  %v2237_v42 = vadd.f32 %v2236_v22, %v6345_v60  ;;  %v1770_v34 = vpop.f32.mrb[27].mxu0  ;;  %3081 = vmatmul.mubr.bf16.gmra.mrb[212].mxu1 %v2728_v3  ;;  %v2238_v8 = vpop.f32.mrb[155].mxu1  ;;  %v2557_v26 = vmax.f32 %v2365_v1, 0.0  ;;  %v6348_v60 = vld [vmem:[#allocation30_spill] sm:$0xff] }
 0x211   :  { %v2369_v18 = vadd.f32 %v5792_v46, %v1770_v34  ;;  %v2558_v23 = vmax.f32 %v2366_v32, 0.0 }
 0x212   :  { %v2560_v51 = vmax.f32 %v2368_v31, 0.0  ;;  %v2466_v0 = vadd.f32 %v5571_v35, %v2237_v42  ;;  %4111 = vmatmul.mubr.bf16.gmra.mrb[132].mxu0 %v5674_v63  ;;  %v2655_v21 = vmax.f32 %v2463_v53, 0.0 }
 0x213   :  { %v2561_v24 = vmax.f32 %v2369_v18, 0.0  ;;  %4114 = vmatprep.mubr.bf16.mxu0 %v5690_v48 }
 0x214   :  { %v2731_v61 = vpack.c.bf16 %v2560_v51, %v2557_v26  ;;  %v2658_v45 = vmax.f32 %v2466_v0, 0.0 }
 0x215   :  { %v2732_v14 = vpack.c.bf16 %v2561_v24, %v2558_v23  ;;  %v1774_v41 = vpop.f32.mrb[28].mxu0  ;;  %v2241_v5 = vpop.f32.mrb[156].mxu1  ;;  %v6349_v23 = vld [vmem:[#allocation32_spill] sm:$0xff] }
 0x216   :  { %v2371_v43 = vadd.f32 %v5789_v7, %v1774_v41  ;;  %v2242_v59 = vadd.f32 %v6346_v49, %v2241_v5  ;;  %v1776_v17 = vpop.f32.mrb[29].mxu0  ;;  %v2243_v33 = vpop.f32.mrb[157].mxu1  ;;  %v5886_v27 = vpack.c.bf16 %v2658_v45, %v2655_v21 }
 0x217   :  { %v2372_v63 = vadd.f32 %v5792_v46, %v1776_v17  ;;  %v1778_v25 = vpop.f32.mrb[30].mxu0  ;;  %v2244_v13 = vpop.f32.mrb[158].mxu1  ;;  %3088 = vmatprep.mubr.bf16.mxu1 %v2732_v14 }
 0x218   :  { %v2469_v48 = vadd.f32 %v5571_v35, %v2242_v59  ;;  %v2374_v10 = vadd.f32 %v5789_v7, %v1778_v25  ;;  %v2245_v44 = vadd.f32 %v6347_v38, %v2244_v13  ;;  %v1780_v3 = vpop.f32.mrb[31].mxu0  ;;  %3089 = vmatmul.mubr.bf16.gmra.mrb[216].mxu1 %v2731_v61  ;;  %v2246_v30 = vpop.f32.mrb[159].mxu1  ;;  %v2563_v36 = vmax.f32 %v2371_v43, 0.0 }
 0x219   :  { %v2375_v57 = vadd.f32 %v5792_v46, %v1780_v3  ;;  %v2564_v11 = vmax.f32 %v2372_v63, 0.0 }
 0x21a   :  { %v2566_v50 = vmax.f32 %v2374_v10, 0.0  ;;  %v2472_v1 = vadd.f32 %v5571_v35, %v2245_v44  ;;  %4115 = vmatmul.mubr.bf16.gmra.mrb[136].mxu0 %v5699_v54  ;;  %v2661_v12 = vmax.f32 %v2469_v48, 0.0  ;;  %v6350_v10 = vld [vmem:[#allocation29_spill] sm:$0xff] }
 0x21b   :  { %v2567_v29 = vmax.f32 %v2375_v57, 0.0  ;;  %4118 = vmatprep.mubr.bf16.mxu0 %v5708_v39 }
 0x21c   :  { %v2734_v6 = vpack.c.bf16 %v2566_v50, %v2563_v36  ;;  %v2664_v32 = vmax.f32 %v2472_v1, 0.0  ;;  %v6351_v1 = vld [vmem:[#allocation31_spill] sm:$0xff] }
 0x21d   :  { %v2735_v20 = vpack.c.bf16 %v2567_v29, %v2564_v11  ;;  %v1784_v22 = vpop.f32.mrb[32].mxu0  ;;  %v2249_v53 = vpop.f32.mrb[160].mxu1 }
 0x21e   :  { %v2377_v31 = vadd.f32 %v5789_v7, %v1784_v22  ;;  %v2250_v42 = vadd.f32 %v2249_v53, %v6348_v60  ;;  %v1786_v34 = vpop.f32.mrb[33].mxu0  ;;  %v2251_v8 = vpop.f32.mrb[161].mxu1  ;;  %v5898_v18 = vpack.c.bf16 %v2664_v32, %v2661_v12 }
 0x21f   :  { %v2378_v54 = vadd.f32 %v5792_v46, %v1786_v34  ;;  %v1788_v26 = vpop.f32.mrb[34].mxu0  ;;  %v2252_v51 = vpop.f32.mrb[162].mxu1  ;;  %3096 = vmatprep.mubr.bf16.mxu1 %v2735_v20 }
 0x220   :  { %v2475_v39 = vadd.f32 %v5571_v35, %v2250_v42  ;;  %v2380_v0 = vadd.f32 %v5789_v7, %v1788_v26  ;;  %v2253_v24 = vadd.f32 %v2252_v51, %v6349_v23  ;;  %v1790_v21 = vpop.f32.mrb[35].mxu0  ;;  %3097 = vmatmul.mubr.bf16.gmra.mrb[220].mxu1 %v2734_v6  ;;  %v2254_v61 = vpop.f32.mrb[163].mxu1  ;;  %v2569_v14 = vmax.f32 %v2377_v31, 0.0 }
 0x221   :  { %v2381_v45 = vadd.f32 %v5792_v46, %v1790_v21  ;;  %v2570_v43 = vmax.f32 %v2378_v54, 0.0 }
 0x222   :  { %v2572_v41 = vmax.f32 %v2380_v0, 0.0  ;;  %v2478_v5 = vadd.f32 %v5571_v35, %v2253_v24  ;;  %4119 = vmatmul.mubr.bf16.gmra.mrb[140].mxu0 %v5717_v52  ;;  %v2667_v59 = vmax.f32 %v2475_v39, 0.0  ;;  %v6352_v39 = vld [vmem:[#allocation34_spill] sm:$0xff] }
 0x223   :  { %v2573_v49 = vmax.f32 %v2381_v45, 0.0  ;;  %4122 = vmatprep.mubr.bf16.mxu0 %v5726_v55 }
 0x224   :  { %v2737_v17 = vpack.c.bf16 %v2572_v41, %v2569_v14  ;;  %v2670_v33 = vmax.f32 %v2478_v5, 0.0  ;;  %v6353_v41 = vld [vmem:[#allocation37_spill] sm:$0xff] }
 0x225   :  { %v2738_v63 = vpack.c.bf16 %v2573_v49, %v2570_v43  ;;  %v1794_v25 = vpop.f32.mrb[36].mxu0  ;;  %v2257_v13 = vpop.f32.mrb[164].mxu1 }
 0x226   :  { %v2383_v48 = vadd.f32 %v5789_v7, %v1794_v25  ;;  %v2258_v38 = vadd.f32 %v6350_v10, %v2257_v13  ;;  %v1796_v44 = vpop.f32.mrb[37].mxu0  ;;  %v2259_v3 = vpop.f32.mrb[165].mxu1  ;;  %v5910_v30 = vpack.c.bf16 %v2670_v33, %v2667_v59 }
 0x227   :  { %v2384_v52 = vadd.f32 %v5792_v46, %v1796_v44  ;;  %v1798_v57 = vpop.f32.mrb[38].mxu0  ;;  %v2260_v36 = vpop.f32.mrb[166].mxu1  ;;  %3104 = vmatprep.mubr.bf16.mxu1 %v2738_v63 }
 0x228   :  { %v2481_v55 = vadd.f32 %v5571_v35, %v2258_v38  ;;  %v2386_v50 = vadd.f32 %v5789_v7, %v1798_v57  ;;  %v2261_v11 = vadd.f32 %v6351_v1, %v2260_v36  ;;  %v1800_v29 = vpop.f32.mrb[39].mxu0  ;;  %3105 = vmatmul.mubr.bf16.gmra.mrb[224].mxu1 %v2737_v17  ;;  %v2262_v12 = vpop.f32.mrb[167].mxu1  ;;  %v2575_v32 = vmax.f32 %v2383_v48, 0.0  ;;  %v6354_v36 = vld [vmem:[#allocation33_spill] sm:$0xff] }
 0x229   :  { %v2387_v6 = vadd.f32 %v5792_v46, %v1800_v29  ;;  %v2576_v53 = vmax.f32 %v2384_v52, 0.0 }
 0x22a   :  { %v2578_v20 = vmax.f32 %v2386_v50, 0.0  ;;  %v2484_v22 = vadd.f32 %v5571_v35, %v2261_v11  ;;  %4123 = vmatmul.mubr.bf16.gmra.mrb[144].mxu0 %v5735_v4  ;;  %v2673_v60 = vmax.f32 %v2481_v55, 0.0 }
 0x22b   :  { %v2579_v31 = vmax.f32 %v2387_v6, 0.0  ;;  %4126 = vmatprep.mubr.bf16.mxu0 %v5744_v28 }
 0x22c   :  { %v2740_v42 = vpack.c.bf16 %v2578_v20, %v2575_v32  ;;  %v2676_v34 = vmax.f32 %v2484_v22, 0.0  ;;  %v6355_v32 = vld [vmem:[#allocation36_spill] sm:$0xff] }
 0x22d   :  { %v2741_v8 = vpack.c.bf16 %v2579_v31, %v2576_v53  ;;  %v1804_v54 = vpop.f32.mrb[40].mxu0  ;;  %v2265_v26 = vpop.f32.mrb[168].mxu1 }
 0x22e   :  { %v2389_v51 = vadd.f32 %v5789_v7, %v1804_v54  ;;  %v2266_v0 = vadd.f32 %v2265_v26, %v6352_v39  ;;  %v1806_v23 = vpop.f32.mrb[41].mxu0  ;;  %v2267_v24 = vpop.f32.mrb[169].mxu1  ;;  %v5922_v21 = vpack.c.bf16 %v2676_v34, %v2673_v60 }
 0x22f   :  { %v2390_v4 = vadd.f32 %v5792_v46, %v1806_v23  ;;  %v1808_v61 = vpop.f32.mrb[42].mxu0  ;;  %v2268_v45 = vpop.f32.mrb[170].mxu1  ;;  %3112 = vmatprep.mubr.bf16.mxu1 %v2741_v8 }
 0x230   :  { %v2487_v28 = vadd.f32 %v5571_v35, %v2266_v0  ;;  %v2392_v14 = vadd.f32 %v5789_v7, %v1808_v61  ;;  %v2269_v5 = vadd.f32 %v2268_v45, %v6353_v41  ;;  %v1810_v43 = vpop.f32.mrb[43].mxu0  ;;  %3113 = vmatmul.mubr.bf16.gmra.mrb[228].mxu1 %v2740_v42  ;;  %v2270_v49 = vpop.f32.mrb[171].mxu1  ;;  %v2581_v17 = vmax.f32 %v2389_v51, 0.0  ;;  %v6356_v61 = vld [vmem:[#allocation39_spill] sm:$0xff] }
 0x231   :  { %v2393_v59 = vadd.f32 %v5792_v46, %v1810_v43  ;;  %v2582_v25 = vmax.f32 %v2390_v4, 0.0 }
 0x232   :  { %v2584_v33 = vmax.f32 %v2392_v14, 0.0  ;;  %v2490_v63 = vadd.f32 %v5571_v35, %v2269_v5  ;;  %4127 = vmatmul.mubr.bf16.gmra.mrb[148].mxu0 %v5753_v2  ;;  %v2679_v48 = vmax.f32 %v2487_v28, 0.0 }
 0x233   :  { %v2585_v13 = vmax.f32 %v2393_v59, 0.0  ;;  %4130 = vmatprep.mubr.bf16.mxu0 %v5762_v37  ;;  %v6357_v59 = vld [vmem:[#allocation42_spill] sm:$0xff] }
 0x234   :  { %v2743_v10 = vpack.c.bf16 %v2584_v33, %v2581_v17  ;;  %v2682_v38 = vmax.f32 %v2490_v63, 0.0 }
 0x235   :  { %v2744_v44 = vpack.c.bf16 %v2585_v13, %v2582_v25  ;;  %v1814_v3 = vpop.f32.mrb[44].mxu0  ;;  %v2273_v52 = vpop.f32.mrb[172].mxu1 }
 0x236   :  { %v2395_v57 = vadd.f32 %v5789_v7, %v1814_v3  ;;  %v2274_v55 = vadd.f32 %v6354_v36, %v2273_v52  ;;  %v1816_v50 = vpop.f32.mrb[45].mxu0  ;;  %v2275_v1 = vpop.f32.mrb[173].mxu1  ;;  %v5934_v11 = vpack.c.bf16 %v2682_v38, %v2679_v48 }
 0x237   :  { %v2396_v2 = vadd.f32 %v5792_v46, %v1816_v50  ;;  %v1818_v29 = vpop.f32.mrb[46].mxu0  ;;  %v2276_v12 = vpop.f32.mrb[174].mxu1  ;;  %3120 = vmatprep.mubr.bf16.mxu1 %v2744_v44 }
 0x238   :  { %v2493_v37 = vadd.f32 %v5571_v35, %v2274_v55  ;;  %v2398_v6 = vadd.f32 %v5789_v7, %v1818_v29  ;;  %v2277_v20 = vadd.f32 %v6355_v32, %v2276_v12  ;;  %v1820_v22 = vpop.f32.mrb[47].mxu0  ;;  %3121 = vmatmul.mubr.bf16.gmra.mrb[232].mxu1 %v2743_v10  ;;  %v2278_v53 = vpop.f32.mrb[175].mxu1  ;;  %v2587_v60 = vmax.f32 %v2395_v57, 0.0 }
 0x239   :  { %v2399_v31 = vadd.f32 %v5792_v46, %v1820_v22  ;;  %v2588_v8 = vmax.f32 %v2396_v2, 0.0  ;;  %v6358_v2 = vld [vmem:[#allocation38_spill] sm:$0xff]  ;;  %v6359_v53 = vld [vmem:[#allocation40_spill] sm:$0xff] }
 0x23a   :  { %v2590_v42 = vmax.f32 %v2398_v6, 0.0  ;;  %v2496_v34 = vadd.f32 %v5571_v35, %v2277_v20  ;;  %4131 = vmatmul.mubr.bf16.gmra.mrb[152].mxu0 %v5771_v9  ;;  %v2685_v26 = vmax.f32 %v2493_v37, 0.0 }
 0x23b   :  { %v2591_v54 = vmax.f32 %v2399_v31, 0.0  ;;  %4134 = vmatprep.mubr.bf16.mxu0 %v5781_v58 }
 0x23c   :  { %v2746_v51 = vpack.c.bf16 %v2590_v42, %v2587_v60  ;;  %v2688_v39 = vmax.f32 %v2496_v34, 0.0 }
 0x23d   :  { %v2747_v0 = vpack.c.bf16 %v2591_v54, %v2588_v8  ;;  %v1824_v23 = vpop.f32.mrb[48].mxu0  ;;  %v2281_v24 = vpop.f32.mrb[176].mxu1 }
 0x23e   :  { %v2401_v4 = vadd.f32 %v5789_v7, %v1824_v23  ;;  %v2282_v45 = vadd.f32 %v2281_v24, %v6356_v61  ;;  %v1826_v28 = vpop.f32.mrb[49].mxu0  ;;  %v2283_v14 = vpop.f32.mrb[177].mxu1  ;;  %v5946_v41 = vpack.c.bf16 %v2688_v39, %v2685_v26 }
 0x23f   :  { %v2402_v9 = vadd.f32 %v5792_v46, %v1826_v28  ;;  %v1828_v5 = vpop.f32.mrb[50].mxu0  ;;  %v2284_v43 = vpop.f32.mrb[178].mxu1  ;;  %3128 = vmatprep.mubr.bf16.mxu1 %v2747_v0  ;;  %v6360_v14 = vld [vmem:[#allocation45_spill] sm:$0xff] }
 0x240   :  { %v2499_v58 = vadd.f32 %v5571_v35, %v2282_v45  ;;  %v2404_v49 = vadd.f32 %v5789_v7, %v1828_v5  ;;  %v2285_v17 = vadd.f32 %v2284_v43, %v6357_v59  ;;  %v1830_v33 = vpop.f32.mrb[51].mxu0  ;;  %3129 = vmatmul.mubr.bf16.gmra.mrb[236].mxu1 %v2746_v51  ;;  %v2286_v63 = vpop.f32.mrb[179].mxu1  ;;  %v2593_v13 = vmax.f32 %v2401_v4, 0.0 }
 0x241   :  { %v2405_v25 = vadd.f32 %v5792_v46, %v1830_v33  ;;  %v2594_v38 = vmax.f32 %v2402_v9, 0.0  ;;  %v6361_v33 = vld [vmem:[#allocation49_spill] sm:$0xff] }
 0x242   :  { %v2596_v48 = vmax.f32 %v2404_v49, 0.0  ;;  %v2502_v10 = vadd.f32 %v5571_v35, %v2285_v17  ;;  %4135 = vmatmul.mubr.bf16.gmra.mrb[156].mxu0 %v5798_v40  ;;  %v2691_v3 = vmax.f32 %v2499_v58, 0.0 }
 0x243   :  { %v2597_v44 = vmax.f32 %v2405_v25, 0.0  ;;  %4138 = vmatprep.mubr.bf16.mxu0 %v5811_v19 }
 0x244   :  { %v2749_v52 = vpack.c.bf16 %v2596_v48, %v2593_v13  ;;  %v2694_v57 = vmax.f32 %v2502_v10, 0.0 }
 0x245   :  { %v2750_v36 = vpack.c.bf16 %v2597_v44, %v2594_v38  ;;  %v1834_v55 = vpop.f32.mrb[52].mxu0  ;;  %v2289_v50 = vpop.f32.mrb[180].mxu1 }
 0x246   :  { %v2407_v1 = vadd.f32 %v5789_v7, %v1834_v55  ;;  %v2290_v29 = vadd.f32 %v6358_v2, %v2289_v50  ;;  %v1836_v12 = vpop.f32.mrb[53].mxu0  ;;  %v2291_v37 = vpop.f32.mrb[181].mxu1  ;;  %v5958_v6 = vpack.c.bf16 %v2694_v57, %v2691_v3 }
 0x247   :  { %v2408_v40 = vadd.f32 %v5792_v46, %v1836_v12  ;;  %v1838_v32 = vpop.f32.mrb[54].mxu0  ;;  %v2292_v20 = vpop.f32.mrb[182].mxu1  ;;  %3136 = vmatprep.mubr.bf16.mxu1 %v2750_v36  ;;  %v6362_v12 = vld [vmem:[#allocation44_spill] sm:$0xff] }
 0x248   :  { %v2505_v19 = vadd.f32 %v5571_v35, %v2290_v29  ;;  %v2410_v22 = vadd.f32 %v5789_v7, %v1838_v32  ;;  %v2293_v31 = vadd.f32 %v6359_v53, %v2292_v20  ;;  %v1840_v60 = vpop.f32.mrb[55].mxu0  ;;  %3137 = vmatmul.mubr.bf16.gmra.mrb[240].mxu1 %v2749_v52  ;;  %v2294_v42 = vpop.f32.mrb[183].mxu1  ;;  %v2599_v8 = vmax.f32 %v2407_v1, 0.0 }
 0x249   :  { %v2411_v34 = vadd.f32 %v5792_v46, %v1840_v60  ;;  %v2600_v51 = vmax.f32 %v2408_v40, 0.0 }
 0x24a   :  { %v2602_v54 = vmax.f32 %v2410_v22, 0.0  ;;  %v2508_v26 = vadd.f32 %v5571_v35, %v2293_v31  ;;  %4139 = vmatmul.mubr.bf16.gmra.mrb[160].mxu0 %v5824_v47  ;;  %v2697_v0 = vmax.f32 %v2505_v19, 0.0  ;;  %v6363_v31 = vld [vmem:[#allocation47_spill] sm:$0xff] }
 0x24b   :  { %v2603_v39 = vmax.f32 %v2411_v34, 0.0  ;;  %4142 = vmatprep.mubr.bf16.mxu0 %v5837_v56 }
 0x24c   :  { %v2752_v23 = vpack.c.bf16 %v2602_v54, %v2599_v8  ;;  %v2700_v24 = vmax.f32 %v2508_v26, 0.0 }
 0x24d   :  { %v2753_v4 = vpack.c.bf16 %v2603_v39, %v2600_v51  ;;  %v1844_v61 = vpop.f32.mrb[56].mxu0  ;;  %v2297_v45 = vpop.f32.mrb[184].mxu1 }
 0x24e   :  { %v2413_v28 = vadd.f32 %v5789_v7, %v1844_v61  ;;  %v2298_v9 = vadd.f32 %v2297_v45, %v6360_v14  ;;  %v1846_v5 = vpop.f32.mrb[57].mxu0  ;;  %v2299_v43 = vpop.f32.mrb[185].mxu1  ;;  %v5970_v58 = vpack.c.bf16 %v2700_v24, %v2697_v0 }
 0x24f   :  { %v2414_v47 = vadd.f32 %v5792_v46, %v1846_v5  ;;  %v1848_v49 = vpop.f32.mrb[58].mxu0  ;;  %v2300_v59 = vpop.f32.mrb[186].mxu1  ;;  %3144 = vmatprep.mubr.bf16.mxu1 %v2753_v4 }
 0x250   :  { %v2511_v56 = vadd.f32 %v5571_v35, %v2298_v9  ;;  %v2416_v17 = vadd.f32 %v5789_v7, %v1848_v49  ;;  %v2301_v63 = vadd.f32 %v2300_v59, %v6361_v33  ;;  %v1850_v25 = vpop.f32.mrb[59].mxu0  ;;  %3145 = vmatmul.mubr.bf16.gmra.mrb[244].mxu1 %v2752_v23  ;;  %v2302_v13 = vpop.f32.mrb[187].mxu1  ;;  %v2605_v10 = vmax.f32 %v2413_v28, 0.0 }
 0x251   :  { %v2417_v48 = vadd.f32 %v5792_v46, %v1850_v25  ;;  %v2606_v3 = vmax.f32 %v2414_v47, 0.0 }
 0x252   :  { %v2608_v38 = vmax.f32 %v2416_v17, 0.0  ;;  %v2514_v44 = vadd.f32 %v5571_v35, %v2301_v63  ;;  %4143 = vmatmul.mubr.bf16.gmra.mrb[164].mxu0 %v5850_v62  ;;  %v2703_v57 = vmax.f32 %v2511_v56, 0.0 }
 0x253   :  { %v2609_v52 = vmax.f32 %v2417_v48, 0.0  ;;  %4146 = vmatprep.mubr.bf16.mxu0 %v5862_v16 }
 0x254   :  { %v2755_v36 = vpack.c.bf16 %v2608_v38, %v2605_v10  ;;  %v2706_v55 = vmax.f32 %v2514_v44, 0.0 }
 0x255   :  { %v2756_v50 = vpack.c.bf16 %v2609_v52, %v2606_v3  ;;  %v1854_v1 = vpop.f32.mrb[60].mxu0  ;;  %v2305_v2 = vpop.f32.mrb[188].mxu1 }
 0x256   :  { %v2419_v29 = vadd.f32 %v5789_v7, %v1854_v1  ;;  %v2306_v37 = vadd.f32 %v6362_v12, %v2305_v2  ;;  %v1856_v40 = vpop.f32.mrb[61].mxu0  ;;  %v2307_v32 = vpop.f32.mrb[189].mxu1  ;;  %v5982_v20 = vpack.c.bf16 %v2706_v55, %v2703_v57 }
 0x257   :  { %v2420_v62 = vadd.f32 %v5792_v46, %v1856_v40  ;;  %v1858_v19 = vpop.f32.mrb[62].mxu0  ;;  %v2308_v22 = vpop.f32.mrb[190].mxu1  ;;  %3152 = vmatprep.mubr.bf16.mxu1 %v2756_v50 }
 0x258   :  { %v2517_v16 = vadd.f32 %v5571_v35, %v2306_v37  ;;  %v2422_v53 = vadd.f32 %v5789_v7, %v1858_v19  ;;  %v2309_v60 = vadd.f32 %v6363_v31, %v2308_v22  ;;  %v1860_v42 = vpop.f32.mrb[63].mxu0  ;;  %3153 = vmatmul.mubr.bf16.gmra.mrb[248].mxu1 %v2755_v36  ;;  %v2310_v34 = vpop.f32.mrb[191].mxu1  ;;  %v2611_v54 = vmax.f32 %v2419_v29, 0.0 }
 0x259   :  { %v2423_v8 = vadd.f32 %v5792_v46, %v1860_v42  ;;  %v2612_v39 = vmax.f32 %v2420_v62, 0.0 }
 0x25a   :  { %v2614_v26 = vmax.f32 %v2422_v53, 0.0  ;;  %v2520_v51 = vadd.f32 %v5571_v35, %v2309_v60  ;;  %4147 = vmatmul.mubr.bf16.gmra.mrb[168].mxu0 %v5874_v15  ;;  %v2709_v23 = vmax.f32 %v2517_v16, 0.0 }
 0x25b   :  { %v2615_v0 = vmax.f32 %v2423_v8, 0.0  ;;  %4150 = vmatprep.mubr.bf16.mxu0 %v5886_v27 }
 0x25c   :  { %v2758_v24 = vpack.c.bf16 %v2614_v26, %v2611_v54  ;;  %v2712_v4 = vmax.f32 %v2520_v51, 0.0 }
 0x25d   :  { %v2759_v61 = vpack.c.bf16 %v2615_v0, %v2612_v39  ;;  %v1864_v45 = vpop.f32.mrb[64].mxu0 }
 0x25e   :  { %v2425_v28 = vadd.f32 %v5789_v7, %v1864_v45  ;;  %v1866_v14 = vpop.f32.mrb[65].mxu0  ;;  %v5993_v9 = vpack.c.bf16 %v2712_v4, %v2709_v23 }
 0x25f   :  { %v2426_v5 = vadd.f32 %v5792_v46, %v1866_v14  ;;  %v1868_v43 = vpop.f32.mrb[66].mxu0  ;;  %3160 = vmatprep.mubr.bf16.mxu1 %v2759_v61 }
 0x260   :  { %v2428_v35 = vadd.f32 %v5789_v7, %v1868_v43  ;;  %v1870_v15 = vpop.f32.mrb[67].mxu0  ;;  %3161 = vmatmul.mubr.bf16.gmra.mrb[252].mxu1 %v2758_v24  ;;  %v2617_v47 = vmax.f32 %v2425_v28, 0.0 }
 0x261   :  { %v2429_v27 = vadd.f32 %v5792_v46, %v1870_v15  ;;  %v2618_v59 = vmax.f32 %v2426_v5, 0.0 }
 0x262   :  { %v2620_v49 = vmax.f32 %v2428_v35, 0.0  ;;  %4151 = vmatmul.mubr.bf16.gmra.mrb[172].mxu0 %v5898_v18 }
 0x263   :  { %v2621_v56 = vmax.f32 %v2429_v27, 0.0  ;;  %4154 = vmatprep.mubr.bf16.mxu0 %v5910_v30 }
 0x264   :  { %v2761_v17 = vpack.c.bf16 %v2620_v49, %v2617_v47 }
 0x265   :  { %v2762_v33 = vpack.c.bf16 %v2621_v56, %v2618_v59  ;;  %v1874_v63 = vpop.f32.mrb[68].mxu0 }
 0x266   :  { %v2431_v25 = vadd.f32 %v5789_v7, %v1874_v63  ;;  %v1876_v13 = vpop.f32.mrb[69].mxu0 }
 0x267   :  { %v2432_v48 = vadd.f32 %v5792_v46, %v1876_v13  ;;  %v1878_v10 = vpop.f32.mrb[70].mxu0  ;;  %3168 = vmatprep.mubr.bf16.mxu1 %v2762_v33 }
 0x268   :  { %v2434_v38 = vadd.f32 %v5789_v7, %v1878_v10  ;;  %v1880_v44 = vpop.f32.mrb[71].mxu0  ;;  %3169 = vmatmul.mubr.bf16.gmra.mrb[0].mxu1 %v2761_v17  ;;  %v2623_v3 = vmax.f32 %v2431_v25, 0.0 }
 0x269   :  { %v2435_v18 = vadd.f32 %v5792_v46, %v1880_v44  ;;  %v2624_v30 = vmax.f32 %v2432_v48, 0.0 }
 0x26a   :  { %v2626_v52 = vmax.f32 %v2434_v38, 0.0  ;;  %4155 = vmatmul.mubr.bf16.gmra.mrb[176].mxu0 %v5922_v21 }
 0x26b   :  { %v2627_v57 = vmax.f32 %v2435_v18, 0.0  ;;  %4158 = vmatprep.mubr.bf16.mxu0 %v5934_v11 }
 0x26c   :  { %v2764_v36 = vpack.c.bf16 %v2626_v52, %v2623_v3 }
 0x26d   :  { %v2765_v55 = vpack.c.bf16 %v2627_v57, %v2624_v30  ;;  %v1884_v50 = vpop.f32.mrb[72].mxu0 }
 0x26e   :  { %v2437_v1 = vadd.f32 %v5789_v7, %v1884_v50  ;;  %v1886_v2 = vpop.f32.mrb[73].mxu0 }
 0x26f   :  { %v2438_v29 = vadd.f32 %v5792_v46, %v1886_v2  ;;  %v1888_v12 = vpop.f32.mrb[74].mxu0  ;;  %3176 = vmatprep.mubr.bf16.mxu1 %v2765_v55 }
 0x270   :  { %v2440_v37 = vadd.f32 %v5789_v7, %v1888_v12  ;;  %v1890_v40 = vpop.f32.mrb[75].mxu0  ;;  %3177 = vmatmul.mubr.bf16.gmra.mrb[4].mxu1 %v2764_v36  ;;  %v2629_v32 = vmax.f32 %v2437_v1, 0.0 }
 0x271   :  { %v2441_v21 = vadd.f32 %v5792_v46, %v1890_v40  ;;  %v2630_v11 = vmax.f32 %v2438_v29, 0.0 }
 0x272   :  { %v2632_v62 = vmax.f32 %v2440_v37, 0.0  ;;  %4159 = vmatmul.mubr.bf16.gmra.mrb[180].mxu0 %v5946_v41 }
 0x273   :  { %v2633_v19 = vmax.f32 %v2441_v21, 0.0  ;;  %4162 = vmatprep.mubr.bf16.mxu0 %v5958_v6 }
 0x274   :  { %v2767_v22 = vpack.c.bf16 %v2632_v62, %v2629_v32 }
 0x275   :  { %v2768_v16 = vpack.c.bf16 %v2633_v19, %v2630_v11  ;;  %v1894_v53 = vpop.f32.mrb[76].mxu0 }
 0x276   :  { %v2443_v31 = vadd.f32 %v5789_v7, %v1894_v53  ;;  %v1896_v60 = vpop.f32.mrb[77].mxu0 }
 0x277   :  { %v2444_v42 = vadd.f32 %v5792_v46, %v1896_v60  ;;  %v1898_v34 = vpop.f32.mrb[78].mxu0  ;;  %3184 = vmatprep.mubr.bf16.mxu1 %v2768_v16 }
 0x278   :  { %v2446_v8 = vadd.f32 %v5789_v7, %v1898_v34  ;;  %v1900_v54 = vpop.f32.mrb[79].mxu0  ;;  %3185 = vmatmul.mubr.bf16.gmra.mrb[8].mxu1 %v2767_v22  ;;  %v2635_v26 = vmax.f32 %v2443_v31, 0.0 }
 0x279   :  { %v2447_v41 = vadd.f32 %v5792_v46, %v1900_v54  ;;  %v2636_v6 = vmax.f32 %v2444_v42, 0.0 }
 0x27a   :  { %v2638_v51 = vmax.f32 %v2446_v8, 0.0  ;;  %4163 = vmatmul.mubr.bf16.gmra.mrb[184].mxu0 %v5970_v58 }
 0x27b   :  { %v2639_v39 = vmax.f32 %v2447_v41, 0.0  ;;  %4166 = vmatprep.mubr.bf16.mxu0 %v5982_v20 }
 0x27c   :  { %v2770_v0 = vpack.c.bf16 %v2638_v51, %v2635_v26 }
 0x27d   :  { %v2771_v23 = vpack.c.bf16 %v2639_v39, %v2636_v6  ;;  %v1904_v24 = vpop.f32.mrb[80].mxu0 }
 0x27e   :  { %v2449_v4 = vadd.f32 %v5789_v7, %v1904_v24  ;;  %v1906_v61 = vpop.f32.mrb[81].mxu0 }
 0x27f   :  { %v2450_v45 = vadd.f32 %v5792_v46, %v1906_v61  ;;  %v1908_v28 = vpop.f32.mrb[82].mxu0  ;;  %3192 = vmatprep.mubr.bf16.mxu1 %v2771_v23 }
 0x280   :  { %v2452_v14 = vadd.f32 %v5789_v7, %v1908_v28  ;;  %v1910_v5 = vpop.f32.mrb[83].mxu0  ;;  %3193 = vmatmul.mubr.bf16.gmra.mrb[12].mxu1 %v2770_v0  ;;  %v2641_v43 = vmax.f32 %v2449_v4, 0.0 }
 0x281   :  { %v2453_v58 = vadd.f32 %v5792_v46, %v1910_v5  ;;  %v2642_v20 = vmax.f32 %v2450_v45, 0.0 }
 0x282   :  { %v2644_v35 = vmax.f32 %v2452_v14, 0.0  ;;  %4167 = vmatmul.mubr.bf16.gmra.mrb[188].mxu0 %v5993_v9 }
 0x283   :  { %v2645_v15 = vmax.f32 %v2453_v58, 0.0 }
 0x284   :  { %v2773_v27 = vpack.c.bf16 %v2644_v35, %v2641_v43 }
 0x285   :  { %v2774_v47 = vpack.c.bf16 %v2645_v15, %v2642_v20  ;;  %v1914_v49 = vpop.f32.mrb[84].mxu0 }
 0x286   :  { %v2455_v59 = vadd.f32 %v5789_v7, %v1914_v49  ;;  %v1916_v56 = vpop.f32.mrb[85].mxu0 }
 0x287   :  { %v2456_v17 = vadd.f32 %v5792_v46, %v1916_v56  ;;  %v1918_v33 = vpop.f32.mrb[86].mxu0  ;;  %3200 = vmatprep.mubr.bf16.mxu1 %v2774_v47 }
 0x288   :  { %v2458_v63 = vadd.f32 %v5789_v7, %v1918_v33  ;;  %v1920_v25 = vpop.f32.mrb[87].mxu0  ;;  %3201 = vmatmul.mubr.bf16.gmra.mrb[16].mxu1 %v2773_v27  ;;  %v2647_v48 = vmax.f32 %v2455_v59, 0.0 }
 0x289   :  { %v2459_v13 = vadd.f32 %v5792_v46, %v1920_v25  ;;  %v2648_v10 = vmax.f32 %v2456_v17, 0.0 }
 0x28a   :  { %v2650_v9 = vmax.f32 %v2458_v63, 0.0 }
 0x28b   :  { %v2651_v38 = vmax.f32 %v2459_v13, 0.0 }
 0x28c   :  { %v2776_v44 = vpack.c.bf16 %v2650_v9, %v2647_v48 }
 0x28d   :  { %v2777_v18 = vpack.c.bf16 %v2651_v38, %v2648_v10  ;;  %v1924_v3 = vpop.f32.mrb[88].mxu0 }
 0x28e   :  { %v2461_v52 = vadd.f32 %v5789_v7, %v1924_v3  ;;  %v1926_v30 = vpop.f32.mrb[89].mxu0 }
 0x28f   :  { %v2462_v57 = vadd.f32 %v5792_v46, %v1926_v30  ;;  %v1928_v36 = vpop.f32.mrb[90].mxu0  ;;  %3208 = vmatprep.mubr.bf16.mxu1 %v2777_v18 }
 0x290   :  { %v2464_v55 = vadd.f32 %v5789_v7, %v1928_v36  ;;  %v1930_v50 = vpop.f32.mrb[91].mxu0  ;;  %3209 = vmatmul.mubr.bf16.gmra.mrb[20].mxu1 %v2776_v44  ;;  %v2653_v2 = vmax.f32 %v2461_v52, 0.0 }
 0x291   :  { %v2465_v1 = vadd.f32 %v5792_v46, %v1930_v50  ;;  %v2654_v12 = vmax.f32 %v2462_v57, 0.0 }
 0x292   :  { %v2656_v29 = vmax.f32 %v2464_v55, 0.0 }
 0x293   :  { %v2657_v37 = vmax.f32 %v2465_v1, 0.0 }
 0x294   :  { %v2779_v40 = vpack.c.bf16 %v2656_v29, %v2653_v2 }
 0x295   :  { %v2780_v21 = vpack.c.bf16 %v2657_v37, %v2654_v12  ;;  %v1934_v32 = vpop.f32.mrb[92].mxu0 }
 0x296   :  { %v2467_v62 = vadd.f32 %v5789_v7, %v1934_v32  ;;  %v1936_v11 = vpop.f32.mrb[93].mxu0 }
 0x297   :  { %v2468_v19 = vadd.f32 %v5792_v46, %v1936_v11  ;;  %v1938_v22 = vpop.f32.mrb[94].mxu0  ;;  %3216 = vmatprep.mubr.bf16.mxu1 %v2780_v21 }
 0x298   :  { %v2470_v16 = vadd.f32 %v5789_v7, %v1938_v22  ;;  %v1940_v53 = vpop.f32.mrb[95].mxu0  ;;  %3217 = vmatmul.mubr.bf16.gmra.mrb[24].mxu1 %v2779_v40  ;;  %v2659_v60 = vmax.f32 %v2467_v62, 0.0 }
 0x299   :  { %v2471_v31 = vadd.f32 %v5792_v46, %v1940_v53  ;;  %v2660_v34 = vmax.f32 %v2468_v19, 0.0 }
 0x29a   :  { %v2662_v42 = vmax.f32 %v2470_v16, 0.0 }
 0x29b   :  { %v2663_v8 = vmax.f32 %v2471_v31, 0.0 }
 0x29c   :  { %v2782_v54 = vpack.c.bf16 %v2662_v42, %v2659_v60 }
 0x29d   :  { %v2783_v41 = vpack.c.bf16 %v2663_v8, %v2660_v34  ;;  %v1944_v26 = vpop.f32.mrb[96].mxu0 }
 0x29e   :  { %v2473_v51 = vadd.f32 %v5789_v7, %v1944_v26  ;;  %v1946_v6 = vpop.f32.mrb[97].mxu0 }
 0x29f   :  { %v2474_v39 = vadd.f32 %v5792_v46, %v1946_v6  ;;  %v1948_v0 = vpop.f32.mrb[98].mxu0  ;;  %3224 = vmatprep.mubr.bf16.mxu1 %v2783_v41 }
 0x2a0   :  { %v2476_v23 = vadd.f32 %v5789_v7, %v1948_v0  ;;  %v1950_v24 = vpop.f32.mrb[99].mxu0  ;;  %3225 = vmatmul.mubr.bf16.gmra.mrb[28].mxu1 %v2782_v54  ;;  %v2665_v61 = vmax.f32 %v2473_v51, 0.0 }
 0x2a1   :  { %v2477_v4 = vadd.f32 %v5792_v46, %v1950_v24  ;;  %v2666_v28 = vmax.f32 %v2474_v39, 0.0 }
 0x2a2   :  { %v2668_v45 = vmax.f32 %v2476_v23, 0.0 }
 0x2a3   :  { %v2669_v14 = vmax.f32 %v2477_v4, 0.0 }
 0x2a4   :  { %v2785_v5 = vpack.c.bf16 %v2668_v45, %v2665_v61 }
 0x2a5   :  { %v2786_v58 = vpack.c.bf16 %v2669_v14, %v2666_v28  ;;  %v1954_v43 = vpop.f32.mrb[100].mxu0 }
 0x2a6   :  { %v2479_v35 = vadd.f32 %v5789_v7, %v1954_v43  ;;  %v1956_v20 = vpop.f32.mrb[101].mxu0 }
 0x2a7   :  { %v2480_v15 = vadd.f32 %v5792_v46, %v1956_v20  ;;  %v1958_v27 = vpop.f32.mrb[102].mxu0  ;;  %3232 = vmatprep.mubr.bf16.mxu1 %v2786_v58 }
 0x2a8   :  { %v2482_v47 = vadd.f32 %v5789_v7, %v1958_v27  ;;  %v1960_v49 = vpop.f32.mrb[103].mxu0  ;;  %3233 = vmatmul.mubr.bf16.gmra.mrb[32].mxu1 %v2785_v5  ;;  %v2671_v56 = vmax.f32 %v2479_v35, 0.0 }
 0x2a9   :  { %v2483_v59 = vadd.f32 %v5792_v46, %v1960_v49  ;;  %v2672_v33 = vmax.f32 %v2480_v15, 0.0 }
 0x2aa   :  { %v2674_v17 = vmax.f32 %v2482_v47, 0.0 }
 0x2ab   :  { %v2675_v63 = vmax.f32 %v2483_v59, 0.0 }
 0x2ac   :  { %v2788_v25 = vpack.c.bf16 %v2674_v17, %v2671_v56 }
 0x2ad   :  { %v2789_v13 = vpack.c.bf16 %v2675_v63, %v2672_v33  ;;  %v1964_v48 = vpop.f32.mrb[104].mxu0 }
 0x2ae   :  { %v2485_v9 = vadd.f32 %v5789_v7, %v1964_v48  ;;  %v1966_v10 = vpop.f32.mrb[105].mxu0 }
 0x2af   :  { %v2486_v38 = vadd.f32 %v5792_v46, %v1966_v10  ;;  %v1968_v44 = vpop.f32.mrb[106].mxu0  ;;  %3240 = vmatprep.mubr.bf16.mxu1 %v2789_v13 }
 0x2b0   :  { %v2488_v18 = vadd.f32 %v5789_v7, %v1968_v44  ;;  %v1970_v3 = vpop.f32.mrb[107].mxu0  ;;  %3241 = vmatmul.mubr.bf16.gmra.mrb[36].mxu1 %v2788_v25  ;;  %v2677_v30 = vmax.f32 %v2485_v9, 0.0 }
 0x2b1   :  { %v2489_v52 = vadd.f32 %v5792_v46, %v1970_v3  ;;  %v2678_v36 = vmax.f32 %v2486_v38, 0.0 }
 0x2b2   :  { %v2680_v57 = vmax.f32 %v2488_v18, 0.0 }
 0x2b3   :  { %v2681_v55 = vmax.f32 %v2489_v52, 0.0 }
 0x2b4   :  { %v2791_v50 = vpack.c.bf16 %v2680_v57, %v2677_v30 }
 0x2b5   :  { %v2792_v1 = vpack.c.bf16 %v2681_v55, %v2678_v36  ;;  %v1974_v2 = vpop.f32.mrb[108].mxu0 }
 0x2b6   :  { %v2491_v29 = vadd.f32 %v5789_v7, %v1974_v2  ;;  %v1976_v12 = vpop.f32.mrb[109].mxu0 }
 0x2b7   :  { %v2492_v37 = vadd.f32 %v5792_v46, %v1976_v12  ;;  %v1978_v40 = vpop.f32.mrb[110].mxu0  ;;  %3248 = vmatprep.mubr.bf16.mxu1 %v2792_v1 }
 0x2b8   :  { %v2494_v21 = vadd.f32 %v5789_v7, %v1978_v40  ;;  %v1980_v32 = vpop.f32.mrb[111].mxu0  ;;  %3249 = vmatmul.mubr.bf16.gmra.mrb[40].mxu1 %v2791_v50  ;;  %v2683_v11 = vmax.f32 %v2491_v29, 0.0 }
 0x2b9   :  { %v2495_v62 = vadd.f32 %v5792_v46, %v1980_v32  ;;  %v2684_v22 = vmax.f32 %v2492_v37, 0.0 }
 0x2ba   :  { %v2686_v19 = vmax.f32 %v2494_v21, 0.0 }
 0x2bb   :  { %v2687_v16 = vmax.f32 %v2495_v62, 0.0  ;;  %v6051_v53 = vpop.f32.mrb[192].mxu1 }
 0x2bc   :  { %v2794_v31 = vpack.c.bf16 %v2686_v19, %v2683_v11  ;;  %v3044_v60 = vpop.f32.mrb[193].mxu1 }
 0x2bd   :  { %v2795_v42 = vpack.c.bf16 %v2687_v16, %v2684_v22  ;;  %v1984_v34 = vpop.f32.mrb[112].mxu0  ;;  %v6053_v8 = vpop.f32.mrb[194].mxu1 }
 0x2be   :  { %v2497_v54 = vadd.f32 %v5789_v7, %v1984_v34  ;;  %v1986_v41 = vpop.f32.mrb[113].mxu0  ;;  %v3047_v26 = vpop.f32.mrb[195].mxu1 }
 0x2bf   :  { %v2498_v51 = vadd.f32 %v5792_v46, %v1986_v41  ;;  %v1988_v6 = vpop.f32.mrb[114].mxu0  ;;  %3256 = vmatprep.mubr.bf16.mxu1 %v2795_v42  ;;  %v6080_v26 = vld [vmem:[%s6259_s6] ss:$0 sm:$0xff]  ;;  %s4525_s6 = smov [#allocation2]  }
 0x2c0   :  { %v2500_v39 = vadd.f32 %v5789_v7, %v1988_v6  ;;  %v1990_v0 = vpop.f32.mrb[115].mxu0  ;;  %3257 = vmatmul.mubr.bf16.gmra.mrb[44].mxu1 %v2794_v31  ;;  %v2689_v24 = vmax.f32 %v2497_v54, 0.0  ;;  %s3655_s28 = sshll.u32 %s4525_s6, 4  ;;  %s3656_s28 = int_to_ptr.vmem [resolvable:$true] %s3655_s28 }
 0x2c1   :  { %v2501_v23 = vadd.f32 %v5792_v46, %v1990_v0  ;;  %v2690_v61 = vmax.f32 %v2498_v51, 0.0  ;;  %s4499_s4 = scalar_lea.vmem %s3656_s28, 8192  ;;  %p4504_p1 = scmp.lt.s32.totalorder %s3656_s28, %s3656_s28 }
 0x2c2   :  { %v2692_v4 = vmax.f32 %v2500_v39, 0.0  ;;  %p4500_p0 = scmp.ne.s32.totalorder %s3656_s28, %s4499_s4  ;;  %p4505_p2 = scmp.lt.s32.totalorder %s4499_s4, %s4499_s4 }
 0x2c3   :  { %v2693_v45 = vmax.f32 %v2501_v23, 0.0  ;;  %v3050_v28 = vpop.f32.mrb[196].mxu1 }
 0x2c4   :  { %v2797_v14 = vpack.c.bf16 %v2692_v4, %v2689_v24  ;;  %v3052_v5 = vpop.f32.mrb[197].mxu1  ;;  %v3051_v24 = vadd.f32 %v6080_v26, %v3050_v28  ;;  %p4506_p3 = por %p4505_p2, %p4504_p1 }
 0x2c5   :  { %v2798_v58 = vpack.c.bf16 %v2693_v45, %v2690_v61  ;;  %v1994_v43 = vpop.f32.mrb[116].mxu0  ;;  %v6059_v35 = vpop.f32.mrb[198].mxu1 }
 0x2c6   :  { %v2503_v20 = vadd.f32 %v5789_v7, %v1994_v43  ;;  %v1996_v15 = vpop.f32.mrb[117].mxu0  ;;  %v3055_v27 = vpop.f32.mrb[199].mxu1  ;;  %v3054_v5 = vadd.f32 %v6080_v26, %v6059_v35  ;;  %p4507_p4 = pnand %p4506_p3, %p4500_p0 }
 0x2c7   :  { %v2504_v47 = vadd.f32 %v5792_v46, %v1996_v15  ;;  %v1998_v49 = vpop.f32.mrb[118].mxu0  ;;  %3264 = vmatprep.mubr.bf16.mxu1 %v2798_v58  ;;  %v3046_v15 = vadd.f32 %v6080_v26, %v6053_v8 }
 0x2c8   :  { %v2506_v59 = vadd.f32 %v5789_v7, %v1998_v49  ;;  %v2000_v56 = vpop.f32.mrb[119].mxu0  ;;  %3265 = vmatmul.mubr.bf16.gmra.mrb[48].mxu1 %v2797_v14  ;;  %v2695_v33 = vmax.f32 %v2503_v20, 0.0 }
 0x2c9   :  { %v2507_v17 = vadd.f32 %v5792_v46, %v2000_v56  ;;  %v2696_v25 = vmax.f32 %v2504_v47, 0.0 }
 0x2ca   :  { %v2698_v63 = vmax.f32 %v2506_v59, 0.0 }
 0x2cb   :  { %v2699_v13 = vmax.f32 %v2507_v17, 0.0  ;;  %v6065_v48 = vpop.f32.mrb[200].mxu1 }
 0x2cc   :  { %v2800_v9 = vpack.c.bf16 %v2698_v63, %v2695_v33  ;;  %v3060_v10 = vpop.f32.mrb[201].mxu1  ;;  %v3059_v17 = vadd.f32 %v6080_v26, %v6065_v48 }
 0x2cd   :  { %v2801_v38 = vpack.c.bf16 %v2699_v13, %v2696_v25  ;;  %v2004_v44 = vpop.f32.mrb[120].mxu0  ;;  %v6067_v18 = vpop.f32.mrb[202].mxu1 }
 0x2ce   :  { %v2509_v3 = vadd.f32 %v5789_v7, %v2004_v44  ;;  %v2006_v52 = vpop.f32.mrb[121].mxu0  ;;  %v3063_v30 = vpop.f32.mrb[203].mxu1  ;;  %v3062_v10 = vadd.f32 %v6080_v26, %v6067_v18 }
 0x2cf   :  { %v2510_v57 = vadd.f32 %v5792_v46, %v2006_v52  ;;  %v2008_v36 = vpop.f32.mrb[122].mxu0  ;;  %3272 = vmatprep.mubr.bf16.mxu1 %v2801_v38 }
 0x2d0   :  { %v2512_v55 = vadd.f32 %v5789_v7, %v2008_v36  ;;  %v2010_v50 = vpop.f32.mrb[123].mxu0  ;;  %3273 = vmatmul.mubr.bf16.gmra.mrb[52].mxu1 %v2800_v9  ;;  %v2701_v2 = vmax.f32 %v2509_v3, 0.0 }
 0x2d1   :  { %v2513_v1 = vadd.f32 %v5792_v46, %v2010_v50  ;;  %v2702_v12 = vmax.f32 %v2510_v57, 0.0 }
 0x2d2   :  { %v2704_v29 = vmax.f32 %v2512_v55, 0.0 }
 0x2d3   :  { %v2705_v37 = vmax.f32 %v2513_v1, 0.0  ;;  %v3066_v40 = vpop.f32.mrb[204].mxu1 }
 0x2d4   :  { %v2803_v21 = vpack.c.bf16 %v2704_v29, %v2701_v2  ;;  %v3068_v32 = vpop.f32.mrb[205].mxu1  ;;  %v3067_v35 = vadd.f32 %v6080_v26, %v3066_v40 }
 0x2d5   :  { %v2804_v62 = vpack.c.bf16 %v2705_v37, %v2702_v12  ;;  %v2014_v11 = vpop.f32.mrb[124].mxu0  ;;  %v3069_v19 = vpop.f32.mrb[206].mxu1 }
 0x2d6   :  { %v2515_v22 = vadd.f32 %v5789_v7, %v2014_v11  ;;  %v2016_v16 = vpop.f32.mrb[125].mxu0  ;;  %v3071_v31 = vpop.f32.mrb[207].mxu1  ;;  %v3070_v63 = vadd.f32 %v6080_v26, %v3069_v19 }
 0x2d7   :  { %v2516_v60 = vadd.f32 %v5792_v46, %v2016_v16  ;;  %v2018_v42 = vpop.f32.mrb[126].mxu0  ;;  %3280 = vmatprep.mubr.bf16.mxu1 %v2804_v62 }
 0x2d8   :  { %v2518_v34 = vadd.f32 %v5789_v7, %v2018_v42  ;;  %v2020_v54 = vpop.f32.mrb[127].mxu0  ;;  %3281 = vmatmul.mubr.bf16.gmra.mrb[56].mxu1 %v2803_v21  ;;  %v2707_v51 = vmax.f32 %v2515_v22, 0.0  ;;  %v3043_v7 = vadd.f32 %v6080_v26, %v6051_v53 }
 0x2d9   :  { %v2519_v41 = vadd.f32 %v5792_v46, %v2020_v54  ;;  %v2708_v39 = vmax.f32 %v2516_v60, 0.0 }
 0x2da   :  { %v2710_v6 = vmax.f32 %v2518_v34, 0.0 }
 0x2db   :  { %v2711_v0 = vmax.f32 %v2519_v41, 0.0  ;;  %v3074_v23 = vpop.f32.mrb[208].mxu1 }
 0x2dc   :  { %v2806_v4 = vpack.c.bf16 %v2710_v6, %v2707_v51  ;;  %v3076_v61 = vpop.f32.mrb[209].mxu1  ;;  %v3075_v55 = vadd.f32 %v6080_v26, %v3074_v23 }
 0x2dd   :  { %v2807_v45 = vpack.c.bf16 %v2711_v0, %v2708_v39  ;;  %v3077_v14 = vpop.f32.mrb[210].mxu1  ;;  %v4108_v46 = vpop.f32.mrb[128].mxu0 }
 0x2de   :  { %v3340_v58 = vadd.f32 %v4108_v46, %v3051_v24  ;;  %v3079_v43 = vpop.f32.mrb[211].mxu1  ;;  %v3331_v20 = vpop.f32.mrb[129].mxu0  ;;  %v3078_v37 = vadd.f32 %v6080_v26, %v3077_v14 }
 0x2df   :  { %v3332_v27 = vadd.f32 %v3331_v20, %v3043_v7  ;;  %3288 = vmatprep.mubr.bf16.mxu1 %v2807_v45  ;;  %v4109_v28 = vpop.f32.mrb[130].mxu0 }
 0x2e0   :  { %3588 = vst [vmem:[#allocation2 + $0x10] sm:$0xff] %v3340_v58  ;;  %v3343_v47 = vadd.f32 %v4109_v28, %v3054_v5  ;;  %3289 = vmatmul.mubr.bf16.gmra.mrb[60].mxu1 %v2806_v4  ;;  %v3334_v49 = vpop.f32.mrb[131].mxu0 }
 0x2e1   :  { %3586 = vst [vmem:[#allocation2] sm:$0xff] %v3332_v27  ;;  %v3335_v53 = vadd.f32 %v3334_v49, %v3046_v15 }
 0x2e2   :  { %3589 = vst [vmem:[#allocation2 + $0x18] sm:$0xff] %v3343_v47 }
 0x2e3   :  { %3587 = vst [vmem:[#allocation2 + $0x8] sm:$0xff] %v3335_v53  ;;  %v3082_v59 = vpop.f32.mrb[212].mxu1 }
 0x2e4   :  { %v3084_v56 = vpop.f32.mrb[213].mxu1  ;;  %v3083_v57 = vadd.f32 %v6080_v26, %v3082_v59 }
 0x2e5   :  { %v3085_v33 = vpop.f32.mrb[214].mxu1  ;;  %v4112_v8 = vpop.f32.mrb[132].mxu0 }
 0x2e6   :  { %v3356_v25 = vadd.f32 %v4112_v8, %v3067_v35  ;;  %v3087_v13 = vpop.f32.mrb[215].mxu1  ;;  %v3347_v9 = vpop.f32.mrb[133].mxu0  ;;  %v3086_v2 = vadd.f32 %v6080_v26, %v3085_v33 }
 0x2e7   :  { %v3348_v38 = vadd.f32 %v3347_v9, %v3059_v17  ;;  %v4113_v44 = vpop.f32.mrb[134].mxu0 }
 0x2e8   :  { %3592 = vst [vmem:[#allocation2 + $0x30] sm:$0xff] %v3356_v25  ;;  %v3359_v3 = vadd.f32 %v4113_v44, %v3070_v63  ;;  %v3350_v52 = vpop.f32.mrb[135].mxu0 }
 0x2e9   :  { %3590 = vst [vmem:[#allocation2 + $0x20] sm:$0xff] %v3348_v38  ;;  %v3351_v30 = vadd.f32 %v3350_v52, %v3062_v10 }
 0x2ea   :  { %3593 = vst [vmem:[#allocation2 + $0x38] sm:$0xff] %v3359_v3 }
 0x2eb   :  { %3591 = vst [vmem:[#allocation2 + $0x28] sm:$0xff] %v3351_v30  ;;  %v3090_v48 = vpop.f32.mrb[216].mxu1 }
 0x2ec   :  { %v3092_v36 = vpop.f32.mrb[217].mxu1  ;;  %v3091_v31 = vadd.f32 %v6080_v26, %v3090_v48 }
 0x2ed   :  { %v3093_v50 = vpop.f32.mrb[218].mxu1  ;;  %v4116_v1 = vpop.f32.mrb[136].mxu0 }
 0x2ee   :  { %v3372_v18 = vadd.f32 %v4116_v1, %v3083_v57  ;;  %v3095_v29 = vpop.f32.mrb[219].mxu1  ;;  %v3363_v12 = vpop.f32.mrb[137].mxu0  ;;  %v3094_v6 = vadd.f32 %v6080_v26, %v3093_v50 }
 0x2ef   :  { %v3364_v40 = vadd.f32 %v3363_v12, %v3075_v55  ;;  %v4117_v21 = vpop.f32.mrb[138].mxu0 }
 0x2f0   :  { %3596 = vst [vmem:[#allocation2 + $0x50] sm:$0xff] %v3372_v18  ;;  %v3375_v32 = vadd.f32 %v4117_v21, %v3086_v2  ;;  %v3366_v62 = vpop.f32.mrb[139].mxu0 }
 0x2f1   :  { %3594 = vst [vmem:[#allocation2 + $0x40] sm:$0xff] %v3364_v40  ;;  %v3367_v11 = vadd.f32 %v3366_v62, %v3078_v37 }
 0x2f2   :  { %3597 = vst [vmem:[#allocation2 + $0x58] sm:$0xff] %v3375_v32 }
 0x2f3   :  { %3595 = vst [vmem:[#allocation2 + $0x48] sm:$0xff] %v3367_v11  ;;  %v3098_v19 = vpop.f32.mrb[220].mxu1 }
 0x2f4   :  { %v3099_v22 = vadd.f32 %v6080_v26, %v3098_v19  ;;  %v3100_v16 = vpop.f32.mrb[221].mxu1 }
 0x2f5   :  { %v3101_v60 = vpop.f32.mrb[222].mxu1  ;;  %v4120_v42 = vpop.f32.mrb[140].mxu0 }
 0x2f6   :  { %v3102_v34 = vadd.f32 %v6080_v26, %v3101_v60  ;;  %v3388_v54 = vadd.f32 %v4120_v42, %v3099_v22  ;;  %v3103_v41 = vpop.f32.mrb[223].mxu1  ;;  %v3379_v51 = vpop.f32.mrb[141].mxu0 }
 0x2f7   :  { %v3380_v39 = vadd.f32 %v3379_v51, %v3091_v31  ;;  %v4121_v0 = vpop.f32.mrb[142].mxu0 }
 0x2f8   :  { %3600 = vst [vmem:[#allocation2 + $0x70] sm:$0xff] %v3388_v54  ;;  %v3391_v23 = vadd.f32 %v4121_v0, %v3102_v34  ;;  %v3382_v24 = vpop.f32.mrb[143].mxu0 }
 0x2f9   :  { %3598 = vst [vmem:[#allocation2 + $0x60] sm:$0xff] %v3380_v39  ;;  %v3383_v4 = vadd.f32 %v3382_v24, %v3094_v6 }
 0x2fa   :  { %3601 = vst [vmem:[#allocation2 + $0x78] sm:$0xff] %v3391_v23 }
 0x2fb   :  { %3599 = vst [vmem:[#allocation2 + $0x68] sm:$0xff] %v3383_v4  ;;  %v3106_v61 = vpop.f32.mrb[224].mxu1 }
 0x2fc   :  { %v3107_v7 = vadd.f32 %v6080_v26, %v3106_v61  ;;  %v3108_v45 = vpop.f32.mrb[225].mxu1 }
 0x2fd   :  { %v3109_v14 = vpop.f32.mrb[226].mxu1  ;;  %v4124_v46 = vpop.f32.mrb[144].mxu0 }
 0x2fe   :  { %v3110_v5 = vadd.f32 %v6080_v26, %v3109_v14  ;;  %v3111_v58 = vpop.f32.mrb[227].mxu1  ;;  %v3395_v43 = vpop.f32.mrb[145].mxu0 }
 0x2ff   :  { %v3396_v20 = vadd.f32 %v3395_v43, %v3107_v7  ;;  %v4125_v15 = vpop.f32.mrb[146].mxu0 }
 0x300   :  { %v3398_v27 = vpop.f32.mrb[147].mxu0 }
 0x301   :  { %3602 = vst [vmem:[#allocation2 + $0x80] sm:$0xff] %v3396_v20  ;;  %v3399_v28 = vadd.f32 %v3398_v27, %v3110_v5 }
 0x303   :  { %3603 = vst [vmem:[#allocation2 + $0x88] sm:$0xff] %v3399_v28  ;;  %v3114_v47 = vpop.f32.mrb[228].mxu1 }
 0x304   :  { %v3115_v49 = vadd.f32 %v6080_v26, %v3114_v47  ;;  %v3116_v53 = vpop.f32.mrb[229].mxu1 }
 0x305   :  { %v3117_v59 = vpop.f32.mrb[230].mxu1  ;;  %v4128_v35 = vpop.f32.mrb[148].mxu0 }
 0x306   :  { %v3404_v56 = vadd.f32 %v4124_v46, %v3115_v49  ;;  %v3118_v17 = vadd.f32 %v6080_v26, %v3117_v59  ;;  %v3119_v33 = vpop.f32.mrb[231].mxu1  ;;  %v3411_v8 = vpop.f32.mrb[149].mxu0 }
 0x307   :  { %v4129_v63 = vpop.f32.mrb[150].mxu0 }
 0x308   :  { %3604 = vst [vmem:[#allocation2 + $0x90] sm:$0xff] %v3404_v56  ;;  %v3407_v25 = vadd.f32 %v4125_v15, %v3118_v17  ;;  %v3414_v13 = vpop.f32.mrb[151].mxu0 }
 0x30a   :  { %3605 = vst [vmem:[#allocation2 + $0x98] sm:$0xff] %v3407_v25 }
 0x30b   :  { %v3122_v9 = vpop.f32.mrb[232].mxu1 }
 0x30c   :  { %v3123_v10 = vadd.f32 %v6080_v26, %v3122_v9  ;;  %v3124_v38 = vpop.f32.mrb[233].mxu1 }
 0x30d   :  { %v3125_v44 = vpop.f32.mrb[234].mxu1  ;;  %v4132_v3 = vpop.f32.mrb[152].mxu0 }
 0x30e   :  { %v3412_v52 = vadd.f32 %v3411_v8, %v3123_v10  ;;  %v3126_v30 = vadd.f32 %v6080_v26, %v3125_v44  ;;  %v3127_v48 = vpop.f32.mrb[235].mxu1  ;;  %v3427_v57 = vpop.f32.mrb[153].mxu0 }
 0x30f   :  { %v4133_v36 = vpop.f32.mrb[154].mxu0 }
 0x310   :  { %3606 = vst [vmem:[#allocation2 + $0xa0] sm:$0xff] %v3412_v52  ;;  %v3415_v55 = vadd.f32 %v3414_v13, %v3126_v30  ;;  %v3430_v50 = vpop.f32.mrb[155].mxu0 }
 0x312   :  { %3607 = vst [vmem:[#allocation2 + $0xa8] sm:$0xff] %v3415_v55 }
 0x313   :  { %v3130_v1 = vpop.f32.mrb[236].mxu1 }
 0x314   :  { %v3131_v2 = vadd.f32 %v6080_v26, %v3130_v1  ;;  %v3132_v18 = vpop.f32.mrb[237].mxu1 }
 0x315   :  { %v3133_v29 = vpop.f32.mrb[238].mxu1  ;;  %v4136_v12 = vpop.f32.mrb[156].mxu0 }
 0x316   :  { %v3420_v37 = vadd.f32 %v4128_v35, %v3131_v2  ;;  %v3134_v40 = vadd.f32 %v6080_v26, %v3133_v29  ;;  %v3135_v21 = vpop.f32.mrb[239].mxu1  ;;  %v3443_v32 = vpop.f32.mrb[157].mxu0 }
 0x317   :  { %v4137_v62 = vpop.f32.mrb[158].mxu0 }
 0x318   :  { %3608 = vst [vmem:[#allocation2 + $0xb0] sm:$0xff] %v3420_v37  ;;  %v3423_v11 = vadd.f32 %v4129_v63, %v3134_v40  ;;  %v3446_v19 = vpop.f32.mrb[159].mxu0 }
 0x31a   :  { %3609 = vst [vmem:[#allocation2 + $0xb8] sm:$0xff] %v3423_v11 }
 0x31b   :  { %v3138_v22 = vpop.f32.mrb[240].mxu1 }
 0x31c   :  { %v3139_v16 = vadd.f32 %v6080_v26, %v3138_v22  ;;  %v3140_v31 = vpop.f32.mrb[241].mxu1 }
 0x31d   :  { %v3141_v60 = vpop.f32.mrb[242].mxu1  ;;  %v6112_v42 = vpop.f32.mrb[160].mxu0 }
 0x31e   :  { %v3428_v34 = vadd.f32 %v3427_v57, %v3139_v16  ;;  %v3142_v54 = vadd.f32 %v6080_v26, %v3141_v60  ;;  %v3143_v41 = vpop.f32.mrb[243].mxu1  ;;  %v3459_v51 = vpop.f32.mrb[161].mxu0 }
 0x31f   :  { %v6115_v6 = vpop.f32.mrb[162].mxu0 }
 0x320   :  { %3610 = vst [vmem:[#allocation2 + $0xc0] sm:$0xff] %v3428_v34  ;;  %v3431_v39 = vadd.f32 %v3430_v50, %v3142_v54  ;;  %v3462_v0 = vpop.f32.mrb[163].mxu0 }
 0x322   :  { %3611 = vst [vmem:[#allocation2 + $0xc8] sm:$0xff] %v3431_v39 }
 0x323   :  { %v3146_v23 = vpop.f32.mrb[244].mxu1 }
 0x324   :  { %v3147_v24 = vadd.f32 %v6080_v26, %v3146_v23  ;;  %v3148_v4 = vpop.f32.mrb[245].mxu1 }
 0x325   :  { %v3149_v61 = vpop.f32.mrb[246].mxu1  ;;  %v6118_v7 = vpop.f32.mrb[164].mxu0 }
 0x326   :  { %v3436_v45 = vadd.f32 %v4132_v3, %v3147_v24  ;;  %v3150_v14 = vadd.f32 %v6080_v26, %v3149_v61  ;;  %v3151_v46 = vpop.f32.mrb[247].mxu1  ;;  %v6121_v5 = vpop.f32.mrb[165].mxu0 }
 0x327   :  { %v6123_v58 = vpop.f32.mrb[166].mxu0 }
 0x328   :  { %3612 = vst [vmem:[#allocation2 + $0xd0] sm:$0xff] %v3436_v45  ;;  %v3439_v43 = vadd.f32 %v4133_v36, %v3150_v14  ;;  %v6125_v20 = vpop.f32.mrb[167].mxu0 }
 0x32a   :  { %3613 = vst [vmem:[#allocation2 + $0xd8] sm:$0xff] %v3439_v43 }
 0x32b   :  { %v3154_v15 = vpop.f32.mrb[248].mxu1 }
 0x32c   :  { %v3155_v27 = vadd.f32 %v6080_v26, %v3154_v15  ;;  %v3156_v28 = vpop.f32.mrb[249].mxu1 }
 0x32d   :  { %v3157_v47 = vpop.f32.mrb[250].mxu1  ;;  %v6128_v49 = vpop.f32.mrb[168].mxu0 }
 0x32e   :  { %v3444_v53 = vadd.f32 %v3443_v32, %v3155_v27  ;;  %v3158_v59 = vadd.f32 %v6080_v26, %v3157_v47  ;;  %v3159_v35 = vpop.f32.mrb[251].mxu1  ;;  %v6131_v56 = vpop.f32.mrb[169].mxu0 }
 0x32f   :  { %v6133_v17 = vpop.f32.mrb[170].mxu0 }
 0x330   :  { %3614 = vst [vmem:[#allocation2 + $0xe0] sm:$0xff] %v3444_v53  ;;  %v3447_v33 = vadd.f32 %v3446_v19, %v3158_v59  ;;  %v6135_v8 = vpop.f32.mrb[171].mxu0 }
 0x332   :  { %3615 = vst [vmem:[#allocation2 + $0xe8] sm:$0xff] %v3447_v33 }
 0x333   :  { %v3162_v63 = vpop.f32.mrb[252].mxu1 }
 0x334   :  { %v3163_v25 = vadd.f32 %v6080_v26, %v3162_v63  ;;  %v3164_v13 = vpop.f32.mrb[253].mxu1 }
 0x335   :  { %v3165_v9 = vpop.f32.mrb[254].mxu1  ;;  %v6138_v10 = vpop.f32.mrb[172].mxu0 }
 0x336   :  { %v3452_v38 = vadd.f32 %v4136_v12, %v3163_v25  ;;  %v3166_v44 = vadd.f32 %v6080_v26, %v3165_v9  ;;  %v3167_v3 = vpop.f32.mrb[255].mxu1  ;;  %v6141_v52 = vpop.f32.mrb[173].mxu0 }
 0x337   :  { %v6143_v30 = vpop.f32.mrb[174].mxu0 }
 0x338   :  { %3616 = vst [vmem:[#allocation2 + $0xf0] sm:$0xff] %v3452_v38  ;;  %v3455_v48 = vadd.f32 %v4137_v62, %v3166_v44  ;;  %v6145_v57 = vpop.f32.mrb[175].mxu0 }
 0x33a   :  { %3617 = vst [vmem:[#allocation2 + $0xf8] sm:$0xff] %v3455_v48 }
 0x33b   :  { %v3170_v36 = vpop.f32.mrb[0].mxu1 }
 0x33c   :  { %v3171_v55 = vadd.f32 %v6080_v26, %v3170_v36  ;;  %v3172_v50 = vpop.f32.mrb[1].mxu1 }
 0x33d   :  { %v3173_v1 = vpop.f32.mrb[2].mxu1  ;;  %v6148_v2 = vpop.f32.mrb[176].mxu0 }
 0x33e   :  { %v3460_v18 = vadd.f32 %v3459_v51, %v3171_v55  ;;  %v3174_v29 = vadd.f32 %v6080_v26, %v3173_v1  ;;  %v3175_v12 = vpop.f32.mrb[3].mxu1  ;;  %v6151_v37 = vpop.f32.mrb[177].mxu0 }
 0x33f   :  { %v6153_v40 = vpop.f32.mrb[178].mxu0 }
 0x340   :  { %3618 = vst [vmem:[#allocation2 + $0x100] sm:$0xff] %v3460_v18  ;;  %v3463_v21 = vadd.f32 %v3462_v0, %v3174_v29  ;;  %v6155_v32 = vpop.f32.mrb[179].mxu0 }
 0x342   :  { %3619 = vst [vmem:[#allocation2 + $0x108] sm:$0xff] %v3463_v21 }
 0x343   :  { %v3178_v62 = vpop.f32.mrb[4].mxu1 }
 0x344   :  { %v3179_v11 = vadd.f32 %v6080_v26, %v3178_v62  ;;  %v3180_v19 = vpop.f32.mrb[5].mxu1 }
 0x345   :  { %v3181_v22 = vpop.f32.mrb[6].mxu1  ;;  %v6158_v16 = vpop.f32.mrb[180].mxu0 }
 0x346   :  { %v3468_v31 = vadd.f32 %v6112_v42, %v3179_v11  ;;  %v3182_v60 = vadd.f32 %v6080_v26, %v3181_v22  ;;  %v3183_v34 = vpop.f32.mrb[7].mxu1  ;;  %v6162_v54 = vpop.f32.mrb[181].mxu0 }
 0x347   :  { %v6164_v41 = vpop.f32.mrb[182].mxu0 }
 0x348   :  { %3620 = vst [vmem:[#allocation2 + $0x110] sm:$0xff] %v3468_v31  ;;  %v3471_v51 = vadd.f32 %v6115_v6, %v3182_v60  ;;  %v6167_v39 = vpop.f32.mrb[183].mxu0 }
 0x34a   :  { %3621 = vst [vmem:[#allocation2 + $0x118] sm:$0xff] %v3471_v51 }
 0x34b   :  { %v3186_v0 = vpop.f32.mrb[8].mxu1 }
 0x34c   :  { %v3187_v23 = vadd.f32 %v6080_v26, %v3186_v0  ;;  %v3188_v24 = vpop.f32.mrb[9].mxu1 }
 0x34d   :  { %v3189_v4 = vpop.f32.mrb[10].mxu1  ;;  %v6170_v61 = vpop.f32.mrb[184].mxu0 }
 0x34e   :  { %v3476_v42 = vadd.f32 %v6121_v5, %v3187_v23  ;;  %v3190_v45 = vadd.f32 %v6080_v26, %v3189_v4  ;;  %v3191_v14 = vpop.f32.mrb[11].mxu1  ;;  %v6174_v46 = vpop.f32.mrb[185].mxu0 }
 0x34f   :  { %v6176_v43 = vpop.f32.mrb[186].mxu0 }
 0x350   :  { %3622 = vst [vmem:[#allocation2 + $0x120] sm:$0xff] %v3476_v42  ;;  %v3479_v6 = vadd.f32 %v6125_v20, %v3190_v45  ;;  %v6179_v15 = vpop.f32.mrb[187].mxu0 }
 0x352   :  { %3623 = vst [vmem:[#allocation2 + $0x128] sm:$0xff] %v3479_v6 }
 0x353   :  { %v3194_v27 = vpop.f32.mrb[12].mxu1 }
 0x354   :  { %v3195_v28 = vadd.f32 %v6080_v26, %v3194_v27  ;;  %v3196_v47 = vpop.f32.mrb[13].mxu1 }
 0x355   :  { %v3197_v53 = vpop.f32.mrb[14].mxu1  ;;  %v6182_v59 = vpop.f32.mrb[188].mxu0 }
 0x356   :  { %v3484_v5 = vadd.f32 %v6118_v7, %v3195_v28  ;;  %v3198_v35 = vadd.f32 %v6080_v26, %v3197_v53  ;;  %v3199_v33 = vpop.f32.mrb[15].mxu1  ;;  %v6186_v63 = vpop.f32.mrb[189].mxu0 }
 0x357   :  { %v6188_v25 = vpop.f32.mrb[190].mxu0 }
 0x358   :  { %3624 = vst [vmem:[#allocation2 + $0x130] sm:$0xff] %v3484_v5  ;;  %v3487_v20 = vadd.f32 %v6123_v58, %v3198_v35  ;;  %v6191_v13 = vpop.f32.mrb[191].mxu0 }
 0x35a   :  { %3625 = vst [vmem:[#allocation2 + $0x138] sm:$0xff] %v3487_v20 }
 0x35b   :  { %v3202_v9 = vpop.f32.mrb[16].mxu1 }
 0x35c   :  { %v3203_v38 = vadd.f32 %v6080_v26, %v3202_v9  ;;  %v3204_v44 = vpop.f32.mrb[17].mxu1 }
 0x35d   :  { %v3205_v3 = vpop.f32.mrb[18].mxu1 }
 0x35e   :  { %v3492_v7 = vadd.f32 %v6131_v56, %v3203_v38  ;;  %v3206_v48 = vadd.f32 %v6080_v26, %v3205_v3  ;;  %v3207_v36 = vpop.f32.mrb[19].mxu1 }
 0x360   :  { %3626 = vst [vmem:[#allocation2 + $0x140] sm:$0xff] %v3492_v7  ;;  %v3495_v55 = vadd.f32 %v6135_v8, %v3206_v48 }
 0x362   :  { %3627 = vst [vmem:[#allocation2 + $0x148] sm:$0xff] %v3495_v55 }
 0x363   :  { %v3210_v50 = vpop.f32.mrb[20].mxu1 }
 0x364   :  { %v3211_v58 = vadd.f32 %v6080_v26, %v3210_v50  ;;  %v3212_v1 = vpop.f32.mrb[21].mxu1 }
 0x365   :  { %v3213_v18 = vpop.f32.mrb[22].mxu1 }
 0x366   :  { %v3500_v29 = vadd.f32 %v6128_v49, %v3211_v58  ;;  %v3214_v12 = vadd.f32 %v6080_v26, %v3213_v18  ;;  %v3215_v21 = vpop.f32.mrb[23].mxu1 }
 0x368   :  { %3628 = vst [vmem:[#allocation2 + $0x150] sm:$0xff] %v3500_v29  ;;  %v3503_v56 = vadd.f32 %v6133_v17, %v3214_v12 }
 0x36a   :  { %3629 = vst [vmem:[#allocation2 + $0x158] sm:$0xff] %v3503_v56 }
 0x36b   :  { %v3218_v62 = vpop.f32.mrb[24].mxu1 }
 0x36c   :  { %v3219_v11 = vadd.f32 %v6080_v26, %v3218_v62  ;;  %v3220_v19 = vpop.f32.mrb[25].mxu1 }
 0x36d   :  { %v3221_v8 = vpop.f32.mrb[26].mxu1 }
 0x36e   :  { %v3508_v22 = vadd.f32 %v6141_v52, %v3219_v11  ;;  %v3222_v31 = vadd.f32 %v6080_v26, %v3221_v8  ;;  %v3223_v60 = vpop.f32.mrb[27].mxu1 }
 0x370   :  { %3630 = vst [vmem:[#allocation2 + $0x160] sm:$0xff] %v3508_v22  ;;  %v3511_v49 = vadd.f32 %v6145_v57, %v3222_v31 }
 0x372   :  { %3631 = vst [vmem:[#allocation2 + $0x168] sm:$0xff] %v3511_v49 }
 0x373   :  { %v3226_v34 = vpop.f32.mrb[28].mxu1 }
 0x374   :  { %v3227_v51 = vadd.f32 %v6080_v26, %v3226_v34  ;;  %v3228_v0 = vpop.f32.mrb[29].mxu1 }
 0x375   :  { %v3229_v17 = vpop.f32.mrb[30].mxu1 }
 0x376   :  { %v3516_v23 = vadd.f32 %v6138_v10, %v3227_v51  ;;  %v3230_v24 = vadd.f32 %v6080_v26, %v3229_v17  ;;  %v3231_v4 = vpop.f32.mrb[31].mxu1 }
 0x378   :  { %3632 = vst [vmem:[#allocation2 + $0x170] sm:$0xff] %v3516_v23  ;;  %v3519_v52 = vadd.f32 %v6143_v30, %v3230_v24 }
 0x37a   :  { %3633 = vst [vmem:[#allocation2 + $0x178] sm:$0xff] %v3519_v52 }
 0x37b   :  { %v3234_v42 = vpop.f32.mrb[32].mxu1 }
 0x37c   :  { %v3235_v45 = vadd.f32 %v6080_v26, %v3234_v42  ;;  %v3236_v14 = vpop.f32.mrb[33].mxu1 }
 0x37d   :  { %v3237_v57 = vpop.f32.mrb[34].mxu1 }
 0x37e   :  { %v3524_v6 = vadd.f32 %v6151_v37, %v3235_v45  ;;  %v3238_v27 = vadd.f32 %v6080_v26, %v3237_v57  ;;  %v3239_v28 = vpop.f32.mrb[35].mxu1 }
 0x380   :  { %3634 = vst [vmem:[#allocation2 + $0x180] sm:$0xff] %v3524_v6  ;;  %v3527_v10 = vadd.f32 %v6155_v32, %v3238_v27 }
 0x382   :  { %3635 = vst [vmem:[#allocation2 + $0x188] sm:$0xff] %v3527_v10 }
 0x383   :  { %v3242_v47 = vpop.f32.mrb[36].mxu1 }
 0x384   :  { %v3243_v53 = vadd.f32 %v6080_v26, %v3242_v47  ;;  %v3244_v5 = vpop.f32.mrb[37].mxu1 }
 0x385   :  { %v3245_v30 = vpop.f32.mrb[38].mxu1 }
 0x386   :  { %v3532_v35 = vadd.f32 %v6148_v2, %v3243_v53  ;;  %v3246_v33 = vadd.f32 %v6080_v26, %v3245_v30  ;;  %v3247_v20 = vpop.f32.mrb[39].mxu1 }
 0x388   :  { %3636 = vst [vmem:[#allocation2 + $0x190] sm:$0xff] %v3532_v35  ;;  %v3535_v37 = vadd.f32 %v6153_v40, %v3246_v33 }
 0x38a   :  { %3637 = vst [vmem:[#allocation2 + $0x198] sm:$0xff] %v3535_v37 }
 0x38b   :  { %v3250_v9 = vpop.f32.mrb[40].mxu1 }
 0x38c   :  { %v3251_v38 = vadd.f32 %v6080_v26, %v3250_v9  ;;  %v3252_v44 = vpop.f32.mrb[41].mxu1 }
 0x38d   :  { %v3253_v32 = vpop.f32.mrb[42].mxu1 }
 0x38e   :  { %v3540_v3 = vadd.f32 %v6162_v54, %v3251_v38  ;;  %v3254_v7 = vadd.f32 %v6080_v26, %v3253_v32  ;;  %v3255_v48 = vpop.f32.mrb[43].mxu1 }
 0x390   :  { %3638 = vst [vmem:[#allocation2 + $0x1a0] sm:$0xff] %v3540_v3  ;;  %v3543_v2 = vadd.f32 %v6167_v39, %v3254_v7 }
 0x392   :  { %3639 = vst [vmem:[#allocation2 + $0x1a8] sm:$0xff] %v3543_v2 }
 0x393   :  { %v3258_v36 = vpop.f32.mrb[44].mxu1 }
 0x394   :  { %v3259_v55 = vadd.f32 %v6080_v26, %v3258_v36  ;;  %v3260_v50 = vpop.f32.mrb[45].mxu1 }
 0x395   :  { %v3261_v40 = vpop.f32.mrb[46].mxu1 }
 0x396   :  { %v3548_v58 = vadd.f32 %v6158_v16, %v3259_v55  ;;  %v3262_v1 = vadd.f32 %v6080_v26, %v3261_v40  ;;  %v3263_v18 = vpop.f32.mrb[47].mxu1 }
 0x398   :  { %3640 = vst [vmem:[#allocation2 + $0x1b0] sm:$0xff] %v3548_v58  ;;  %v3551_v54 = vadd.f32 %v6164_v41, %v3262_v1 }
 0x39a   :  { %3641 = vst [vmem:[#allocation2 + $0x1b8] sm:$0xff] %v3551_v54 }
 0x39b   :  { %v3266_v29 = vpop.f32.mrb[48].mxu1 }
 0x39c   :  { %v3267_v12 = vadd.f32 %v6080_v26, %v3266_v29  ;;  %v3268_v21 = vpop.f32.mrb[49].mxu1 }
 0x39d   :  { %v3269_v39 = vpop.f32.mrb[50].mxu1 }
 0x39e   :  { %v3556_v56 = vadd.f32 %v6174_v46, %v3267_v12  ;;  %v3270_v62 = vadd.f32 %v6080_v26, %v3269_v39  ;;  %v3271_v11 = vpop.f32.mrb[51].mxu1 }
 0x3a0   :  { %3642 = vst [vmem:[#allocation2 + $0x1c0] sm:$0xff] %v3556_v56  ;;  %v3559_v16 = vadd.f32 %v6179_v15, %v3270_v62 }
 0x3a2   :  { %3643 = vst [vmem:[#allocation2 + $0x1c8] sm:$0xff] %v3559_v16 }
 0x3a3   :  { %v3274_v19 = vpop.f32.mrb[52].mxu1 }
 0x3a4   :  { %v3275_v8 = vadd.f32 %v6080_v26, %v3274_v19  ;;  %v3276_v22 = vpop.f32.mrb[53].mxu1 }
 0x3a5   :  { %v3277_v41 = vpop.f32.mrb[54].mxu1 }
 0x3a6   :  { %v3564_v31 = vadd.f32 %v6170_v61, %v3275_v8  ;;  %v3278_v60 = vadd.f32 %v6080_v26, %v3277_v41  ;;  %v3279_v49 = vpop.f32.mrb[55].mxu1 }
 0x3a8   :  { %3644 = vst [vmem:[#allocation2 + $0x1d0] sm:$0xff] %v3564_v31  ;;  %v3567_v46 = vadd.f32 %v6176_v43, %v3278_v60 }
 0x3aa   :  { %3645 = vst [vmem:[#allocation2 + $0x1d8] sm:$0xff] %v3567_v46 }
 0x3ab   :  { %v3282_v34 = vpop.f32.mrb[56].mxu1 }
 0x3ac   :  { %v3283_v51 = vadd.f32 %v6080_v26, %v3282_v34  ;;  %v3284_v0 = vpop.f32.mrb[57].mxu1 }
 0x3ad   :  { %v3285_v15 = vpop.f32.mrb[58].mxu1 }
 0x3ae   :  { %v3572_v17 = vadd.f32 %v6186_v63, %v3283_v51  ;;  %v3286_v23 = vadd.f32 %v6080_v26, %v3285_v15  ;;  %v3287_v24 = vpop.f32.mrb[59].mxu1 }
 0x3b0   :  { %3646 = vst [vmem:[#allocation2 + $0x1e0] sm:$0xff] %v3572_v17  ;;  %v3575_v61 = vadd.f32 %v6191_v13, %v3286_v23 }
 0x3b2   :  { %3647 = vst [vmem:[#allocation2 + $0x1e8] sm:$0xff] %v3575_v61 }
 0x3b3   :  { %v3290_v4 = vpop.f32.mrb[60].mxu1 }
 0x3b4   :  { %v3291_v52 = vadd.f32 %v6080_v26, %v3290_v4  ;;  %v3292_v42 = vpop.f32.mrb[61].mxu1 }
 0x3b5   :  { %v3293_v43 = vpop.f32.mrb[62].mxu1 }
 0x3b6   :  { %v3580_v45 = vadd.f32 %v6182_v59, %v3291_v52  ;;  %v3294_v14 = vadd.f32 %v6080_v26, %v3293_v43  ;;  %v3295_v57 = vpop.f32.mrb[63].mxu1 }
 0x3b8   :  { %3648 = vst [vmem:[#allocation2 + $0x1f0] sm:$0xff] %v3580_v45  ;;  %v3583_v63 = vadd.f32 %v6188_v25, %v3294_v14 }
 0x3ba   :  { %3649 = vst [vmem:[#allocation2 + $0x1f8] sm:$0xff] %v3583_v63 }
 0x3bb   :  { %4510 = shalt.err (!%p4507_p4)
}
 0x3bc   :  { %s4511_s8 = scalar_lea.hbm %s6260_s7, 8192 }
 0x3bd   :  { %p4512_p5 = scmp.ne.s32.totalorder %s6260_s7, %s4511_s8  ;;  %p4515_p6 = scmp.lt.u32.totalorder %s4511_s8, %s6260_s7 }
 0x3bf   :  { %p4517_p7 = pnand %p4515_p6, %p4512_p5 }
 0x3c1   :  { %4520 = shalt.err (!%p4517_p7)
}
 0x3c2   :  { %s4526_s1 = smov 128   ;;  %s4527_s13 = smov 8  }
 0x3c3   :  { %3661 = dma.vmem_to_hbm [thread:$0]  %s3656_s28, 8192, %s6260_s7, [#allocation3], %s4526_s1, %s4526_s1, %s4527_s13  }
 0x3c4   :  { %4521 = dma.done.wait [#allocation3], 8192  }
 0x3c5   :  { %4522 = vsyncadd [#allocation3], 4294959104 }
 0x3c6   :  { %3665 = vsyncpa [#allocation3], 1 }

</bundles_post_ra>
